<compile_context>
chip_gen: v7x
topology: tpu7x:2x2x1
jax: 0.10.0
libtpu: 0.0.40
codegen_flags: <defaults>
</compile_context>

<pallas_src>
import functools

import jax
import jax.numpy as jnp
from jax import lax
from jax.experimental import pallas as pl
from jax.experimental.pallas import tpu as pltpu


def _round_up(x, m):
    return ((x + m - 1) // m) * m


def _encoder_lstm_kernel(xg0_ref, whh_ref, wih_ref, b_ref,
                         h_out_ref, c_out_ref,
                         h_scr, c_scr, act_scr, xg_scr,
                         *, n_layers, t_block, seq_len, hp):
    """Fused multi-layer LSTM recurrence over one block of `t_block` steps.

    xg0_ref : (Tb, BP, 4*HP) f32  precomputed x @ W_ih^T + b for layer 0
    whh_ref : (L,  HP, 4*HP) bf16 recurrent weights (gate slabs lane-aligned)
    wih_ref : (max(L-1,1), HP, 4*HP) bf16 input weights for layers 1..L-1
    b_ref   : (max(L-1,1), BP, 4*HP) f32  biases for layers 1..L-1
    h_out_ref / c_out_ref : (L, BP, HP) f32 final states (written last block)
    h_scr / c_scr : (L, BP, HP) f32 resident recurrent state
    act_scr : (Tb, BP, HP)   f32 layer->layer activations within the block
    xg_scr  : (Tb, BP, 4*HP) f32 gate pre-activations for layers > 0
    """
    tb_idx = pl.program_id(0)
    HP = hp
    needs_mask = (seq_len % t_block) != 0

    @pl.when(tb_idx == 0)
    def _():
        h_scr[...] = jnp.zeros_like(h_scr)
        c_scr[...] = jnp.zeros_like(c_scr)

    def run_layer(src_ref, layer, write_act):
        whh = whh_ref[layer]  # (HP, 4*HP) bf16, hoisted out of the time loop

        def step(tt, carry):
            xg = src_ref[tt]                       # (BP, 4*HP) f32
            h = h_scr[layer]                       # (BP, HP)   f32
            c = c_scr[layer]
            gates = xg + jnp.dot(h.astype(jnp.bfloat16), whh,
                                 preferred_element_type=jnp.float32)
            # PyTorch gate order [i, f, g, o]; slabs are lane-aligned (HP=128k).
            i_g = jax.nn.sigmoid(gates[:, 0 * HP:1 * HP])
            f_g = jax.nn.sigmoid(gates[:, 1 * HP:2 * HP])
            g_g = jnp.tanh(gates[:, 2 * HP:3 * HP])
            o_g = jax.nn.sigmoid(gates[:, 3 * HP:4 * HP])
            c_new = f_g * c + i_g * g_g
            h_new = o_g * jnp.tanh(c_new)
            if needs_mask:  # only when T was padded up to a multiple of Tb
                valid = (tb_idx * t_block + tt) < seq_len
                h_new = jnp.where(valid, h_new, h)
                c_new = jnp.where(valid, c_new, c)
            h_scr[layer] = h_new
            c_scr[layer] = c_new
            if write_act:
                act_scr[tt] = h_new
            return carry

        lax.fori_loop(0, t_block, step, 0, unroll=True)

    for layer in range(n_layers):  # static python loop over layers
        if layer == 0:
            src_ref = xg0_ref
        else:
            # Hoisted input GEMM for this layer: all Tb timesteps at once.
            bp = act_scr.shape[1]
            acts = act_scr[...].astype(jnp.bfloat16).reshape(t_block * bp, HP)
            g = jnp.dot(acts, wih_ref[layer - 1],
                        preferred_element_type=jnp.float32)
            xg_scr[...] = g.reshape(t_block, bp, 4 * HP) + b_ref[layer - 1]
            src_ref = xg_scr
        run_layer(src_ref, layer, write_act=(layer < n_layers - 1))

    @pl.when(tb_idx == pl.num_programs(0) - 1)
    def _():
        h_out_ref[...] = h_scr[...]
        c_out_ref[...] = c_scr[...]


def _pad_gates(w_t, H, HP):
    """(in_dim, 4H) -> (HP, 4*HP): each H-wide gate slab placed at lane k*HP,
    contraction dim zero-padded to HP (so padded h lanes contribute nothing)."""
    in_dim = w_t.shape[0]
    w4 = w_t.reshape(in_dim, 4, H)
    out = jnp.zeros((HP, 4, HP), w_t.dtype).at[:in_dim, :, :H].set(w4)
    return out.reshape(HP, 4 * HP)


def _pad_bias(b, H, HP, BP):
    """(4H,) -> (BP, 4*HP) with gate slabs at lane offsets k*HP."""
    b4 = b.reshape(4, H)
    out = jnp.zeros((4, HP), b.dtype).at[:, :H].set(b4)
    return jnp.broadcast_to(out.reshape(1, 4 * HP), (BP, 4 * HP))


def encoder_forward(params, src, *, t_block=16):
    """src: [seq_len, batch] int32 -> (hidden, cell), each [n_layers, B, H]."""
    embedding = params["embedding"]
    lstm_params = params["lstm"]
    n_layers = len(lstm_params)
    T, B = src.shape
    H = lstm_params[0][1].shape[1]          # w_hh: (4H, H)

    if T == 0:
        z = jnp.zeros((n_layers, B, H), jnp.float32)
        return z, z

    # Embedding gather + dropout (identity in eval mode) are XLA glue.
    # TODO(synk): training-mode dropout (random masks) not implemented; eval semantics used.
    embedded = jnp.take(embedding, src, axis=0).astype(jnp.float32)  # (T,B,E)
    E = embedded.shape[-1]

    BP = _round_up(B, 8)         # sublane padding
    HP = _round_up(H, 128)       # lane padding (gate slab width)
    Tb = max(1, min(t_block, T))
    T_pad = _round_up(T, Tb)
    nl1 = max(n_layers - 1, 1)

    # ---- hoisted layer-0 input GEMM: one big (T*B, E) x (E, 4H) matmul ----
    w_ih0, _, b_ih0, b_hh0 = lstm_params[0]
    bias0 = (b_ih0 + b_hh0).astype(jnp.float32)
    xg0 = jnp.dot(embedded.reshape(T * B, E), w_ih0.T.astype(jnp.float32),
                  preferred_element_type=jnp.float32) + bias0       # (T*B, 4H)
    xg0 = xg0.reshape(T, B, 4, H)
    xg0_p = jnp.zeros((T_pad, BP, 4, HP), jnp.float32)
    xg0_p = xg0_p.at[:T, :B, :, :H].set(xg0).reshape(T_pad, BP, 4 * HP)

    # ---- padded, gate-slab-aligned recurrent weights (bf16 on the MXU) ----
    whh_all = jnp.stack([
        _pad_gates(w_hh.T.astype(jnp.float32), H, HP)
        for (_, w_hh, _, _) in lstm_params
    ]).astype(jnp.bfloat16)                                          # (L,HP,4HP)

    if n_layers > 1:
        wih_rest = jnp.stack([
            _pad_gates(w_ih.T.astype(jnp.float32), H, HP)
            for (w_ih, _, _, _) in lstm_params[1:]
        ]).astype(jnp.bfloat16)                                      # (L-1,HP,4HP)
        b_rest = jnp.stack([
            _pad_bias((b_ih + b_hh).astype(jnp.float32), H, HP, BP)
            for (_, _, b_ih, b_hh) in lstm_params[1:]
        ])                                                           # (L-1,BP,4HP)
    else:
        wih_rest = jnp.zeros((1, HP, 4 * HP), jnp.bfloat16)
        b_rest = jnp.zeros((1, BP, 4 * HP), jnp.float32)

    kernel = functools.partial(_encoder_lstm_kernel,
                               n_layers=n_layers, t_block=Tb,
                               seq_len=T, hp=HP)

    # TODO(synk): for production-sized H (>=1024) on v7x (64 MiB VMEM), tile
    # the 4*HP gate axis with a second grid axis instead of keeping whole
    # weight slabs resident.
    grid_spec = pltpu.PrefetchScalarGridSpec(
        num_scalar_prefetch=0,
        grid=(T_pad // Tb,),
        in_specs=[
            pl.BlockSpec((Tb, BP, 4 * HP), lambda t: (t, 0, 0)),
            pl.BlockSpec((n_layers, HP, 4 * HP), lambda t: (0, 0, 0)),
            pl.BlockSpec((nl1, HP, 4 * HP), lambda t: (0, 0, 0)),
            pl.BlockSpec((nl1, BP, 4 * HP), lambda t: (0, 0, 0)),
        ],
        out_specs=[
            pl.BlockSpec((n_layers, BP, HP), lambda t: (0, 0, 0)),
            pl.BlockSpec((n_layers, BP, HP), lambda t: (0, 0, 0)),
        ],
        scratch_shapes=[
            pltpu.VMEM((n_layers, BP, HP), jnp.float32),   # h state per layer
            pltpu.VMEM((n_layers, BP, HP), jnp.float32),   # c state per layer
            pltpu.VMEM((Tb, BP, HP), jnp.float32),         # inter-layer acts
            pltpu.VMEM((Tb, BP, 4 * HP), jnp.float32),     # gate preacts l>0
        ],
    )

    h_pad, c_pad = pl.pallas_call(
        kernel,
        out_shape=(jax.ShapeDtypeStruct((n_layers, BP, HP), jnp.float32),
                   jax.ShapeDtypeStruct((n_layers, BP, HP), jnp.float32)),
        grid_spec=grid_spec,
        compiler_params=pltpu.CompilerParams(
            dimension_semantics=("arbitrary",)),   # time recurrence is serial
    )(xg0_p, whh_all, wih_rest, b_rest)

    return h_pad[:, :B, :H], c_pad[:, :B, :H]


def init_encoder_params(key, input_dim, embedding_dim, hidden_dim, n_layers):
    """Deterministic parameter init mirroring the nn.Module shapes."""
    keys = jax.random.split(key, 1 + 4 * n_layers)
    params = {
        "embedding": jax.random.normal(
            keys[0], (input_dim, embedding_dim), jnp.float32) * 0.1,
        "lstm": [],
    }
    k = 1
    for layer in range(n_layers):
        in_dim = embedding_dim if layer == 0 else hidden_dim
        scale = 1.0 / jnp.sqrt(jnp.float32(hidden_dim))
        w_ih = jax.random.uniform(keys[k], (4 * hidden_dim, in_dim),
                                  jnp.float32, -scale, scale); k += 1
        w_hh = jax.random.uniform(keys[k], (4 * hidden_dim, hidden_dim),
                                  jnp.float32, -scale, scale); k += 1
        b_ih = jax.random.uniform(keys[k], (4 * hidden_dim,),
                                  jnp.float32, -scale, scale); k += 1
        b_hh = jax.random.uniform(keys[k], (4 * hidden_dim,),
                                  jnp.float32, -scale, scale); k += 1
        params["lstm"].append((w_ih, w_hh, b_ih, b_hh))
    return params


def _encoder_reference(params, src):
    """Pure-JAX (lax.scan) reference for correctness."""
    x = jnp.take(params["embedding"], src, axis=0).astype(jnp.float32)
    hs, cs = [], []
    for (w_ih, w_hh, b_ih, b_hh) in params["lstm"]:
        H = w_hh.shape[1]
        B = x.shape[1]

        def step(carry, x_t, w_ih=w_ih, w_hh=w_hh, b=(b_ih + b_hh), H=H):
            h, c = carry
            gates = x_t @ w_ih.T + h @ w_hh.T + b
            i = jax.nn.sigmoid(gates[:, 0:H])
            f = jax.nn.sigmoid(gates[:, H:2 * H])
            g = jnp.tanh(gates[:, 2 * H:3 * H])
            o = jax.nn.sigmoid(gates[:, 3 * H:4 * H])
            c_new = f * c + i * g
            h_new = o * jnp.tanh(c_new)
            return (h_new, c_new), h_new

        init = (jnp.zeros((B, H), jnp.float32), jnp.zeros((B, H), jnp.float32))
        (h_T, c_T), outs = lax.scan(step, init, x)
        hs.append(h_T)
        cs.append(c_T)
        x = outs
    return jnp.stack(hs), jnp.stack(cs)


if __name__ == "__main__":
    INPUT_DIM = 50      # vocab size
    EMB_DIM = 16
    HID_DIM = 32
    N_LAYERS = 2
    SEQ_LEN = 8
    BATCH = 2

    key = jax.random.PRNGKey(0)
    pkey, skey = jax.random.split(key)

    params = init_encoder_params(pkey, INPUT_DIM, EMB_DIM, HID_DIM, N_LAYERS)
    src = jax.random.randint(skey, (SEQ_LEN, BATCH), 0, INPUT_DIM, jnp.int32)

    hidden, cell = jax.jit(encoder_forward)(params, src)
    jax.block_until_ready((hidden, cell))

    assert hidden.shape == (N_LAYERS, BATCH, HID_DIM)
    assert cell.shape == (N_LAYERS, BATCH, HID_DIM)

    h_ref, c_ref = _encoder_reference(params, src)
    assert jnp.allclose(hidden, h_ref, atol=3e-2, rtol=3e-2), \
        float(jnp.max(jnp.abs(hidden - h_ref)))
    assert jnp.allclose(cell, c_ref, atol=3e-2, rtol=3e-2), \
        float(jnp.max(jnp.abs(cell - c_ref)))

    print("KERNEL_OK")
</pallas_src>

<mosaic_0001>
module attributes {stable_mosaic.version = 11 : i64} {
  func.func @_encoder_lstm_kernel(%arg0: i32, %arg1: memref<8x8x512xf32, #tpu.memory_space<vmem>>, %arg2: memref<2x128x512xbf16, #tpu.memory_space<vmem>>, %arg3: memref<1x128x512xbf16, #tpu.memory_space<vmem>>, %arg4: memref<1x8x512xf32, #tpu.memory_space<vmem>>, %arg5: memref<2x8x128xf32, #tpu.memory_space<vmem>>, %arg6: memref<2x8x128xf32, #tpu.memory_space<vmem>>, %arg7: memref<2x8x128xf32, #tpu.memory_space<vmem>>, %arg8: memref<2x8x128xf32, #tpu.memory_space<vmem>>, %arg9: memref<8x8x128xf32, #tpu.memory_space<vmem>>, %arg10: memref<8x8x512xf32, #tpu.memory_space<vmem>>) attributes {dimension_semantics = [#tpu.dimension_semantics<arbitrary>], iteration_bounds = array<i64: 1>, scalar_prefetch = 0 : i64, scratch_operands = 4 : i64, tpu.core_type = #tpu.core_type<tc>, window_params = [{transform_indices = @transform_0, window_bounds = array<i64: 8, 8, 512>}, {pipeline_mode = #tpu.pipeline_mode<synchronous>, transform_indices = @transform_1, window_bounds = array<i64: 2, 128, 512>}, {pipeline_mode = #tpu.pipeline_mode<synchronous>, transform_indices = @transform_2, window_bounds = array<i64: 1, 128, 512>}, {pipeline_mode = #tpu.pipeline_mode<synchronous>, transform_indices = @transform_3, window_bounds = array<i64: 1, 8, 512>}, {pipeline_mode = #tpu.pipeline_mode<synchronous>, transform_indices = @transform_4, window_bounds = array<i64: 2, 8, 128>}, {pipeline_mode = #tpu.pipeline_mode<synchronous>, transform_indices = @transform_5, window_bounds = array<i64: 2, 8, 128>}]} {
    %c0_i32 = arith.constant 0 : i32
    %0 = arith.cmpi eq, %arg0, %c0_i32 : i32
    %1 = arith.extui %0 : i1 to i32
    %c0_i32_0 = arith.constant 0 : i32
    %2 = arith.cmpi ne, %1, %c0_i32_0 : i32
    scf.if %2 {
      %cst_333 = arith.constant 0.000000e+00 : f32
      %711 = vector.broadcast %cst_333 : f32 to vector<2x8x128xf32>
      %c0_334 = arith.constant 0 : index
      %c0_335 = arith.constant 0 : index
      %c0_336 = arith.constant 0 : index
      %712 = vector.load %arg7[%c0_334, %c0_335, %c0_336] : memref<2x8x128xf32, #tpu.memory_space<vmem>>, vector<2x8x128xf32>
      tpu.vector_store %arg7[%c0_334, %c0_335, %c0_336], %711 {strides = array<i32>} : memref<2x8x128xf32, #tpu.memory_space<vmem>>, vector<2x8x128xf32>,
      %cst_337 = arith.constant 0.000000e+00 : f32
      %713 = vector.broadcast %cst_337 : f32 to vector<2x8x128xf32>
      %c0_338 = arith.constant 0 : index
      %c0_339 = arith.constant 0 : index
      %c0_340 = arith.constant 0 : index
      %714 = vector.load %arg8[%c0_338, %c0_339, %c0_340] : memref<2x8x128xf32, #tpu.memory_space<vmem>>, vector<2x8x128xf32>
      tpu.vector_store %arg8[%c0_338, %c0_339, %c0_340], %713 {strides = array<i32>} : memref<2x8x128xf32, #tpu.memory_space<vmem>>, vector<2x8x128xf32>,
    } else {
    }
    %c0 = arith.constant 0 : index
    %c0_1 = arith.constant 0 : index
    %c0_2 = arith.constant 0 : index
    %3 = vector.load %arg2[%c0, %c0_1, %c0_2] : memref<2x128x512xbf16, #tpu.memory_space<vmem>>, vector<1x128x512xbf16>
    %4 = vector.shape_cast %3 : vector<1x128x512xbf16> to vector<128x512xbf16>
    %c0_i32_3 = arith.constant 0 : i32
    %5 = arith.index_cast %c0_i32_3 : i32 to index
    %c0_4 = arith.constant 0 : index
    %c0_5 = arith.constant 0 : index
    %6 = vector.load %arg1[%5, %c0_4, %c0_5] : memref<8x8x512xf32, #tpu.memory_space<vmem>>, vector<1x8x512xf32>
    %7 = vector.shape_cast %6 : vector<1x8x512xf32> to vector<8x512xf32>
    %c0_6 = arith.constant 0 : index
    %c0_7 = arith.constant 0 : index
    %c0_8 = arith.constant 0 : index
    %8 = vector.load %arg7[%c0_6, %c0_7, %c0_8] : memref<2x8x128xf32, #tpu.memory_space<vmem>>, vector<1x8x128xf32>
    %9 = vector.shape_cast %8 : vector<1x8x128xf32> to vector<8x128xf32>
    %c0_9 = arith.constant 0 : index
    %c0_10 = arith.constant 0 : index
    %c0_11 = arith.constant 0 : index
    %10 = vector.load %arg8[%c0_9, %c0_10, %c0_11] : memref<2x8x128xf32, #tpu.memory_space<vmem>>, vector<1x8x128xf32>
    %11 = vector.shape_cast %10 : vector<1x8x128xf32> to vector<8x128xf32>
    %12 = arith.truncf %9 : vector<8x128xf32> to vector<8x128xbf16>
    %cst = arith.constant dense<0.000000e+00> : vector<8x512xf32>
    %13 = tpu.matmul %12, %4, %cst {dimension_numbers = #tpu.dot_dimension_numbers<[1], [0], [0], [1], [0, 0, 1, 1], [], []>} : vector<8x128xbf16>, vector<128x512xbf16>, vector<8x512xf32> -> vector<8x512xf32>
    %14 = arith.addf %7, %13 : vector<8x512xf32>
    %15 = vector.extract_strided_slice %14 {offsets = [0, 0], sizes = [8, 128], strides = [1, 1]} : vector<8x512xf32> to vector<8x128xf32>
    %16 = arith.negf %15 : vector<8x128xf32>
    %17 = math.exp %16 : vector<8x128xf32>
    %cst_12 = arith.constant 1.000000e+00 : f32
    %18 = vector.broadcast %cst_12 : f32 to vector<8x128xf32>
    %19 = arith.addf %18, %17 : vector<8x128xf32>
    %20 = arith.divf %18, %19 : vector<8x128xf32>
    %21 = vector.extract_strided_slice %14 {offsets = [0, 128], sizes = [8, 128], strides = [1, 1]} : vector<8x512xf32> to vector<8x128xf32>
    %22 = arith.negf %21 : vector<8x128xf32>
    %23 = math.exp %22 : vector<8x128xf32>
    %cst_13 = arith.constant 1.000000e+00 : f32
    %24 = vector.broadcast %cst_13 : f32 to vector<8x128xf32>
    %25 = arith.addf %24, %23 : vector<8x128xf32>
    %26 = arith.divf %24, %25 : vector<8x128xf32>
    %27 = vector.extract_strided_slice %14 {offsets = [0, 256], sizes = [8, 128], strides = [1, 1]} : vector<8x512xf32> to vector<8x128xf32>
    %28 = math.tanh %27 : vector<8x128xf32>
    %29 = vector.extract_strided_slice %14 {offsets = [0, 384], sizes = [8, 128], strides = [1, 1]} : vector<8x512xf32> to vector<8x128xf32>
    %30 = arith.negf %29 : vector<8x128xf32>
    %31 = math.exp %30 : vector<8x128xf32>
    %cst_14 = arith.constant 1.000000e+00 : f32
    %32 = vector.broadcast %cst_14 : f32 to vector<8x128xf32>
    %33 = arith.addf %32, %31 : vector<8x128xf32>
    %34 = arith.divf %32, %33 : vector<8x128xf32>
    %35 = arith.mulf %26, %11 : vector<8x128xf32>
    %36 = arith.mulf %20, %28 : vector<8x128xf32>
    %37 = arith.addf %35, %36 : vector<8x128xf32>
    %38 = math.tanh %37 : vector<8x128xf32>
    %39 = arith.mulf %34, %38 : vector<8x128xf32>
    %c0_15 = arith.constant 0 : index
    %c0_16 = arith.constant 0 : index
    %c0_17 = arith.constant 0 : index
    %40 = vector.load %arg7[%c0_15, %c0_16, %c0_17] : memref<2x8x128xf32, #tpu.memory_space<vmem>>, vector<1x8x128xf32>
    %41 = vector.shape_cast %40 : vector<1x8x128xf32> to vector<8x128xf32>
    %42 = vector.shape_cast %39 : vector<8x128xf32> to vector<1x8x128xf32>
    tpu.vector_store %arg7[%c0_15, %c0_16, %c0_17], %42 {strides = array<i32>} : memref<2x8x128xf32, #tpu.memory_space<vmem>>, vector<1x8x128xf32>,
    %c0_18 = arith.constant 0 : index
    %c0_19 = arith.constant 0 : index
    %c0_20 = arith.constant 0 : index
    %43 = vector.load %arg8[%c0_18, %c0_19, %c0_20] : memref<2x8x128xf32, #tpu.memory_space<vmem>>, vector<1x8x128xf32>
    %44 = vector.shape_cast %43 : vector<1x8x128xf32> to vector<8x128xf32>
    %45 = vector.shape_cast %37 : vector<8x128xf32> to vector<1x8x128xf32>
    tpu.vector_store %arg8[%c0_18, %c0_19, %c0_20], %45 {strides = array<i32>} : memref<2x8x128xf32, #tpu.memory_space<vmem>>, vector<1x8x128xf32>,
    %46 = arith.index_cast %c0_i32_3 : i32 to index
    %c0_21 = arith.constant 0 : index
    %c0_22 = arith.constant 0 : index
    %47 = vector.load %arg9[%46, %c0_21, %c0_22] : memref<8x8x128xf32, #tpu.memory_space<vmem>>, vector<1x8x128xf32>
    %48 = vector.shape_cast %47 : vector<1x8x128xf32> to vector<8x128xf32>
    %49 = vector.shape_cast %39 : vector<8x128xf32> to vector<1x8x128xf32>
    tpu.vector_store %arg9[%46, %c0_21, %c0_22], %49 {strides = array<i32>} : memref<8x8x128xf32, #tpu.memory_space<vmem>>, vector<1x8x128xf32>,
    %c1_i32 = arith.constant 1 : i32
    %50 = arith.index_cast %c1_i32 : i32 to index
    %c0_23 = arith.constant 0 : index
    %c0_24 = arith.constant 0 : index
    %51 = vector.load %arg1[%50, %c0_23, %c0_24] : memref<8x8x512xf32, #tpu.memory_space<vmem>>, vector<1x8x512xf32>
    %52 = vector.shape_cast %51 : vector<1x8x512xf32> to vector<8x512xf32>
    %c0_25 = arith.constant 0 : index
    %c0_26 = arith.constant 0 : index
    %c0_27 = arith.constant 0 : index
    %53 = vector.load %arg7[%c0_25, %c0_26, %c0_27] : memref<2x8x128xf32, #tpu.memory_space<vmem>>, vector<1x8x128xf32>
    %54 = vector.shape_cast %53 : vector<1x8x128xf32> to vector<8x128xf32>
    %c0_28 = arith.constant 0 : index
    %c0_29 = arith.constant 0 : index
    %c0_30 = arith.constant 0 : index
    %55 = vector.load %arg8[%c0_28, %c0_29, %c0_30] : memref<2x8x128xf32, #tpu.memory_space<vmem>>, vector<1x8x128xf32>
    %56 = vector.shape_cast %55 : vector<1x8x128xf32> to vector<8x128xf32>
    %57 = arith.truncf %54 : vector<8x128xf32> to vector<8x128xbf16>
    %cst_31 = arith.constant dense<0.000000e+00> : vector<8x512xf32>
    %58 = tpu.matmul %57, %4, %cst_31 {dimension_numbers = #tpu.dot_dimension_numbers<[1], [0], [0], [1], [0, 0, 1, 1], [], []>} : vector<8x128xbf16>, vector<128x512xbf16>, vector<8x512xf32> -> vector<8x512xf32>
    %59 = arith.addf %52, %58 : vector<8x512xf32>
    %60 = vector.extract_strided_slice %59 {offsets = [0, 0], sizes = [8, 128], strides = [1, 1]} : vector<8x512xf32> to vector<8x128xf32>
    %61 = arith.negf %60 : vector<8x128xf32>
    %62 = math.exp %61 : vector<8x128xf32>
    %cst_32 = arith.constant 1.000000e+00 : f32
    %63 = vector.broadcast %cst_32 : f32 to vector<8x128xf32>
    %64 = arith.addf %63, %62 : vector<8x128xf32>
    %65 = arith.divf %63, %64 : vector<8x128xf32>
    %66 = vector.extract_strided_slice %59 {offsets = [0, 128], sizes = [8, 128], strides = [1, 1]} : vector<8x512xf32> to vector<8x128xf32>
    %67 = arith.negf %66 : vector<8x128xf32>
    %68 = math.exp %67 : vector<8x128xf32>
    %cst_33 = arith.constant 1.000000e+00 : f32
    %69 = vector.broadcast %cst_33 : f32 to vector<8x128xf32>
    %70 = arith.addf %69, %68 : vector<8x128xf32>
    %71 = arith.divf %69, %70 : vector<8x128xf32>
    %72 = vector.extract_strided_slice %59 {offsets = [0, 256], sizes = [8, 128], strides = [1, 1]} : vector<8x512xf32> to vector<8x128xf32>
    %73 = math.tanh %72 : vector<8x128xf32>
    %74 = vector.extract_strided_slice %59 {offsets = [0, 384], sizes = [8, 128], strides = [1, 1]} : vector<8x512xf32> to vector<8x128xf32>
    %75 = arith.negf %74 : vector<8x128xf32>
    %76 = math.exp %75 : vector<8x128xf32>
    %cst_34 = arith.constant 1.000000e+00 : f32
    %77 = vector.broadcast %cst_34 : f32 to vector<8x128xf32>
    %78 = arith.addf %77, %76 : vector<8x128xf32>
    %79 = arith.divf %77, %78 : vector<8x128xf32>
    %80 = arith.mulf %71, %56 : vector<8x128xf32>
    %81 = arith.mulf %65, %73 : vector<8x128xf32>
    %82 = arith.addf %80, %81 : vector<8x128xf32>
    %83 = math.tanh %82 : vector<8x128xf32>
    %84 = arith.mulf %79, %83 : vector<8x128xf32>
    %c0_35 = arith.constant 0 : index
    %c0_36 = arith.constant 0 : index
    %c0_37 = arith.constant 0 : index
    %85 = vector.load %arg7[%c0_35, %c0_36, %c0_37] : memref<2x8x128xf32, #tpu.memory_space<vmem>>, vector<1x8x128xf32>
    %86 = vector.shape_cast %85 : vector<1x8x128xf32> to vector<8x128xf32>
    %87 = vector.shape_cast %84 : vector<8x128xf32> to vector<1x8x128xf32>
    tpu.vector_store %arg7[%c0_35, %c0_36, %c0_37], %87 {strides = array<i32>} : memref<2x8x128xf32, #tpu.memory_space<vmem>>, vector<1x8x128xf32>,
    %c0_38 = arith.constant 0 : index
    %c0_39 = arith.constant 0 : index
    %c0_40 = arith.constant 0 : index
    %88 = vector.load %arg8[%c0_38, %c0_39, %c0_40] : memref<2x8x128xf32, #tpu.memory_space<vmem>>, vector<1x8x128xf32>
    %89 = vector.shape_cast %88 : vector<1x8x128xf32> to vector<8x128xf32>
    %90 = vector.shape_cast %82 : vector<8x128xf32> to vector<1x8x128xf32>
    tpu.vector_store %arg8[%c0_38, %c0_39, %c0_40], %90 {strides = array<i32>} : memref<2x8x128xf32, #tpu.memory_space<vmem>>, vector<1x8x128xf32>,
    %91 = arith.index_cast %c1_i32 : i32 to index
    %c0_41 = arith.constant 0 : index
    %c0_42 = arith.constant 0 : index
    %92 = vector.load %arg9[%91, %c0_41, %c0_42] : memref<8x8x128xf32, #tpu.memory_space<vmem>>, vector<1x8x128xf32>
    %93 = vector.shape_cast %92 : vector<1x8x128xf32> to vector<8x128xf32>
    %94 = vector.shape_cast %84 : vector<8x128xf32> to vector<1x8x128xf32>
    tpu.vector_store %arg9[%91, %c0_41, %c0_42], %94 {strides = array<i32>} : memref<8x8x128xf32, #tpu.memory_space<vmem>>, vector<1x8x128xf32>,
    %c2_i32 = arith.constant 2 : i32
    %95 = arith.index_cast %c2_i32 : i32 to index
    %c0_43 = arith.constant 0 : index
    %c0_44 = arith.constant 0 : index
    %96 = vector.load %arg1[%95, %c0_43, %c0_44] : memref<8x8x512xf32, #tpu.memory_space<vmem>>, vector<1x8x512xf32>
    %97 = vector.shape_cast %96 : vector<1x8x512xf32> to vector<8x512xf32>
    %c0_45 = arith.constant 0 : index
    %c0_46 = arith.constant 0 : index
    %c0_47 = arith.constant 0 : index
    %98 = vector.load %arg7[%c0_45, %c0_46, %c0_47] : memref<2x8x128xf32, #tpu.memory_space<vmem>>, vector<1x8x128xf32>
    %99 = vector.shape_cast %98 : vector<1x8x128xf32> to vector<8x128xf32>
    %c0_48 = arith.constant 0 : index
    %c0_49 = arith.constant 0 : index
    %c0_50 = arith.constant 0 : index
    %100 = vector.load %arg8[%c0_48, %c0_49, %c0_50] : memref<2x8x128xf32, #tpu.memory_space<vmem>>, vector<1x8x128xf32>
    %101 = vector.shape_cast %100 : vector<1x8x128xf32> to vector<8x128xf32>
    %102 = arith.truncf %99 : vector<8x128xf32> to vector<8x128xbf16>
    %cst_51 = arith.constant dense<0.000000e+00> : vector<8x512xf32>
    %103 = tpu.matmul %102, %4, %cst_51 {dimension_numbers = #tpu.dot_dimension_numbers<[1], [0], [0], [1], [0, 0, 1, 1], [], []>} : vector<8x128xbf16>, vector<128x512xbf16>, vector<8x512xf32> -> vector<8x512xf32>
    %104 = arith.addf %97, %103 : vector<8x512xf32>
    %105 = vector.extract_strided_slice %104 {offsets = [0, 0], sizes = [8, 128], strides = [1, 1]} : vector<8x512xf32> to vector<8x128xf32>
    %106 = arith.negf %105 : vector<8x128xf32>
    %107 = math.exp %106 : vector<8x128xf32>
    %cst_52 = arith.constant 1.000000e+00 : f32
    %108 = vector.broadcast %cst_52 : f32 to vector<8x128xf32>
    %109 = arith.addf %108, %107 : vector<8x128xf32>
    %110 = arith.divf %108, %109 : vector<8x128xf32>
    %111 = vector.extract_strided_slice %104 {offsets = [0, 128], sizes = [8, 128], strides = [1, 1]} : vector<8x512xf32> to vector<8x128xf32>
    %112 = arith.negf %111 : vector<8x128xf32>
    %113 = math.exp %112 : vector<8x128xf32>
    %cst_53 = arith.constant 1.000000e+00 : f32
    %114 = vector.broadcast %cst_53 : f32 to vector<8x128xf32>
    %115 = arith.addf %114, %113 : vector<8x128xf32>
    %116 = arith.divf %114, %115 : vector<8x128xf32>
    %117 = vector.extract_strided_slice %104 {offsets = [0, 256], sizes = [8, 128], strides = [1, 1]} : vector<8x512xf32> to vector<8x128xf32>
    %118 = math.tanh %117 : vector<8x128xf32>
    %119 = vector.extract_strided_slice %104 {offsets = [0, 384], sizes = [8, 128], strides = [1, 1]} : vector<8x512xf32> to vector<8x128xf32>
    %120 = arith.negf %119 : vector<8x128xf32>
    %121 = math.exp %120 : vector<8x128xf32>
    %cst_54 = arith.constant 1.000000e+00 : f32
    %122 = vector.broadcast %cst_54 : f32 to vector<8x128xf32>
    %123 = arith.addf %122, %121 : vector<8x128xf32>
    %124 = arith.divf %122, %123 : vector<8x128xf32>
    %125 = arith.mulf %116, %101 : vector<8x128xf32>
    %126 = arith.mulf %110, %118 : vector<8x128xf32>
    %127 = arith.addf %125, %126 : vector<8x128xf32>
    %128 = math.tanh %127 : vector<8x128xf32>
    %129 = arith.mulf %124, %128 : vector<8x128xf32>
    %c0_55 = arith.constant 0 : index
    %c0_56 = arith.constant 0 : index
    %c0_57 = arith.constant 0 : index
    %130 = vector.load %arg7[%c0_55, %c0_56, %c0_57] : memref<2x8x128xf32, #tpu.memory_space<vmem>>, vector<1x8x128xf32>
    %131 = vector.shape_cast %130 : vector<1x8x128xf32> to vector<8x128xf32>
    %132 = vector.shape_cast %129 : vector<8x128xf32> to vector<1x8x128xf32>
    tpu.vector_store %arg7[%c0_55, %c0_56, %c0_57], %132 {strides = array<i32>} : memref<2x8x128xf32, #tpu.memory_space<vmem>>, vector<1x8x128xf32>,
    %c0_58 = arith.constant 0 : index
    %c0_59 = arith.constant 0 : index
    %c0_60 = arith.constant 0 : index
    %133 = vector.load %arg8[%c0_58, %c0_59, %c0_60] : memref<2x8x128xf32, #tpu.memory_space<vmem>>, vector<1x8x128xf32>
    %134 = vector.shape_cast %133 : vector<1x8x128xf32> to vector<8x128xf32>
    %135 = vector.shape_cast %127 : vector<8x128xf32> to vector<1x8x128xf32>
    tpu.vector_store %arg8[%c0_58, %c0_59, %c0_60], %135 {strides = array<i32>} : memref<2x8x128xf32, #tpu.memory_space<vmem>>, vector<1x8x128xf32>,
    %136 = arith.index_cast %c2_i32 : i32 to index
    %c0_61 = arith.constant 0 : index
    %c0_62 = arith.constant 0 : index
    %137 = vector.load %arg9[%136, %c0_61, %c0_62] : memref<8x8x128xf32, #tpu.memory_space<vmem>>, vector<1x8x128xf32>
    %138 = vector.shape_cast %137 : vector<1x8x128xf32> to vector<8x128xf32>
    %139 = vector.shape_cast %129 : vector<8x128xf32> to vector<1x8x128xf32>
    tpu.vector_store %arg9[%136, %c0_61, %c0_62], %139 {strides = array<i32>} : memref<8x8x128xf32, #tpu.memory_space<vmem>>, vector<1x8x128xf32>,
    %c3_i32 = arith.constant 3 : i32
    %140 = arith.index_cast %c3_i32 : i32 to index
    %c0_63 = arith.constant 0 : index
    %c0_64 = arith.constant 0 : index
    %141 = vector.load %arg1[%140, %c0_63, %c0_64] : memref<8x8x512xf32, #tpu.memory_space<vmem>>, vector<1x8x512xf32>
    %142 = vector.shape_cast %141 : vector<1x8x512xf32> to vector<8x512xf32>
    %c0_65 = arith.constant 0 : index
    %c0_66 = arith.constant 0 : index
    %c0_67 = arith.constant 0 : index
    %143 = vector.load %arg7[%c0_65, %c0_66, %c0_67] : memref<2x8x128xf32, #tpu.memory_space<vmem>>, vector<1x8x128xf32>
    %144 = vector.shape_cast %143 : vector<1x8x128xf32> to vector<8x128xf32>
    %c0_68 = arith.constant 0 : index
    %c0_69 = arith.constant 0 : index
    %c0_70 = arith.constant 0 : index
    %145 = vector.load %arg8[%c0_68, %c0_69, %c0_70] : memref<2x8x128xf32, #tpu.memory_space<vmem>>, vector<1x8x128xf32>
    %146 = vector.shape_cast %145 : vector<1x8x128xf32> to vector<8x128xf32>
    %147 = arith.truncf %144 : vector<8x128xf32> to vector<8x128xbf16>
    %cst_71 = arith.constant dense<0.000000e+00> : vector<8x512xf32>
    %148 = tpu.matmul %147, %4, %cst_71 {dimension_numbers = #tpu.dot_dimension_numbers<[1], [0], [0], [1], [0, 0, 1, 1], [], []>} : vector<8x128xbf16>, vector<128x512xbf16>, vector<8x512xf32> -> vector<8x512xf32>
    %149 = arith.addf %142, %148 : vector<8x512xf32>
    %150 = vector.extract_strided_slice %149 {offsets = [0, 0], sizes = [8, 128], strides = [1, 1]} : vector<8x512xf32> to vector<8x128xf32>
    %151 = arith.negf %150 : vector<8x128xf32>
    %152 = math.exp %151 : vector<8x128xf32>
    %cst_72 = arith.constant 1.000000e+00 : f32
    %153 = vector.broadcast %cst_72 : f32 to vector<8x128xf32>
    %154 = arith.addf %153, %152 : vector<8x128xf32>
    %155 = arith.divf %153, %154 : vector<8x128xf32>
    %156 = vector.extract_strided_slice %149 {offsets = [0, 128], sizes = [8, 128], strides = [1, 1]} : vector<8x512xf32> to vector<8x128xf32>
    %157 = arith.negf %156 : vector<8x128xf32>
    %158 = math.exp %157 : vector<8x128xf32>
    %cst_73 = arith.constant 1.000000e+00 : f32
    %159 = vector.broadcast %cst_73 : f32 to vector<8x128xf32>
    %160 = arith.addf %159, %158 : vector<8x128xf32>
    %161 = arith.divf %159, %160 : vector<8x128xf32>
    %162 = vector.extract_strided_slice %149 {offsets = [0, 256], sizes = [8, 128], strides = [1, 1]} : vector<8x512xf32> to vector<8x128xf32>
    %163 = math.tanh %162 : vector<8x128xf32>
    %164 = vector.extract_strided_slice %149 {offsets = [0, 384], sizes = [8, 128], strides = [1, 1]} : vector<8x512xf32> to vector<8x128xf32>
    %165 = arith.negf %164 : vector<8x128xf32>
    %166 = math.exp %165 : vector<8x128xf32>
    %cst_74 = arith.constant 1.000000e+00 : f32
    %167 = vector.broadcast %cst_74 : f32 to vector<8x128xf32>
    %168 = arith.addf %167, %166 : vector<8x128xf32>
    %169 = arith.divf %167, %168 : vector<8x128xf32>
    %170 = arith.mulf %161, %146 : vector<8x128xf32>
    %171 = arith.mulf %155, %163 : vector<8x128xf32>
    %172 = arith.addf %170, %171 : vector<8x128xf32>
    %173 = math.tanh %172 : vector<8x128xf32>
    %174 = arith.mulf %169, %173 : vector<8x128xf32>
    %c0_75 = arith.constant 0 : index
    %c0_76 = arith.constant 0 : index
    %c0_77 = arith.constant 0 : index
    %175 = vector.load %arg7[%c0_75, %c0_76, %c0_77] : memref<2x8x128xf32, #tpu.memory_space<vmem>>, vector<1x8x128xf32>
    %176 = vector.shape_cast %175 : vector<1x8x128xf32> to vector<8x128xf32>
    %177 = vector.shape_cast %174 : vector<8x128xf32> to vector<1x8x128xf32>
    tpu.vector_store %arg7[%c0_75, %c0_76, %c0_77], %177 {strides = array<i32>} : memref<2x8x128xf32, #tpu.memory_space<vmem>>, vector<1x8x128xf32>,
    %c0_78 = arith.constant 0 : index
    %c0_79 = arith.constant 0 : index
    %c0_80 = arith.constant 0 : index
    %178 = vector.load %arg8[%c0_78, %c0_79, %c0_80] : memref<2x8x128xf32, #tpu.memory_space<vmem>>, vector<1x8x128xf32>
    %179 = vector.shape_cast %178 : vector<1x8x128xf32> to vector<8x128xf32>
    %180 = vector.shape_cast %172 : vector<8x128xf32> to vector<1x8x128xf32>
    tpu.vector_store %arg8[%c0_78, %c0_79, %c0_80], %180 {strides = array<i32>} : memref<2x8x128xf32, #tpu.memory_space<vmem>>, vector<1x8x128xf32>,
    %181 = arith.index_cast %c3_i32 : i32 to index
    %c0_81 = arith.constant 0 : index
    %c0_82 = arith.constant 0 : index
    %182 = vector.load %arg9[%181, %c0_81, %c0_82] : memref<8x8x128xf32, #tpu.memory_space<vmem>>, vector<1x8x128xf32>
    %183 = vector.shape_cast %182 : vector<1x8x128xf32> to vector<8x128xf32>
    %184 = vector.shape_cast %174 : vector<8x128xf32> to vector<1x8x128xf32>
    tpu.vector_store %arg9[%181, %c0_81, %c0_82], %184 {strides = array<i32>} : memref<8x8x128xf32, #tpu.memory_space<vmem>>, vector<1x8x128xf32>,
    %c4_i32 = arith.constant 4 : i32
    %185 = arith.index_cast %c4_i32 : i32 to index
    %c0_83 = arith.constant 0 : index
    %c0_84 = arith.constant 0 : index
    %186 = vector.load %arg1[%185, %c0_83, %c0_84] : memref<8x8x512xf32, #tpu.memory_space<vmem>>, vector<1x8x512xf32>
    %187 = vector.shape_cast %186 : vector<1x8x512xf32> to vector<8x512xf32>
    %c0_85 = arith.constant 0 : index
    %c0_86 = arith.constant 0 : index
    %c0_87 = arith.constant 0 : index
    %188 = vector.load %arg7[%c0_85, %c0_86, %c0_87] : memref<2x8x128xf32, #tpu.memory_space<vmem>>, vector<1x8x128xf32>
    %189 = vector.shape_cast %188 : vector<1x8x128xf32> to vector<8x128xf32>
    %c0_88 = arith.constant 0 : index
    %c0_89 = arith.constant 0 : index
    %c0_90 = arith.constant 0 : index
    %190 = vector.load %arg8[%c0_88, %c0_89, %c0_90] : memref<2x8x128xf32, #tpu.memory_space<vmem>>, vector<1x8x128xf32>
    %191 = vector.shape_cast %190 : vector<1x8x128xf32> to vector<8x128xf32>
    %192 = arith.truncf %189 : vector<8x128xf32> to vector<8x128xbf16>
    %cst_91 = arith.constant dense<0.000000e+00> : vector<8x512xf32>
    %193 = tpu.matmul %192, %4, %cst_91 {dimension_numbers = #tpu.dot_dimension_numbers<[1], [0], [0], [1], [0, 0, 1, 1], [], []>} : vector<8x128xbf16>, vector<128x512xbf16>, vector<8x512xf32> -> vector<8x512xf32>
    %194 = arith.addf %187, %193 : vector<8x512xf32>
    %195 = vector.extract_strided_slice %194 {offsets = [0, 0], sizes = [8, 128], strides = [1, 1]} : vector<8x512xf32> to vector<8x128xf32>
    %196 = arith.negf %195 : vector<8x128xf32>
    %197 = math.exp %196 : vector<8x128xf32>
    %cst_92 = arith.constant 1.000000e+00 : f32
    %198 = vector.broadcast %cst_92 : f32 to vector<8x128xf32>
    %199 = arith.addf %198, %197 : vector<8x128xf32>
    %200 = arith.divf %198, %199 : vector<8x128xf32>
    %201 = vector.extract_strided_slice %194 {offsets = [0, 128], sizes = [8, 128], strides = [1, 1]} : vector<8x512xf32> to vector<8x128xf32>
    %202 = arith.negf %201 : vector<8x128xf32>
    %203 = math.exp %202 : vector<8x128xf32>
    %cst_93 = arith.constant 1.000000e+00 : f32
    %204 = vector.broadcast %cst_93 : f32 to vector<8x128xf32>
    %205 = arith.addf %204, %203 : vector<8x128xf32>
    %206 = arith.divf %204, %205 : vector<8x128xf32>
    %207 = vector.extract_strided_slice %194 {offsets = [0, 256], sizes = [8, 128], strides = [1, 1]} : vector<8x512xf32> to vector<8x128xf32>
    %208 = math.tanh %207 : vector<8x128xf32>
    %209 = vector.extract_strided_slice %194 {offsets = [0, 384], sizes = [8, 128], strides = [1, 1]} : vector<8x512xf32> to vector<8x128xf32>
    %210 = arith.negf %209 : vector<8x128xf32>
    %211 = math.exp %210 : vector<8x128xf32>
    %cst_94 = arith.constant 1.000000e+00 : f32
    %212 = vector.broadcast %cst_94 : f32 to vector<8x128xf32>
    %213 = arith.addf %212, %211 : vector<8x128xf32>
    %214 = arith.divf %212, %213 : vector<8x128xf32>
    %215 = arith.mulf %206, %191 : vector<8x128xf32>
    %216 = arith.mulf %200, %208 : vector<8x128xf32>
    %217 = arith.addf %215, %216 : vector<8x128xf32>
    %218 = math.tanh %217 : vector<8x128xf32>
    %219 = arith.mulf %214, %218 : vector<8x128xf32>
    %c0_95 = arith.constant 0 : index
    %c0_96 = arith.constant 0 : index
    %c0_97 = arith.constant 0 : index
    %220 = vector.load %arg7[%c0_95, %c0_96, %c0_97] : memref<2x8x128xf32, #tpu.memory_space<vmem>>, vector<1x8x128xf32>
    %221 = vector.shape_cast %220 : vector<1x8x128xf32> to vector<8x128xf32>
    %222 = vector.shape_cast %219 : vector<8x128xf32> to vector<1x8x128xf32>
    tpu.vector_store %arg7[%c0_95, %c0_96, %c0_97], %222 {strides = array<i32>} : memref<2x8x128xf32, #tpu.memory_space<vmem>>, vector<1x8x128xf32>,
    %c0_98 = arith.constant 0 : index
    %c0_99 = arith.constant 0 : index
    %c0_100 = arith.constant 0 : index
    %223 = vector.load %arg8[%c0_98, %c0_99, %c0_100] : memref<2x8x128xf32, #tpu.memory_space<vmem>>, vector<1x8x128xf32>
    %224 = vector.shape_cast %223 : vector<1x8x128xf32> to vector<8x128xf32>
    %225 = vector.shape_cast %217 : vector<8x128xf32> to vector<1x8x128xf32>
    tpu.vector_store %arg8[%c0_98, %c0_99, %c0_100], %225 {strides = array<i32>} : memref<2x8x128xf32, #tpu.memory_space<vmem>>, vector<1x8x128xf32>,
    %226 = arith.index_cast %c4_i32 : i32 to index
    %c0_101 = arith.constant 0 : index
    %c0_102 = arith.constant 0 : index
    %227 = vector.load %arg9[%226, %c0_101, %c0_102] : memref<8x8x128xf32, #tpu.memory_space<vmem>>, vector<1x8x128xf32>
    %228 = vector.shape_cast %227 : vector<1x8x128xf32> to vector<8x128xf32>
    %229 = vector.shape_cast %219 : vector<8x128xf32> to vector<1x8x128xf32>
    tpu.vector_store %arg9[%226, %c0_101, %c0_102], %229 {strides = array<i32>} : memref<8x8x128xf32, #tpu.memory_space<vmem>>, vector<1x8x128xf32>,
    %c5_i32 = arith.constant 5 : i32
    %230 = arith.index_cast %c5_i32 : i32 to index
    %c0_103 = arith.constant 0 : index
    %c0_104 = arith.constant 0 : index
    %231 = vector.load %arg1[%230, %c0_103, %c0_104] : memref<8x8x512xf32, #tpu.memory_space<vmem>>, vector<1x8x512xf32>
    %232 = vector.shape_cast %231 : vector<1x8x512xf32> to vector<8x512xf32>
    %c0_105 = arith.constant 0 : index
    %c0_106 = arith.constant 0 : index
    %c0_107 = arith.constant 0 : index
    %233 = vector.load %arg7[%c0_105, %c0_106, %c0_107] : memref<2x8x128xf32, #tpu.memory_space<vmem>>, vector<1x8x128xf32>
    %234 = vector.shape_cast %233 : vector<1x8x128xf32> to vector<8x128xf32>
    %c0_108 = arith.constant 0 : index
    %c0_109 = arith.constant 0 : index
    %c0_110 = arith.constant 0 : index
    %235 = vector.load %arg8[%c0_108, %c0_109, %c0_110] : memref<2x8x128xf32, #tpu.memory_space<vmem>>, vector<1x8x128xf32>
    %236 = vector.shape_cast %235 : vector<1x8x128xf32> to vector<8x128xf32>
    %237 = arith.truncf %234 : vector<8x128xf32> to vector<8x128xbf16>
    %cst_111 = arith.constant dense<0.000000e+00> : vector<8x512xf32>
    %238 = tpu.matmul %237, %4, %cst_111 {dimension_numbers = #tpu.dot_dimension_numbers<[1], [0], [0], [1], [0, 0, 1, 1], [], []>} : vector<8x128xbf16>, vector<128x512xbf16>, vector<8x512xf32> -> vector<8x512xf32>
    %239 = arith.addf %232, %238 : vector<8x512xf32>
    %240 = vector.extract_strided_slice %239 {offsets = [0, 0], sizes = [8, 128], strides = [1, 1]} : vector<8x512xf32> to vector<8x128xf32>
    %241 = arith.negf %240 : vector<8x128xf32>
    %242 = math.exp %241 : vector<8x128xf32>
    %cst_112 = arith.constant 1.000000e+00 : f32
    %243 = vector.broadcast %cst_112 : f32 to vector<8x128xf32>
    %244 = arith.addf %243, %242 : vector<8x128xf32>
    %245 = arith.divf %243, %244 : vector<8x128xf32>
    %246 = vector.extract_strided_slice %239 {offsets = [0, 128], sizes = [8, 128], strides = [1, 1]} : vector<8x512xf32> to vector<8x128xf32>
    %247 = arith.negf %246 : vector<8x128xf32>
    %248 = math.exp %247 : vector<8x128xf32>
    %cst_113 = arith.constant 1.000000e+00 : f32
    %249 = vector.broadcast %cst_113 : f32 to vector<8x128xf32>
    %250 = arith.addf %249, %248 : vector<8x128xf32>
    %251 = arith.divf %249, %250 : vector<8x128xf32>
    %252 = vector.extract_strided_slice %239 {offsets = [0, 256], sizes = [8, 128], strides = [1, 1]} : vector<8x512xf32> to vector<8x128xf32>
    %253 = math.tanh %252 : vector<8x128xf32>
    %254 = vector.extract_strided_slice %239 {offsets = [0, 384], sizes = [8, 128], strides = [1, 1]} : vector<8x512xf32> to vector<8x128xf32>
    %255 = arith.negf %254 : vector<8x128xf32>
    %256 = math.exp %255 : vector<8x128xf32>
    %cst_114 = arith.constant 1.000000e+00 : f32
    %257 = vector.broadcast %cst_114 : f32 to vector<8x128xf32>
    %258 = arith.addf %257, %256 : vector<8x128xf32>
    %259 = arith.divf %257, %258 : vector<8x128xf32>
    %260 = arith.mulf %251, %236 : vector<8x128xf32>
    %261 = arith.mulf %245, %253 : vector<8x128xf32>
    %262 = arith.addf %260, %261 : vector<8x128xf32>
    %263 = math.tanh %262 : vector<8x128xf32>
    %264 = arith.mulf %259, %263 : vector<8x128xf32>
    %c0_115 = arith.constant 0 : index
    %c0_116 = arith.constant 0 : index
    %c0_117 = arith.constant 0 : index
    %265 = vector.load %arg7[%c0_115, %c0_116, %c0_117] : memref<2x8x128xf32, #tpu.memory_space<vmem>>, vector<1x8x128xf32>
    %266 = vector.shape_cast %265 : vector<1x8x128xf32> to vector<8x128xf32>
    %267 = vector.shape_cast %264 : vector<8x128xf32> to vector<1x8x128xf32>
    tpu.vector_store %arg7[%c0_115, %c0_116, %c0_117], %267 {strides = array<i32>} : memref<2x8x128xf32, #tpu.memory_space<vmem>>, vector<1x8x128xf32>,
    %c0_118 = arith.constant 0 : index
    %c0_119 = arith.constant 0 : index
    %c0_120 = arith.constant 0 : index
    %268 = vector.load %arg8[%c0_118, %c0_119, %c0_120] : memref<2x8x128xf32, #tpu.memory_space<vmem>>, vector<1x8x128xf32>
    %269 = vector.shape_cast %268 : vector<1x8x128xf32> to vector<8x128xf32>
    %270 = vector.shape_cast %262 : vector<8x128xf32> to vector<1x8x128xf32>
    tpu.vector_store %arg8[%c0_118, %c0_119, %c0_120], %270 {strides = array<i32>} : memref<2x8x128xf32, #tpu.memory_space<vmem>>, vector<1x8x128xf32>,
    %271 = arith.index_cast %c5_i32 : i32 to index
    %c0_121 = arith.constant 0 : index
    %c0_122 = arith.constant 0 : index
    %272 = vector.load %arg9[%271, %c0_121, %c0_122] : memref<8x8x128xf32, #tpu.memory_space<vmem>>, vector<1x8x128xf32>
    %273 = vector.shape_cast %272 : vector<1x8x128xf32> to vector<8x128xf32>
    %274 = vector.shape_cast %264 : vector<8x128xf32> to vector<1x8x128xf32>
    tpu.vector_store %arg9[%271, %c0_121, %c0_122], %274 {strides = array<i32>} : memref<8x8x128xf32, #tpu.memory_space<vmem>>, vector<1x8x128xf32>,
    %c6_i32 = arith.constant 6 : i32
    %275 = arith.index_cast %c6_i32 : i32 to index
    %c0_123 = arith.constant 0 : index
    %c0_124 = arith.constant 0 : index
    %276 = vector.load %arg1[%275, %c0_123, %c0_124] : memref<8x8x512xf32, #tpu.memory_space<vmem>>, vector<1x8x512xf32>
    %277 = vector.shape_cast %276 : vector<1x8x512xf32> to vector<8x512xf32>
    %c0_125 = arith.constant 0 : index
    %c0_126 = arith.constant 0 : index
    %c0_127 = arith.constant 0 : index
    %278 = vector.load %arg7[%c0_125, %c0_126, %c0_127] : memref<2x8x128xf32, #tpu.memory_space<vmem>>, vector<1x8x128xf32>
    %279 = vector.shape_cast %278 : vector<1x8x128xf32> to vector<8x128xf32>
    %c0_128 = arith.constant 0 : index
    %c0_129 = arith.constant 0 : index
    %c0_130 = arith.constant 0 : index
    %280 = vector.load %arg8[%c0_128, %c0_129, %c0_130] : memref<2x8x128xf32, #tpu.memory_space<vmem>>, vector<1x8x128xf32>
    %281 = vector.shape_cast %280 : vector<1x8x128xf32> to vector<8x128xf32>
    %282 = arith.truncf %279 : vector<8x128xf32> to vector<8x128xbf16>
    %cst_131 = arith.constant dense<0.000000e+00> : vector<8x512xf32>
    %283 = tpu.matmul %282, %4, %cst_131 {dimension_numbers = #tpu.dot_dimension_numbers<[1], [0], [0], [1], [0, 0, 1, 1], [], []>} : vector<8x128xbf16>, vector<128x512xbf16>, vector<8x512xf32> -> vector<8x512xf32>
    %284 = arith.addf %277, %283 : vector<8x512xf32>
    %285 = vector.extract_strided_slice %284 {offsets = [0, 0], sizes = [8, 128], strides = [1, 1]} : vector<8x512xf32> to vector<8x128xf32>
    %286 = arith.negf %285 : vector<8x128xf32>
    %287 = math.exp %286 : vector<8x128xf32>
    %cst_132 = arith.constant 1.000000e+00 : f32
    %288 = vector.broadcast %cst_132 : f32 to vector<8x128xf32>
    %289 = arith.addf %288, %287 : vector<8x128xf32>
    %290 = arith.divf %288, %289 : vector<8x128xf32>
    %291 = vector.extract_strided_slice %284 {offsets = [0, 128], sizes = [8, 128], strides = [1, 1]} : vector<8x512xf32> to vector<8x128xf32>
    %292 = arith.negf %291 : vector<8x128xf32>
    %293 = math.exp %292 : vector<8x128xf32>
    %cst_133 = arith.constant 1.000000e+00 : f32
    %294 = vector.broadcast %cst_133 : f32 to vector<8x128xf32>
    %295 = arith.addf %294, %293 : vector<8x128xf32>
    %296 = arith.divf %294, %295 : vector<8x128xf32>
    %297 = vector.extract_strided_slice %284 {offsets = [0, 256], sizes = [8, 128], strides = [1, 1]} : vector<8x512xf32> to vector<8x128xf32>
    %298 = math.tanh %297 : vector<8x128xf32>
    %299 = vector.extract_strided_slice %284 {offsets = [0, 384], sizes = [8, 128], strides = [1, 1]} : vector<8x512xf32> to vector<8x128xf32>
    %300 = arith.negf %299 : vector<8x128xf32>
    %301 = math.exp %300 : vector<8x128xf32>
    %cst_134 = arith.constant 1.000000e+00 : f32
    %302 = vector.broadcast %cst_134 : f32 to vector<8x128xf32>
    %303 = arith.addf %302, %301 : vector<8x128xf32>
    %304 = arith.divf %302, %303 : vector<8x128xf32>
    %305 = arith.mulf %296, %281 : vector<8x128xf32>
    %306 = arith.mulf %290, %298 : vector<8x128xf32>
    %307 = arith.addf %305, %306 : vector<8x128xf32>
    %308 = math.tanh %307 : vector<8x128xf32>
    %309 = arith.mulf %304, %308 : vector<8x128xf32>
    %c0_135 = arith.constant 0 : index
    %c0_136 = arith.constant 0 : index
    %c0_137 = arith.constant 0 : index
    %310 = vector.load %arg7[%c0_135, %c0_136, %c0_137] : memref<2x8x128xf32, #tpu.memory_space<vmem>>, vector<1x8x128xf32>
    %311 = vector.shape_cast %310 : vector<1x8x128xf32> to vector<8x128xf32>
    %312 = vector.shape_cast %309 : vector<8x128xf32> to vector<1x8x128xf32>
    tpu.vector_store %arg7[%c0_135, %c0_136, %c0_137], %312 {strides = array<i32>} : memref<2x8x128xf32, #tpu.memory_space<vmem>>, vector<1x8x128xf32>,
    %c0_138 = arith.constant 0 : index
    %c0_139 = arith.constant 0 : index
    %c0_140 = arith.constant 0 : index
    %313 = vector.load %arg8[%c0_138, %c0_139, %c0_140] : memref<2x8x128xf32, #tpu.memory_space<vmem>>, vector<1x8x128xf32>
    %314 = vector.shape_cast %313 : vector<1x8x128xf32> to vector<8x128xf32>
    %315 = vector.shape_cast %307 : vector<8x128xf32> to vector<1x8x128xf32>
    tpu.vector_store %arg8[%c0_138, %c0_139, %c0_140], %315 {strides = array<i32>} : memref<2x8x128xf32, #tpu.memory_space<vmem>>, vector<1x8x128xf32>,
    %316 = arith.index_cast %c6_i32 : i32 to index
    %c0_141 = arith.constant 0 : index
    %c0_142 = arith.constant 0 : index
    %317 = vector.load %arg9[%316, %c0_141, %c0_142] : memref<8x8x128xf32, #tpu.memory_space<vmem>>, vector<1x8x128xf32>
    %318 = vector.shape_cast %317 : vector<1x8x128xf32> to vector<8x128xf32>
    %319 = vector.shape_cast %309 : vector<8x128xf32> to vector<1x8x128xf32>
    tpu.vector_store %arg9[%316, %c0_141, %c0_142], %319 {strides = array<i32>} : memref<8x8x128xf32, #tpu.memory_space<vmem>>, vector<1x8x128xf32>,
    %c7_i32 = arith.constant 7 : i32
    %320 = arith.index_cast %c7_i32 : i32 to index
    %c0_143 = arith.constant 0 : index
    %c0_144 = arith.constant 0 : index
    %321 = vector.load %arg1[%320, %c0_143, %c0_144] : memref<8x8x512xf32, #tpu.memory_space<vmem>>, vector<1x8x512xf32>
    %322 = vector.shape_cast %321 : vector<1x8x512xf32> to vector<8x512xf32>
    %c0_145 = arith.constant 0 : index
    %c0_146 = arith.constant 0 : index
    %c0_147 = arith.constant 0 : index
    %323 = vector.load %arg7[%c0_145, %c0_146, %c0_147] : memref<2x8x128xf32, #tpu.memory_space<vmem>>, vector<1x8x128xf32>
    %324 = vector.shape_cast %323 : vector<1x8x128xf32> to vector<8x128xf32>
    %c0_148 = arith.constant 0 : index
    %c0_149 = arith.constant 0 : index
    %c0_150 = arith.constant 0 : index
    %325 = vector.load %arg8[%c0_148, %c0_149, %c0_150] : memref<2x8x128xf32, #tpu.memory_space<vmem>>, vector<1x8x128xf32>
    %326 = vector.shape_cast %325 : vector<1x8x128xf32> to vector<8x128xf32>
    %327 = arith.truncf %324 : vector<8x128xf32> to vector<8x128xbf16>
    %cst_151 = arith.constant dense<0.000000e+00> : vector<8x512xf32>
    %328 = tpu.matmul %327, %4, %cst_151 {dimension_numbers = #tpu.dot_dimension_numbers<[1], [0], [0], [1], [0, 0, 1, 1], [], []>} : vector<8x128xbf16>, vector<128x512xbf16>, vector<8x512xf32> -> vector<8x512xf32>
    %329 = arith.addf %322, %328 : vector<8x512xf32>
    %330 = vector.extract_strided_slice %329 {offsets = [0, 0], sizes = [8, 128], strides = [1, 1]} : vector<8x512xf32> to vector<8x128xf32>
    %331 = arith.negf %330 : vector<8x128xf32>
    %332 = math.exp %331 : vector<8x128xf32>
    %cst_152 = arith.constant 1.000000e+00 : f32
    %333 = vector.broadcast %cst_152 : f32 to vector<8x128xf32>
    %334 = arith.addf %333, %332 : vector<8x128xf32>
    %335 = arith.divf %333, %334 : vector<8x128xf32>
    %336 = vector.extract_strided_slice %329 {offsets = [0, 128], sizes = [8, 128], strides = [1, 1]} : vector<8x512xf32> to vector<8x128xf32>
    %337 = arith.negf %336 : vector<8x128xf32>
    %338 = math.exp %337 : vector<8x128xf32>
    %cst_153 = arith.constant 1.000000e+00 : f32
    %339 = vector.broadcast %cst_153 : f32 to vector<8x128xf32>
    %340 = arith.addf %339, %338 : vector<8x128xf32>
    %341 = arith.divf %339, %340 : vector<8x128xf32>
    %342 = vector.extract_strided_slice %329 {offsets = [0, 256], sizes = [8, 128], strides = [1, 1]} : vector<8x512xf32> to vector<8x128xf32>
    %343 = math.tanh %342 : vector<8x128xf32>
    %344 = vector.extract_strided_slice %329 {offsets = [0, 384], sizes = [8, 128], strides = [1, 1]} : vector<8x512xf32> to vector<8x128xf32>
    %345 = arith.negf %344 : vector<8x128xf32>
    %346 = math.exp %345 : vector<8x128xf32>
    %cst_154 = arith.constant 1.000000e+00 : f32
    %347 = vector.broadcast %cst_154 : f32 to vector<8x128xf32>
    %348 = arith.addf %347, %346 : vector<8x128xf32>
    %349 = arith.divf %347, %348 : vector<8x128xf32>
    %350 = arith.mulf %341, %326 : vector<8x128xf32>
    %351 = arith.mulf %335, %343 : vector<8x128xf32>
    %352 = arith.addf %350, %351 : vector<8x128xf32>
    %353 = math.tanh %352 : vector<8x128xf32>
    %354 = arith.mulf %349, %353 : vector<8x128xf32>
    %c0_155 = arith.constant 0 : index
    %c0_156 = arith.constant 0 : index
    %c0_157 = arith.constant 0 : index
    %355 = vector.load %arg7[%c0_155, %c0_156, %c0_157] : memref<2x8x128xf32, #tpu.memory_space<vmem>>, vector<1x8x128xf32>
    %356 = vector.shape_cast %355 : vector<1x8x128xf32> to vector<8x128xf32>
    %357 = vector.shape_cast %354 : vector<8x128xf32> to vector<1x8x128xf32>
    tpu.vector_store %arg7[%c0_155, %c0_156, %c0_157], %357 {strides = array<i32>} : memref<2x8x128xf32, #tpu.memory_space<vmem>>, vector<1x8x128xf32>,
    %c0_158 = arith.constant 0 : index
    %c0_159 = arith.constant 0 : index
    %c0_160 = arith.constant 0 : index
    %358 = vector.load %arg8[%c0_158, %c0_159, %c0_160] : memref<2x8x128xf32, #tpu.memory_space<vmem>>, vector<1x8x128xf32>
    %359 = vector.shape_cast %358 : vector<1x8x128xf32> to vector<8x128xf32>
    %360 = vector.shape_cast %352 : vector<8x128xf32> to vector<1x8x128xf32>
    tpu.vector_store %arg8[%c0_158, %c0_159, %c0_160], %360 {strides = array<i32>} : memref<2x8x128xf32, #tpu.memory_space<vmem>>, vector<1x8x128xf32>,
    %361 = arith.index_cast %c7_i32 : i32 to index
    %c0_161 = arith.constant 0 : index
    %c0_162 = arith.constant 0 : index
    %362 = vector.load %arg9[%361, %c0_161, %c0_162] : memref<8x8x128xf32, #tpu.memory_space<vmem>>, vector<1x8x128xf32>
    %363 = vector.shape_cast %362 : vector<1x8x128xf32> to vector<8x128xf32>
    %364 = vector.shape_cast %354 : vector<8x128xf32> to vector<1x8x128xf32>
    tpu.vector_store %arg9[%361, %c0_161, %c0_162], %364 {strides = array<i32>} : memref<8x8x128xf32, #tpu.memory_space<vmem>>, vector<1x8x128xf32>,
    %c8_i32 = arith.constant 8 : i32
    %c0_163 = arith.constant 0 : index
    %c0_164 = arith.constant 0 : index
    %c0_165 = arith.constant 0 : index
    %365 = vector.load %arg9[%c0_163, %c0_164, %c0_165] : memref<8x8x128xf32, #tpu.memory_space<vmem>>, vector<8x8x128xf32>
    %366 = arith.truncf %365 : vector<8x8x128xf32> to vector<8x8x128xbf16>
    %367 = vector.shape_cast %366 : vector<8x8x128xbf16> to vector<64x128xbf16>
    %c0_166 = arith.constant 0 : index
    %c0_167 = arith.constant 0 : index
    %c0_168 = arith.constant 0 : index
    %368 = vector.load %arg3[%c0_166, %c0_167, %c0_168] : memref<1x128x512xbf16, #tpu.memory_space<vmem>>, vector<1x128x512xbf16>
    %369 = vector.shape_cast %368 : vector<1x128x512xbf16> to vector<128x512xbf16>
    %cst_169 = arith.constant dense<0.000000e+00> : vector<64x512xf32>
    %370 = tpu.matmul %367, %369, %cst_169 {dimension_numbers = #tpu.dot_dimension_numbers<[1], [0], [0], [1], [0, 0, 1, 1], [], []>} : vector<64x128xbf16>, vector<128x512xbf16>, vector<64x512xf32> -> vector<64x512xf32>
    %371 = vector.shape_cast %370 : vector<64x512xf32> to vector<8x8x512xf32>
    %c0_170 = arith.constant 0 : index
    %c0_171 = arith.constant 0 : index
    %c0_172 = arith.constant 0 : index
    %372 = vector.load %arg4[%c0_170, %c0_171, %c0_172] : memref<1x8x512xf32, #tpu.memory_space<vmem>>, vector<1x8x512xf32>
    %373 = vector.shape_cast %372 : vector<1x8x512xf32> to vector<8x512xf32>
    %374 = vector.shape_cast %373 : vector<8x512xf32> to vector<1x8x512xf32>
    %375 = vector.broadcast %374 : vector<1x8x512xf32> to vector<8x8x512xf32>
    %376 = arith.addf %371, %375 : vector<8x8x512xf32>
    %c0_173 = arith.constant 0 : index
    %c0_174 = arith.constant 0 : index
    %c0_175 = arith.constant 0 : index
    %377 = vector.load %arg10[%c0_173, %c0_174, %c0_175] : memref<8x8x512xf32, #tpu.memory_space<vmem>>, vector<8x8x512xf32>
    tpu.vector_store %arg10[%c0_173, %c0_174, %c0_175], %376 {strides = array<i32>} : memref<8x8x512xf32, #tpu.memory_space<vmem>>, vector<8x8x512xf32>,
    %c1 = arith.constant 1 : index
    %c0_176 = arith.constant 0 : index
    %c0_177 = arith.constant 0 : index
    %378 = vector.load %arg2[%c1, %c0_176, %c0_177] : memref<2x128x512xbf16, #tpu.memory_space<vmem>>, vector<1x128x512xbf16>
    %379 = vector.shape_cast %378 : vector<1x128x512xbf16> to vector<128x512xbf16>
    %c0_i32_178 = arith.constant 0 : i32
    %380 = arith.index_cast %c0_i32_178 : i32 to index
    %c0_179 = arith.constant 0 : index
    %c0_180 = arith.constant 0 : index
    %381 = vector.load %arg10[%380, %c0_179, %c0_180] : memref<8x8x512xf32, #tpu.memory_space<vmem>>, vector<1x8x512xf32>
    %382 = vector.shape_cast %381 : vector<1x8x512xf32> to vector<8x512xf32>
    %c1_181 = arith.constant 1 : index
    %c0_182 = arith.constant 0 : index
    %c0_183 = arith.constant 0 : index
    %383 = vector.load %arg7[%c1_181, %c0_182, %c0_183] : memref<2x8x128xf32, #tpu.memory_space<vmem>>, vector<1x8x128xf32>
    %384 = vector.shape_cast %383 : vector<1x8x128xf32> to vector<8x128xf32>
    %c1_184 = arith.constant 1 : index
    %c0_185 = arith.constant 0 : index
    %c0_186 = arith.constant 0 : index
    %385 = vector.load %arg8[%c1_184, %c0_185, %c0_186] : memref<2x8x128xf32, #tpu.memory_space<vmem>>, vector<1x8x128xf32>
    %386 = vector.shape_cast %385 : vector<1x8x128xf32> to vector<8x128xf32>
    %387 = arith.truncf %384 : vector<8x128xf32> to vector<8x128xbf16>
    %cst_187 = arith.constant dense<0.000000e+00> : vector<8x512xf32>
    %388 = tpu.matmul %387, %379, %cst_187 {dimension_numbers = #tpu.dot_dimension_numbers<[1], [0], [0], [1], [0, 0, 1, 1], [], []>} : vector<8x128xbf16>, vector<128x512xbf16>, vector<8x512xf32> -> vector<8x512xf32>
    %389 = arith.addf %382, %388 : vector<8x512xf32>
    %390 = vector.extract_strided_slice %389 {offsets = [0, 0], sizes = [8, 128], strides = [1, 1]} : vector<8x512xf32> to vector<8x128xf32>
    %391 = arith.negf %390 : vector<8x128xf32>
    %392 = math.exp %391 : vector<8x128xf32>
    %cst_188 = arith.constant 1.000000e+00 : f32
    %393 = vector.broadcast %cst_188 : f32 to vector<8x128xf32>
    %394 = arith.addf %393, %392 : vector<8x128xf32>
    %395 = arith.divf %393, %394 : vector<8x128xf32>
    %396 = vector.extract_strided_slice %389 {offsets = [0, 128], sizes = [8, 128], strides = [1, 1]} : vector<8x512xf32> to vector<8x128xf32>
    %397 = arith.negf %396 : vector<8x128xf32>
    %398 = math.exp %397 : vector<8x128xf32>
    %cst_189 = arith.constant 1.000000e+00 : f32
    %399 = vector.broadcast %cst_189 : f32 to vector<8x128xf32>
    %400 = arith.addf %399, %398 : vector<8x128xf32>
    %401 = arith.divf %399, %400 : vector<8x128xf32>
    %402 = vector.extract_strided_slice %389 {offsets = [0, 256], sizes = [8, 128], strides = [1, 1]} : vector<8x512xf32> to vector<8x128xf32>
    %403 = math.tanh %402 : vector<8x128xf32>
    %404 = vector.extract_strided_slice %389 {offsets = [0, 384], sizes = [8, 128], strides = [1, 1]} : vector<8x512xf32> to vector<8x128xf32>
    %405 = arith.negf %404 : vector<8x128xf32>
    %406 = math.exp %405 : vector<8x128xf32>
    %cst_190 = arith.constant 1.000000e+00 : f32
    %407 = vector.broadcast %cst_190 : f32 to vector<8x128xf32>
    %408 = arith.addf %407, %406 : vector<8x128xf32>
    %409 = arith.divf %407, %408 : vector<8x128xf32>
    %410 = arith.mulf %401, %386 : vector<8x128xf32>
    %411 = arith.mulf %395, %403 : vector<8x128xf32>
    %412 = arith.addf %410, %411 : vector<8x128xf32>
    %413 = math.tanh %412 : vector<8x128xf32>
    %414 = arith.mulf %409, %413 : vector<8x128xf32>
    %c1_191 = arith.constant 1 : index
    %c0_192 = arith.constant 0 : index
    %c0_193 = arith.constant 0 : index
    %415 = vector.load %arg7[%c1_191, %c0_192, %c0_193] : memref<2x8x128xf32, #tpu.memory_space<vmem>>, vector<1x8x128xf32>
    %416 = vector.shape_cast %415 : vector<1x8x128xf32> to vector<8x128xf32>
    %417 = vector.shape_cast %414 : vector<8x128xf32> to vector<1x8x128xf32>
    tpu.vector_store %arg7[%c1_191, %c0_192, %c0_193], %417 {strides = array<i32>} : memref<2x8x128xf32, #tpu.memory_space<vmem>>, vector<1x8x128xf32>,
    %c1_194 = arith.constant 1 : index
    %c0_195 = arith.constant 0 : index
    %c0_196 = arith.constant 0 : index
    %418 = vector.load %arg8[%c1_194, %c0_195, %c0_196] : memref<2x8x128xf32, #tpu.memory_space<vmem>>, vector<1x8x128xf32>
    %419 = vector.shape_cast %418 : vector<1x8x128xf32> to vector<8x128xf32>
    %420 = vector.shape_cast %412 : vector<8x128xf32> to vector<1x8x128xf32>
    tpu.vector_store %arg8[%c1_194, %c0_195, %c0_196], %420 {strides = array<i32>} : memref<2x8x128xf32, #tpu.memory_space<vmem>>, vector<1x8x128xf32>,
    %c1_i32_197 = arith.constant 1 : i32
    %421 = arith.index_cast %c1_i32_197 : i32 to index
    %c0_198 = arith.constant 0 : index
    %c0_199 = arith.constant 0 : index
    %422 = vector.load %arg10[%421, %c0_198, %c0_199] : memref<8x8x512xf32, #tpu.memory_space<vmem>>, vector<1x8x512xf32>
    %423 = vector.shape_cast %422 : vector<1x8x512xf32> to vector<8x512xf32>
    %c1_200 = arith.constant 1 : index
    %c0_201 = arith.constant 0 : index
    %c0_202 = arith.constant 0 : index
    %424 = vector.load %arg7[%c1_200, %c0_201, %c0_202] : memref<2x8x128xf32, #tpu.memory_space<vmem>>, vector<1x8x128xf32>
    %425 = vector.shape_cast %424 : vector<1x8x128xf32> to vector<8x128xf32>
    %c1_203 = arith.constant 1 : index
    %c0_204 = arith.constant 0 : index
    %c0_205 = arith.constant 0 : index
    %426 = vector.load %arg8[%c1_203, %c0_204, %c0_205] : memref<2x8x128xf32, #tpu.memory_space<vmem>>, vector<1x8x128xf32>
    %427 = vector.shape_cast %426 : vector<1x8x128xf32> to vector<8x128xf32>
    %428 = arith.truncf %425 : vector<8x128xf32> to vector<8x128xbf16>
    %cst_206 = arith.constant dense<0.000000e+00> : vector<8x512xf32>
    %429 = tpu.matmul %428, %379, %cst_206 {dimension_numbers = #tpu.dot_dimension_numbers<[1], [0], [0], [1], [0, 0, 1, 1], [], []>} : vector<8x128xbf16>, vector<128x512xbf16>, vector<8x512xf32> -> vector<8x512xf32>
    %430 = arith.addf %423, %429 : vector<8x512xf32>
    %431 = vector.extract_strided_slice %430 {offsets = [0, 0], sizes = [8, 128], strides = [1, 1]} : vector<8x512xf32> to vector<8x128xf32>
    %432 = arith.negf %431 : vector<8x128xf32>
    %433 = math.exp %432 : vector<8x128xf32>
    %cst_207 = arith.constant 1.000000e+00 : f32
    %434 = vector.broadcast %cst_207 : f32 to vector<8x128xf32>
    %435 = arith.addf %434, %433 : vector<8x128xf32>
    %436 = arith.divf %434, %435 : vector<8x128xf32>
    %437 = vector.extract_strided_slice %430 {offsets = [0, 128], sizes = [8, 128], strides = [1, 1]} : vector<8x512xf32> to vector<8x128xf32>
    %438 = arith.negf %437 : vector<8x128xf32>
    %439 = math.exp %438 : vector<8x128xf32>
    %cst_208 = arith.constant 1.000000e+00 : f32
    %440 = vector.broadcast %cst_208 : f32 to vector<8x128xf32>
    %441 = arith.addf %440, %439 : vector<8x128xf32>
    %442 = arith.divf %440, %441 : vector<8x128xf32>
    %443 = vector.extract_strided_slice %430 {offsets = [0, 256], sizes = [8, 128], strides = [1, 1]} : vector<8x512xf32> to vector<8x128xf32>
    %444 = math.tanh %443 : vector<8x128xf32>
    %445 = vector.extract_strided_slice %430 {offsets = [0, 384], sizes = [8, 128], strides = [1, 1]} : vector<8x512xf32> to vector<8x128xf32>
    %446 = arith.negf %445 : vector<8x128xf32>
    %447 = math.exp %446 : vector<8x128xf32>
    %cst_209 = arith.constant 1.000000e+00 : f32
    %448 = vector.broadcast %cst_209 : f32 to vector<8x128xf32>
    %449 = arith.addf %448, %447 : vector<8x128xf32>
    %450 = arith.divf %448, %449 : vector<8x128xf32>
    %451 = arith.mulf %442, %427 : vector<8x128xf32>
    %452 = arith.mulf %436, %444 : vector<8x128xf32>
    %453 = arith.addf %451, %452 : vector<8x128xf32>
    %454 = math.tanh %453 : vector<8x128xf32>
    %455 = arith.mulf %450, %454 : vector<8x128xf32>
    %c1_210 = arith.constant 1 : index
    %c0_211 = arith.constant 0 : index
    %c0_212 = arith.constant 0 : index
    %456 = vector.load %arg7[%c1_210, %c0_211, %c0_212] : memref<2x8x128xf32, #tpu.memory_space<vmem>>, vector<1x8x128xf32>
    %457 = vector.shape_cast %456 : vector<1x8x128xf32> to vector<8x128xf32>
    %458 = vector.shape_cast %455 : vector<8x128xf32> to vector<1x8x128xf32>
    tpu.vector_store %arg7[%c1_210, %c0_211, %c0_212], %458 {strides = array<i32>} : memref<2x8x128xf32, #tpu.memory_space<vmem>>, vector<1x8x128xf32>,
    %c1_213 = arith.constant 1 : index
    %c0_214 = arith.constant 0 : index
    %c0_215 = arith.constant 0 : index
    %459 = vector.load %arg8[%c1_213, %c0_214, %c0_215] : memref<2x8x128xf32, #tpu.memory_space<vmem>>, vector<1x8x128xf32>
    %460 = vector.shape_cast %459 : vector<1x8x128xf32> to vector<8x128xf32>
    %461 = vector.shape_cast %453 : vector<8x128xf32> to vector<1x8x128xf32>
    tpu.vector_store %arg8[%c1_213, %c0_214, %c0_215], %461 {strides = array<i32>} : memref<2x8x128xf32, #tpu.memory_space<vmem>>, vector<1x8x128xf32>,
    %c2_i32_216 = arith.constant 2 : i32
    %462 = arith.index_cast %c2_i32_216 : i32 to index
    %c0_217 = arith.constant 0 : index
    %c0_218 = arith.constant 0 : index
    %463 = vector.load %arg10[%462, %c0_217, %c0_218] : memref<8x8x512xf32, #tpu.memory_space<vmem>>, vector<1x8x512xf32>
    %464 = vector.shape_cast %463 : vector<1x8x512xf32> to vector<8x512xf32>
    %c1_219 = arith.constant 1 : index
    %c0_220 = arith.constant 0 : index
    %c0_221 = arith.constant 0 : index
    %465 = vector.load %arg7[%c1_219, %c0_220, %c0_221] : memref<2x8x128xf32, #tpu.memory_space<vmem>>, vector<1x8x128xf32>
    %466 = vector.shape_cast %465 : vector<1x8x128xf32> to vector<8x128xf32>
    %c1_222 = arith.constant 1 : index
    %c0_223 = arith.constant 0 : index
    %c0_224 = arith.constant 0 : index
    %467 = vector.load %arg8[%c1_222, %c0_223, %c0_224] : memref<2x8x128xf32, #tpu.memory_space<vmem>>, vector<1x8x128xf32>
    %468 = vector.shape_cast %467 : vector<1x8x128xf32> to vector<8x128xf32>
    %469 = arith.truncf %466 : vector<8x128xf32> to vector<8x128xbf16>
    %cst_225 = arith.constant dense<0.000000e+00> : vector<8x512xf32>
    %470 = tpu.matmul %469, %379, %cst_225 {dimension_numbers = #tpu.dot_dimension_numbers<[1], [0], [0], [1], [0, 0, 1, 1], [], []>} : vector<8x128xbf16>, vector<128x512xbf16>, vector<8x512xf32> -> vector<8x512xf32>
    %471 = arith.addf %464, %470 : vector<8x512xf32>
    %472 = vector.extract_strided_slice %471 {offsets = [0, 0], sizes = [8, 128], strides = [1, 1]} : vector<8x512xf32> to vector<8x128xf32>
    %473 = arith.negf %472 : vector<8x128xf32>
    %474 = math.exp %473 : vector<8x128xf32>
    %cst_226 = arith.constant 1.000000e+00 : f32
    %475 = vector.broadcast %cst_226 : f32 to vector<8x128xf32>
    %476 = arith.addf %475, %474 : vector<8x128xf32>
    %477 = arith.divf %475, %476 : vector<8x128xf32>
    %478 = vector.extract_strided_slice %471 {offsets = [0, 128], sizes = [8, 128], strides = [1, 1]} : vector<8x512xf32> to vector<8x128xf32>
    %479 = arith.negf %478 : vector<8x128xf32>
    %480 = math.exp %479 : vector<8x128xf32>
    %cst_227 = arith.constant 1.000000e+00 : f32
    %481 = vector.broadcast %cst_227 : f32 to vector<8x128xf32>
    %482 = arith.addf %481, %480 : vector<8x128xf32>
    %483 = arith.divf %481, %482 : vector<8x128xf32>
    %484 = vector.extract_strided_slice %471 {offsets = [0, 256], sizes = [8, 128], strides = [1, 1]} : vector<8x512xf32> to vector<8x128xf32>
    %485 = math.tanh %484 : vector<8x128xf32>
    %486 = vector.extract_strided_slice %471 {offsets = [0, 384], sizes = [8, 128], strides = [1, 1]} : vector<8x512xf32> to vector<8x128xf32>
    %487 = arith.negf %486 : vector<8x128xf32>
    %488 = math.exp %487 : vector<8x128xf32>
    %cst_228 = arith.constant 1.000000e+00 : f32
    %489 = vector.broadcast %cst_228 : f32 to vector<8x128xf32>
    %490 = arith.addf %489, %488 : vector<8x128xf32>
    %491 = arith.divf %489, %490 : vector<8x128xf32>
    %492 = arith.mulf %483, %468 : vector<8x128xf32>
    %493 = arith.mulf %477, %485 : vector<8x128xf32>
    %494 = arith.addf %492, %493 : vector<8x128xf32>
    %495 = math.tanh %494 : vector<8x128xf32>
    %496 = arith.mulf %491, %495 : vector<8x128xf32>
    %c1_229 = arith.constant 1 : index
    %c0_230 = arith.constant 0 : index
    %c0_231 = arith.constant 0 : index
    %497 = vector.load %arg7[%c1_229, %c0_230, %c0_231] : memref<2x8x128xf32, #tpu.memory_space<vmem>>, vector<1x8x128xf32>
    %498 = vector.shape_cast %497 : vector<1x8x128xf32> to vector<8x128xf32>
    %499 = vector.shape_cast %496 : vector<8x128xf32> to vector<1x8x128xf32>
    tpu.vector_store %arg7[%c1_229, %c0_230, %c0_231], %499 {strides = array<i32>} : memref<2x8x128xf32, #tpu.memory_space<vmem>>, vector<1x8x128xf32>,
    %c1_232 = arith.constant 1 : index
    %c0_233 = arith.constant 0 : index
    %c0_234 = arith.constant 0 : index
    %500 = vector.load %arg8[%c1_232, %c0_233, %c0_234] : memref<2x8x128xf32, #tpu.memory_space<vmem>>, vector<1x8x128xf32>
    %501 = vector.shape_cast %500 : vector<1x8x128xf32> to vector<8x128xf32>
    %502 = vector.shape_cast %494 : vector<8x128xf32> to vector<1x8x128xf32>
    tpu.vector_store %arg8[%c1_232, %c0_233, %c0_234], %502 {strides = array<i32>} : memref<2x8x128xf32, #tpu.memory_space<vmem>>, vector<1x8x128xf32>,
    %c3_i32_235 = arith.constant 3 : i32
    %503 = arith.index_cast %c3_i32_235 : i32 to index
    %c0_236 = arith.constant 0 : index
    %c0_237 = arith.constant 0 : index
    %504 = vector.load %arg10[%503, %c0_236, %c0_237] : memref<8x8x512xf32, #tpu.memory_space<vmem>>, vector<1x8x512xf32>
    %505 = vector.shape_cast %504 : vector<1x8x512xf32> to vector<8x512xf32>
    %c1_238 = arith.constant 1 : index
    %c0_239 = arith.constant 0 : index
    %c0_240 = arith.constant 0 : index
    %506 = vector.load %arg7[%c1_238, %c0_239, %c0_240] : memref<2x8x128xf32, #tpu.memory_space<vmem>>, vector<1x8x128xf32>
    %507 = vector.shape_cast %506 : vector<1x8x128xf32> to vector<8x128xf32>
    %c1_241 = arith.constant 1 : index
    %c0_242 = arith.constant 0 : index
    %c0_243 = arith.constant 0 : index
    %508 = vector.load %arg8[%c1_241, %c0_242, %c0_243] : memref<2x8x128xf32, #tpu.memory_space<vmem>>, vector<1x8x128xf32>
    %509 = vector.shape_cast %508 : vector<1x8x128xf32> to vector<8x128xf32>
    %510 = arith.truncf %507 : vector<8x128xf32> to vector<8x128xbf16>
    %cst_244 = arith.constant dense<0.000000e+00> : vector<8x512xf32>
    %511 = tpu.matmul %510, %379, %cst_244 {dimension_numbers = #tpu.dot_dimension_numbers<[1], [0], [0], [1], [0, 0, 1, 1], [], []>} : vector<8x128xbf16>, vector<128x512xbf16>, vector<8x512xf32> -> vector<8x512xf32>
    %512 = arith.addf %505, %511 : vector<8x512xf32>
    %513 = vector.extract_strided_slice %512 {offsets = [0, 0], sizes = [8, 128], strides = [1, 1]} : vector<8x512xf32> to vector<8x128xf32>
    %514 = arith.negf %513 : vector<8x128xf32>
    %515 = math.exp %514 : vector<8x128xf32>
    %cst_245 = arith.constant 1.000000e+00 : f32
    %516 = vector.broadcast %cst_245 : f32 to vector<8x128xf32>
    %517 = arith.addf %516, %515 : vector<8x128xf32>
    %518 = arith.divf %516, %517 : vector<8x128xf32>
    %519 = vector.extract_strided_slice %512 {offsets = [0, 128], sizes = [8, 128], strides = [1, 1]} : vector<8x512xf32> to vector<8x128xf32>
    %520 = arith.negf %519 : vector<8x128xf32>
    %521 = math.exp %520 : vector<8x128xf32>
    %cst_246 = arith.constant 1.000000e+00 : f32
    %522 = vector.broadcast %cst_246 : f32 to vector<8x128xf32>
    %523 = arith.addf %522, %521 : vector<8x128xf32>
    %524 = arith.divf %522, %523 : vector<8x128xf32>
    %525 = vector.extract_strided_slice %512 {offsets = [0, 256], sizes = [8, 128], strides = [1, 1]} : vector<8x512xf32> to vector<8x128xf32>
    %526 = math.tanh %525 : vector<8x128xf32>
    %527 = vector.extract_strided_slice %512 {offsets = [0, 384], sizes = [8, 128], strides = [1, 1]} : vector<8x512xf32> to vector<8x128xf32>
    %528 = arith.negf %527 : vector<8x128xf32>
    %529 = math.exp %528 : vector<8x128xf32>
    %cst_247 = arith.constant 1.000000e+00 : f32
    %530 = vector.broadcast %cst_247 : f32 to vector<8x128xf32>
    %531 = arith.addf %530, %529 : vector<8x128xf32>
    %532 = arith.divf %530, %531 : vector<8x128xf32>
    %533 = arith.mulf %524, %509 : vector<8x128xf32>
    %534 = arith.mulf %518, %526 : vector<8x128xf32>
    %535 = arith.addf %533, %534 : vector<8x128xf32>
    %536 = math.tanh %535 : vector<8x128xf32>
    %537 = arith.mulf %532, %536 : vector<8x128xf32>
    %c1_248 = arith.constant 1 : index
    %c0_249 = arith.constant 0 : index
    %c0_250 = arith.constant 0 : index
    %538 = vector.load %arg7[%c1_248, %c0_249, %c0_250] : memref<2x8x128xf32, #tpu.memory_space<vmem>>, vector<1x8x128xf32>
    %539 = vector.shape_cast %538 : vector<1x8x128xf32> to vector<8x128xf32>
    %540 = vector.shape_cast %537 : vector<8x128xf32> to vector<1x8x128xf32>
    tpu.vector_store %arg7[%c1_248, %c0_249, %c0_250], %540 {strides = array<i32>} : memref<2x8x128xf32, #tpu.memory_space<vmem>>, vector<1x8x128xf32>,
    %c1_251 = arith.constant 1 : index
    %c0_252 = arith.constant 0 : index
    %c0_253 = arith.constant 0 : index
    %541 = vector.load %arg8[%c1_251, %c0_252, %c0_253] : memref<2x8x128xf32, #tpu.memory_space<vmem>>, vector<1x8x128xf32>
    %542 = vector.shape_cast %541 : vector<1x8x128xf32> to vector<8x128xf32>
    %543 = vector.shape_cast %535 : vector<8x128xf32> to vector<1x8x128xf32>
    tpu.vector_store %arg8[%c1_251, %c0_252, %c0_253], %543 {strides = array<i32>} : memref<2x8x128xf32, #tpu.memory_space<vmem>>, vector<1x8x128xf32>,
    %c4_i32_254 = arith.constant 4 : i32
    %544 = arith.index_cast %c4_i32_254 : i32 to index
    %c0_255 = arith.constant 0 : index
    %c0_256 = arith.constant 0 : index
    %545 = vector.load %arg10[%544, %c0_255, %c0_256] : memref<8x8x512xf32, #tpu.memory_space<vmem>>, vector<1x8x512xf32>
    %546 = vector.shape_cast %545 : vector<1x8x512xf32> to vector<8x512xf32>
    %c1_257 = arith.constant 1 : index
    %c0_258 = arith.constant 0 : index
    %c0_259 = arith.constant 0 : index
    %547 = vector.load %arg7[%c1_257, %c0_258, %c0_259] : memref<2x8x128xf32, #tpu.memory_space<vmem>>, vector<1x8x128xf32>
    %548 = vector.shape_cast %547 : vector<1x8x128xf32> to vector<8x128xf32>
    %c1_260 = arith.constant 1 : index
    %c0_261 = arith.constant 0 : index
    %c0_262 = arith.constant 0 : index
    %549 = vector.load %arg8[%c1_260, %c0_261, %c0_262] : memref<2x8x128xf32, #tpu.memory_space<vmem>>, vector<1x8x128xf32>
    %550 = vector.shape_cast %549 : vector<1x8x128xf32> to vector<8x128xf32>
    %551 = arith.truncf %548 : vector<8x128xf32> to vector<8x128xbf16>
    %cst_263 = arith.constant dense<0.000000e+00> : vector<8x512xf32>
    %552 = tpu.matmul %551, %379, %cst_263 {dimension_numbers = #tpu.dot_dimension_numbers<[1], [0], [0], [1], [0, 0, 1, 1], [], []>} : vector<8x128xbf16>, vector<128x512xbf16>, vector<8x512xf32> -> vector<8x512xf32>
    %553 = arith.addf %546, %552 : vector<8x512xf32>
    %554 = vector.extract_strided_slice %553 {offsets = [0, 0], sizes = [8, 128], strides = [1, 1]} : vector<8x512xf32> to vector<8x128xf32>
    %555 = arith.negf %554 : vector<8x128xf32>
    %556 = math.exp %555 : vector<8x128xf32>
    %cst_264 = arith.constant 1.000000e+00 : f32
    %557 = vector.broadcast %cst_264 : f32 to vector<8x128xf32>
    %558 = arith.addf %557, %556 : vector<8x128xf32>
    %559 = arith.divf %557, %558 : vector<8x128xf32>
    %560 = vector.extract_strided_slice %553 {offsets = [0, 128], sizes = [8, 128], strides = [1, 1]} : vector<8x512xf32> to vector<8x128xf32>
    %561 = arith.negf %560 : vector<8x128xf32>
    %562 = math.exp %561 : vector<8x128xf32>
    %cst_265 = arith.constant 1.000000e+00 : f32
    %563 = vector.broadcast %cst_265 : f32 to vector<8x128xf32>
    %564 = arith.addf %563, %562 : vector<8x128xf32>
    %565 = arith.divf %563, %564 : vector<8x128xf32>
    %566 = vector.extract_strided_slice %553 {offsets = [0, 256], sizes = [8, 128], strides = [1, 1]} : vector<8x512xf32> to vector<8x128xf32>
    %567 = math.tanh %566 : vector<8x128xf32>
    %568 = vector.extract_strided_slice %553 {offsets = [0, 384], sizes = [8, 128], strides = [1, 1]} : vector<8x512xf32> to vector<8x128xf32>
    %569 = arith.negf %568 : vector<8x128xf32>
    %570 = math.exp %569 : vector<8x128xf32>
    %cst_266 = arith.constant 1.000000e+00 : f32
    %571 = vector.broadcast %cst_266 : f32 to vector<8x128xf32>
    %572 = arith.addf %571, %570 : vector<8x128xf32>
    %573 = arith.divf %571, %572 : vector<8x128xf32>
    %574 = arith.mulf %565, %550 : vector<8x128xf32>
    %575 = arith.mulf %559, %567 : vector<8x128xf32>
    %576 = arith.addf %574, %575 : vector<8x128xf32>
    %577 = math.tanh %576 : vector<8x128xf32>
    %578 = arith.mulf %573, %577 : vector<8x128xf32>
    %c1_267 = arith.constant 1 : index
    %c0_268 = arith.constant 0 : index
    %c0_269 = arith.constant 0 : index
    %579 = vector.load %arg7[%c1_267, %c0_268, %c0_269] : memref<2x8x128xf32, #tpu.memory_space<vmem>>, vector<1x8x128xf32>
    %580 = vector.shape_cast %579 : vector<1x8x128xf32> to vector<8x128xf32>
    %581 = vector.shape_cast %578 : vector<8x128xf32> to vector<1x8x128xf32>
    tpu.vector_store %arg7[%c1_267, %c0_268, %c0_269], %581 {strides = array<i32>} : memref<2x8x128xf32, #tpu.memory_space<vmem>>, vector<1x8x128xf32>,
    %c1_270 = arith.constant 1 : index
    %c0_271 = arith.constant 0 : index
    %c0_272 = arith.constant 0 : index
    %582 = vector.load %arg8[%c1_270, %c0_271, %c0_272] : memref<2x8x128xf32, #tpu.memory_space<vmem>>, vector<1x8x128xf32>
    %583 = vector.shape_cast %582 : vector<1x8x128xf32> to vector<8x128xf32>
    %584 = vector.shape_cast %576 : vector<8x128xf32> to vector<1x8x128xf32>
    tpu.vector_store %arg8[%c1_270, %c0_271, %c0_272], %584 {strides = array<i32>} : memref<2x8x128xf32, #tpu.memory_space<vmem>>, vector<1x8x128xf32>,
    %c5_i32_273 = arith.constant 5 : i32
    %585 = arith.index_cast %c5_i32_273 : i32 to index
    %c0_274 = arith.constant 0 : index
    %c0_275 = arith.constant 0 : index
    %586 = vector.load %arg10[%585, %c0_274, %c0_275] : memref<8x8x512xf32, #tpu.memory_space<vmem>>, vector<1x8x512xf32>
    %587 = vector.shape_cast %586 : vector<1x8x512xf32> to vector<8x512xf32>
    %c1_276 = arith.constant 1 : index
    %c0_277 = arith.constant 0 : index
    %c0_278 = arith.constant 0 : index
    %588 = vector.load %arg7[%c1_276, %c0_277, %c0_278] : memref<2x8x128xf32, #tpu.memory_space<vmem>>, vector<1x8x128xf32>
    %589 = vector.shape_cast %588 : vector<1x8x128xf32> to vector<8x128xf32>
    %c1_279 = arith.constant 1 : index
    %c0_280 = arith.constant 0 : index
    %c0_281 = arith.constant 0 : index
    %590 = vector.load %arg8[%c1_279, %c0_280, %c0_281] : memref<2x8x128xf32, #tpu.memory_space<vmem>>, vector<1x8x128xf32>
    %591 = vector.shape_cast %590 : vector<1x8x128xf32> to vector<8x128xf32>
    %592 = arith.truncf %589 : vector<8x128xf32> to vector<8x128xbf16>
    %cst_282 = arith.constant dense<0.000000e+00> : vector<8x512xf32>
    %593 = tpu.matmul %592, %379, %cst_282 {dimension_numbers = #tpu.dot_dimension_numbers<[1], [0], [0], [1], [0, 0, 1, 1], [], []>} : vector<8x128xbf16>, vector<128x512xbf16>, vector<8x512xf32> -> vector<8x512xf32>
    %594 = arith.addf %587, %593 : vector<8x512xf32>
    %595 = vector.extract_strided_slice %594 {offsets = [0, 0], sizes = [8, 128], strides = [1, 1]} : vector<8x512xf32> to vector<8x128xf32>
    %596 = arith.negf %595 : vector<8x128xf32>
    %597 = math.exp %596 : vector<8x128xf32>
    %cst_283 = arith.constant 1.000000e+00 : f32
    %598 = vector.broadcast %cst_283 : f32 to vector<8x128xf32>
    %599 = arith.addf %598, %597 : vector<8x128xf32>
    %600 = arith.divf %598, %599 : vector<8x128xf32>
    %601 = vector.extract_strided_slice %594 {offsets = [0, 128], sizes = [8, 128], strides = [1, 1]} : vector<8x512xf32> to vector<8x128xf32>
    %602 = arith.negf %601 : vector<8x128xf32>
    %603 = math.exp %602 : vector<8x128xf32>
    %cst_284 = arith.constant 1.000000e+00 : f32
    %604 = vector.broadcast %cst_284 : f32 to vector<8x128xf32>
    %605 = arith.addf %604, %603 : vector<8x128xf32>
    %606 = arith.divf %604, %605 : vector<8x128xf32>
    %607 = vector.extract_strided_slice %594 {offsets = [0, 256], sizes = [8, 128], strides = [1, 1]} : vector<8x512xf32> to vector<8x128xf32>
    %608 = math.tanh %607 : vector<8x128xf32>
    %609 = vector.extract_strided_slice %594 {offsets = [0, 384], sizes = [8, 128], strides = [1, 1]} : vector<8x512xf32> to vector<8x128xf32>
    %610 = arith.negf %609 : vector<8x128xf32>
    %611 = math.exp %610 : vector<8x128xf32>
    %cst_285 = arith.constant 1.000000e+00 : f32
    %612 = vector.broadcast %cst_285 : f32 to vector<8x128xf32>
    %613 = arith.addf %612, %611 : vector<8x128xf32>
    %614 = arith.divf %612, %613 : vector<8x128xf32>
    %615 = arith.mulf %606, %591 : vector<8x128xf32>
    %616 = arith.mulf %600, %608 : vector<8x128xf32>
    %617 = arith.addf %615, %616 : vector<8x128xf32>
    %618 = math.tanh %617 : vector<8x128xf32>
    %619 = arith.mulf %614, %618 : vector<8x128xf32>
    %c1_286 = arith.constant 1 : index
    %c0_287 = arith.constant 0 : index
    %c0_288 = arith.constant 0 : index
    %620 = vector.load %arg7[%c1_286, %c0_287, %c0_288] : memref<2x8x128xf32, #tpu.memory_space<vmem>>, vector<1x8x128xf32>
    %621 = vector.shape_cast %620 : vector<1x8x128xf32> to vector<8x128xf32>
    %622 = vector.shape_cast %619 : vector<8x128xf32> to vector<1x8x128xf32>
    tpu.vector_store %arg7[%c1_286, %c0_287, %c0_288], %622 {strides = array<i32>} : memref<2x8x128xf32, #tpu.memory_space<vmem>>, vector<1x8x128xf32>,
    %c1_289 = arith.constant 1 : index
    %c0_290 = arith.constant 0 : index
    %c0_291 = arith.constant 0 : index
    %623 = vector.load %arg8[%c1_289, %c0_290, %c0_291] : memref<2x8x128xf32, #tpu.memory_space<vmem>>, vector<1x8x128xf32>
    %624 = vector.shape_cast %623 : vector<1x8x128xf32> to vector<8x128xf32>
    %625 = vector.shape_cast %617 : vector<8x128xf32> to vector<1x8x128xf32>
    tpu.vector_store %arg8[%c1_289, %c0_290, %c0_291], %625 {strides = array<i32>} : memref<2x8x128xf32, #tpu.memory_space<vmem>>, vector<1x8x128xf32>,
    %c6_i32_292 = arith.constant 6 : i32
    %626 = arith.index_cast %c6_i32_292 : i32 to index
    %c0_293 = arith.constant 0 : index
    %c0_294 = arith.constant 0 : index
    %627 = vector.load %arg10[%626, %c0_293, %c0_294] : memref<8x8x512xf32, #tpu.memory_space<vmem>>, vector<1x8x512xf32>
    %628 = vector.shape_cast %627 : vector<1x8x512xf32> to vector<8x512xf32>
    %c1_295 = arith.constant 1 : index
    %c0_296 = arith.constant 0 : index
    %c0_297 = arith.constant 0 : index
    %629 = vector.load %arg7[%c1_295, %c0_296, %c0_297] : memref<2x8x128xf32, #tpu.memory_space<vmem>>, vector<1x8x128xf32>
    %630 = vector.shape_cast %629 : vector<1x8x128xf32> to vector<8x128xf32>
    %c1_298 = arith.constant 1 : index
    %c0_299 = arith.constant 0 : index
    %c0_300 = arith.constant 0 : index
    %631 = vector.load %arg8[%c1_298, %c0_299, %c0_300] : memref<2x8x128xf32, #tpu.memory_space<vmem>>, vector<1x8x128xf32>
    %632 = vector.shape_cast %631 : vector<1x8x128xf32> to vector<8x128xf32>
    %633 = arith.truncf %630 : vector<8x128xf32> to vector<8x128xbf16>
    %cst_301 = arith.constant dense<0.000000e+00> : vector<8x512xf32>
    %634 = tpu.matmul %633, %379, %cst_301 {dimension_numbers = #tpu.dot_dimension_numbers<[1], [0], [0], [1], [0, 0, 1, 1], [], []>} : vector<8x128xbf16>, vector<128x512xbf16>, vector<8x512xf32> -> vector<8x512xf32>
    %635 = arith.addf %628, %634 : vector<8x512xf32>
    %636 = vector.extract_strided_slice %635 {offsets = [0, 0], sizes = [8, 128], strides = [1, 1]} : vector<8x512xf32> to vector<8x128xf32>
    %637 = arith.negf %636 : vector<8x128xf32>
    %638 = math.exp %637 : vector<8x128xf32>
    %cst_302 = arith.constant 1.000000e+00 : f32
    %639 = vector.broadcast %cst_302 : f32 to vector<8x128xf32>
    %640 = arith.addf %639, %638 : vector<8x128xf32>
    %641 = arith.divf %639, %640 : vector<8x128xf32>
    %642 = vector.extract_strided_slice %635 {offsets = [0, 128], sizes = [8, 128], strides = [1, 1]} : vector<8x512xf32> to vector<8x128xf32>
    %643 = arith.negf %642 : vector<8x128xf32>
    %644 = math.exp %643 : vector<8x128xf32>
    %cst_303 = arith.constant 1.000000e+00 : f32
    %645 = vector.broadcast %cst_303 : f32 to vector<8x128xf32>
    %646 = arith.addf %645, %644 : vector<8x128xf32>
    %647 = arith.divf %645, %646 : vector<8x128xf32>
    %648 = vector.extract_strided_slice %635 {offsets = [0, 256], sizes = [8, 128], strides = [1, 1]} : vector<8x512xf32> to vector<8x128xf32>
    %649 = math.tanh %648 : vector<8x128xf32>
    %650 = vector.extract_strided_slice %635 {offsets = [0, 384], sizes = [8, 128], strides = [1, 1]} : vector<8x512xf32> to vector<8x128xf32>
    %651 = arith.negf %650 : vector<8x128xf32>
    %652 = math.exp %651 : vector<8x128xf32>
    %cst_304 = arith.constant 1.000000e+00 : f32
    %653 = vector.broadcast %cst_304 : f32 to vector<8x128xf32>
    %654 = arith.addf %653, %652 : vector<8x128xf32>
    %655 = arith.divf %653, %654 : vector<8x128xf32>
    %656 = arith.mulf %647, %632 : vector<8x128xf32>
    %657 = arith.mulf %641, %649 : vector<8x128xf32>
    %658 = arith.addf %656, %657 : vector<8x128xf32>
    %659 = math.tanh %658 : vector<8x128xf32>
    %660 = arith.mulf %655, %659 : vector<8x128xf32>
    %c1_305 = arith.constant 1 : index
    %c0_306 = arith.constant 0 : index
    %c0_307 = arith.constant 0 : index
    %661 = vector.load %arg7[%c1_305, %c0_306, %c0_307] : memref<2x8x128xf32, #tpu.memory_space<vmem>>, vector<1x8x128xf32>
    %662 = vector.shape_cast %661 : vector<1x8x128xf32> to vector<8x128xf32>
    %663 = vector.shape_cast %660 : vector<8x128xf32> to vector<1x8x128xf32>
    tpu.vector_store %arg7[%c1_305, %c0_306, %c0_307], %663 {strides = array<i32>} : memref<2x8x128xf32, #tpu.memory_space<vmem>>, vector<1x8x128xf32>,
    %c1_308 = arith.constant 1 : index
    %c0_309 = arith.constant 0 : index
    %c0_310 = arith.constant 0 : index
    %664 = vector.load %arg8[%c1_308, %c0_309, %c0_310] : memref<2x8x128xf32, #tpu.memory_space<vmem>>, vector<1x8x128xf32>
    %665 = vector.shape_cast %664 : vector<1x8x128xf32> to vector<8x128xf32>
    %666 = vector.shape_cast %658 : vector<8x128xf32> to vector<1x8x128xf32>
    tpu.vector_store %arg8[%c1_308, %c0_309, %c0_310], %666 {strides = array<i32>} : memref<2x8x128xf32, #tpu.memory_space<vmem>>, vector<1x8x128xf32>,
    %c7_i32_311 = arith.constant 7 : i32
    %667 = arith.index_cast %c7_i32_311 : i32 to index
    %c0_312 = arith.constant 0 : index
    %c0_313 = arith.constant 0 : index
    %668 = vector.load %arg10[%667, %c0_312, %c0_313] : memref<8x8x512xf32, #tpu.memory_space<vmem>>, vector<1x8x512xf32>
    %669 = vector.shape_cast %668 : vector<1x8x512xf32> to vector<8x512xf32>
    %c1_314 = arith.constant 1 : index
    %c0_315 = arith.constant 0 : index
    %c0_316 = arith.constant 0 : index
    %670 = vector.load %arg7[%c1_314, %c0_315, %c0_316] : memref<2x8x128xf32, #tpu.memory_space<vmem>>, vector<1x8x128xf32>
    %671 = vector.shape_cast %670 : vector<1x8x128xf32> to vector<8x128xf32>
    %c1_317 = arith.constant 1 : index
    %c0_318 = arith.constant 0 : index
    %c0_319 = arith.constant 0 : index
    %672 = vector.load %arg8[%c1_317, %c0_318, %c0_319] : memref<2x8x128xf32, #tpu.memory_space<vmem>>, vector<1x8x128xf32>
    %673 = vector.shape_cast %672 : vector<1x8x128xf32> to vector<8x128xf32>
    %674 = arith.truncf %671 : vector<8x128xf32> to vector<8x128xbf16>
    %cst_320 = arith.constant dense<0.000000e+00> : vector<8x512xf32>
    %675 = tpu.matmul %674, %379, %cst_320 {dimension_numbers = #tpu.dot_dimension_numbers<[1], [0], [0], [1], [0, 0, 1, 1], [], []>} : vector<8x128xbf16>, vector<128x512xbf16>, vector<8x512xf32> -> vector<8x512xf32>
    %676 = arith.addf %669, %675 : vector<8x512xf32>
    %677 = vector.extract_strided_slice %676 {offsets = [0, 0], sizes = [8, 128], strides = [1, 1]} : vector<8x512xf32> to vector<8x128xf32>
    %678 = arith.negf %677 : vector<8x128xf32>
    %679 = math.exp %678 : vector<8x128xf32>
    %cst_321 = arith.constant 1.000000e+00 : f32
    %680 = vector.broadcast %cst_321 : f32 to vector<8x128xf32>
    %681 = arith.addf %680, %679 : vector<8x128xf32>
    %682 = arith.divf %680, %681 : vector<8x128xf32>
    %683 = vector.extract_strided_slice %676 {offsets = [0, 128], sizes = [8, 128], strides = [1, 1]} : vector<8x512xf32> to vector<8x128xf32>
    %684 = arith.negf %683 : vector<8x128xf32>
    %685 = math.exp %684 : vector<8x128xf32>
    %cst_322 = arith.constant 1.000000e+00 : f32
    %686 = vector.broadcast %cst_322 : f32 to vector<8x128xf32>
    %687 = arith.addf %686, %685 : vector<8x128xf32>
    %688 = arith.divf %686, %687 : vector<8x128xf32>
    %689 = vector.extract_strided_slice %676 {offsets = [0, 256], sizes = [8, 128], strides = [1, 1]} : vector<8x512xf32> to vector<8x128xf32>
    %690 = math.tanh %689 : vector<8x128xf32>
    %691 = vector.extract_strided_slice %676 {offsets = [0, 384], sizes = [8, 128], strides = [1, 1]} : vector<8x512xf32> to vector<8x128xf32>
    %692 = arith.negf %691 : vector<8x128xf32>
    %693 = math.exp %692 : vector<8x128xf32>
    %cst_323 = arith.constant 1.000000e+00 : f32
    %694 = vector.broadcast %cst_323 : f32 to vector<8x128xf32>
    %695 = arith.addf %694, %693 : vector<8x128xf32>
    %696 = arith.divf %694, %695 : vector<8x128xf32>
    %697 = arith.mulf %688, %673 : vector<8x128xf32>
    %698 = arith.mulf %682, %690 : vector<8x128xf32>
    %699 = arith.addf %697, %698 : vector<8x128xf32>
    %700 = math.tanh %699 : vector<8x128xf32>
    %701 = arith.mulf %696, %700 : vector<8x128xf32>
    %c1_324 = arith.constant 1 : index
    %c0_325 = arith.constant 0 : index
    %c0_326 = arith.constant 0 : index
    %702 = vector.load %arg7[%c1_324, %c0_325, %c0_326] : memref<2x8x128xf32, #tpu.memory_space<vmem>>, vector<1x8x128xf32>
    %703 = vector.shape_cast %702 : vector<1x8x128xf32> to vector<8x128xf32>
    %704 = vector.shape_cast %701 : vector<8x128xf32> to vector<1x8x128xf32>
    tpu.vector_store %arg7[%c1_324, %c0_325, %c0_326], %704 {strides = array<i32>} : memref<2x8x128xf32, #tpu.memory_space<vmem>>, vector<1x8x128xf32>,
    %c1_327 = arith.constant 1 : index
    %c0_328 = arith.constant 0 : index
    %c0_329 = arith.constant 0 : index
    %705 = vector.load %arg8[%c1_327, %c0_328, %c0_329] : memref<2x8x128xf32, #tpu.memory_space<vmem>>, vector<1x8x128xf32>
    %706 = vector.shape_cast %705 : vector<1x8x128xf32> to vector<8x128xf32>
    %707 = vector.shape_cast %699 : vector<8x128xf32> to vector<1x8x128xf32>
    tpu.vector_store %arg8[%c1_327, %c0_328, %c0_329], %707 {strides = array<i32>} : memref<2x8x128xf32, #tpu.memory_space<vmem>>, vector<1x8x128xf32>,
    %c8_i32_330 = arith.constant 8 : i32
    %c0_i32_331 = arith.constant 0 : i32
    %708 = arith.cmpi eq, %arg0, %c0_i32_331 : i32
    %709 = arith.extui %708 : i1 to i32
    %c0_i32_332 = arith.constant 0 : i32
    %710 = arith.cmpi ne, %709, %c0_i32_332 : i32
    scf.if %710 {
      %c0_333 = arith.constant 0 : index
      %c0_334 = arith.constant 0 : index
      %c0_335 = arith.constant 0 : index
      %711 = vector.load %arg7[%c0_333, %c0_334, %c0_335] : memref<2x8x128xf32, #tpu.memory_space<vmem>>, vector<2x8x128xf32>
      %c0_336 = arith.constant 0 : index
      %c0_337 = arith.constant 0 : index
      %c0_338 = arith.constant 0 : index
      %712 = vector.load %arg5[%c0_336, %c0_337, %c0_338] : memref<2x8x128xf32, #tpu.memory_space<vmem>>, vector<2x8x128xf32>
      tpu.vector_store %arg5[%c0_336, %c0_337, %c0_338], %711 {strides = array<i32>} : memref<2x8x128xf32, #tpu.memory_space<vmem>>, vector<2x8x128xf32>,
      %c0_339 = arith.constant 0 : index
      %c0_340 = arith.constant 0 : index
      %c0_341 = arith.constant 0 : index
      %713 = vector.load %arg8[%c0_339, %c0_340, %c0_341] : memref<2x8x128xf32, #tpu.memory_space<vmem>>, vector<2x8x128xf32>
      %c0_342 = arith.constant 0 : index
      %c0_343 = arith.constant 0 : index
      %c0_344 = arith.constant 0 : index
      %714 = vector.load %arg6[%c0_342, %c0_343, %c0_344] : memref<2x8x128xf32, #tpu.memory_space<vmem>>, vector<2x8x128xf32>
      tpu.vector_store %arg6[%c0_342, %c0_343, %c0_344], %713 {strides = array<i32>} : memref<2x8x128xf32, #tpu.memory_space<vmem>>, vector<2x8x128xf32>,
    } else {
    }
    return
  }
  func.func @transform_0(%arg0: i32) -> (i32, i32, i32) {
    %c0_i32 = arith.constant 0 : i32
    %c0_i32_0 = arith.constant 0 : i32
    %c0_i32_1 = arith.constant 0 : i32
    return %arg0, %c0_i32, %c0_i32_0 : i32, i32, i32
  }
  func.func @transform_1(%arg0: i32) -> (i32, i32, i32) {
    %c0_i32 = arith.constant 0 : i32
    %c0_i32_0 = arith.constant 0 : i32
    %c0_i32_1 = arith.constant 0 : i32
    %c0_i32_2 = arith.constant 0 : i32
    return %c0_i32, %c0_i32_0, %c0_i32_1 : i32, i32, i32
  }
  func.func @transform_2(%arg0: i32) -> (i32, i32, i32) {
    %c0_i32 = arith.constant 0 : i32
    %c0_i32_0 = arith.constant 0 : i32
    %c0_i32_1 = arith.constant 0 : i32
    %c0_i32_2 = arith.constant 0 : i32
    return %c0_i32, %c0_i32_0, %c0_i32_1 : i32, i32, i32
  }
  func.func @transform_3(%arg0: i32) -> (i32, i32, i32) {
    %c0_i32 = arith.constant 0 : i32
    %c0_i32_0 = arith.constant 0 : i32
    %c0_i32_1 = arith.constant 0 : i32
    %c0_i32_2 = arith.constant 0 : i32
    return %c0_i32, %c0_i32_0, %c0_i32_1 : i32, i32, i32
  }
  func.func @transform_4(%arg0: i32) -> (i32, i32, i32) {
    %c0_i32 = arith.constant 0 : i32
    %c0_i32_0 = arith.constant 0 : i32
    %c0_i32_1 = arith.constant 0 : i32
    %c0_i32_2 = arith.constant 0 : i32
    return %c0_i32, %c0_i32_0, %c0_i32_1 : i32, i32, i32
  }
  func.func @transform_5(%arg0: i32) -> (i32, i32, i32) {
    %c0_i32 = arith.constant 0 : i32
    %c0_i32_0 = arith.constant 0 : i32
    %c0_i32_1 = arith.constant 0 : i32
    %c0_i32_2 = arith.constant 0 : i32
    return %c0_i32, %c0_i32_0, %c0_i32_1 : i32, i32, i32
  }
}

</mosaic_0001>

<bundles_post_ra>
// kernel: encoder_forward.1
= control target key start
LH: loop header
LB: loop body
LE: loop exit
PB: predicated region body
PF: predicated region fallthrough
CT: control target
= control target key end

     0   :  { %v5092_v1 = vmov 0   ;;  %v3496_v33 = vmov 0.0|0.0   ;;  %s5086_s1 = inlined_call_operand.vmem [shape: bf16[2,128,512], index: 1, kind: input, shape index: {}]   ;;  %s5087_s0 = inlined_call_operand.vmem [shape: f32[8,8,512], index: 0, kind: input, shape index: {}]   ;;  %s5088_s2 = inlined_call_operand.vmem [shape: bf16[1,128,512], index: 2, kind: input, shape index: {}]   ;;  %s5089_s5 = inlined_call_operand.vmem [shape: f32[2,8,128], index: 5, kind: output, shape index: {1}]   ;;  %s5090_s4 = inlined_call_operand.vmem [shape: f32[2,8,128], index: 4, kind: output, shape index: {0}]   ;;  %s5091_s3 = inlined_call_operand.vmem [shape: f32[1,8,512], index: 3, kind: input, shape index: {}]  }
   0x1   :  { %v3530_v0 = vld [vmem:[%s5086_s1 + $0x4] ss:$16 sps:$4 sm:$0xff]   ;;  %259 = vmatprep.mubr.bf16.mxu0 %v5092_v1  ;;  %300 = vmatprep.mubr.bf16.mxu1 %v5092_v1  ;;  %v3537_v2 = vld [vmem:[%s5086_s1] ss:$16 sps:$4 sm:$0xff]   ;;  %v3560_v6 = vld [vmem:[%s5086_s1 + $0xc] ss:$16 sps:$4 sm:$0xff]  }
   0x2   :  { %227 = vmatprep.subr.bf16.mxu0 %v3530_v0  ;;  %v3543_v3 = vld [vmem:[%s5086_s1 + $0x24] ss:$16 sps:$4 sm:$0xff]   ;;  %v3549_v4 = vld [vmem:[%s5086_s1 + $0x20] ss:$16 sps:$4 sm:$0xff]   ;;  %v3565_v7 = vld [vmem:[%s5086_s1 + $0x8] ss:$16 sps:$4 sm:$0xff]   ;;  %268 = vmatprep.subr.bf16.mxu1 %v3560_v6 }
   0x3   :  { %228 = vmatpush1.bf16.msra.mxu0 %v3537_v2  ;;  %v3555_v5 = vld [vmem:[%s5086_s1 + $0x44] ss:$16 sps:$4 sm:$0xff]   ;;  %v3571_v8 = vld [vmem:[%s5086_s1 + $0x40] ss:$16 sps:$4 sm:$0xff]   ;;  %269 = vmatpush1.bf16.msra.mxu1 %v3565_v7  ;;  %v3584_v10 = vld [vmem:[%s5086_s1 + $0x2c] ss:$16 sps:$4 sm:$0xff]  }
   0x4   :  { %229 = vmatprep.subr.bf16.mxu0 %v3543_v3  ;;  %v3578_v9 = vld [vmem:[%s5086_s1 + $0x64] ss:$16 sps:$4 sm:$0xff]   ;;  %v3589_v11 = vld [vmem:[%s5086_s1 + $0x28] ss:$16 sps:$4 sm:$0xff]   ;;  %270 = vmatprep.subr.bf16.mxu1 %v3584_v10  ;;  %v3596_v12 = vld [vmem:[%s5086_s1 + $0x60] ss:$16 sps:$4 sm:$0xff]  }
   0x5   :  { %v3601_v13 = vld [vmem:[%s5086_s1 + $0x84] ss:$16 sps:$4 sm:$0xff]   ;;  %v3606_v14 = vld [vmem:[%s5086_s1 + $0x4c] ss:$16 sps:$4 sm:$0xff]   ;;  %v3613_v15 = vld [vmem:[%s5086_s1 + $0x48] ss:$16 sps:$4 sm:$0xff]  }
   0x6   :  { %v3619_v16 = vld [vmem:[%s5086_s1 + $0x6c] ss:$16 sps:$4 sm:$0xff]   ;;  %v3625_v17 = vld [vmem:[%s5086_s1 + $0x80] ss:$16 sps:$4 sm:$0xff]   ;;  %v3631_v18 = vld [vmem:[%s5086_s1 + $0xa4] ss:$16 sps:$4 sm:$0xff]  }
   0x7   :  { %230 = vmatpush1.bf16.msra.mxu0 %v3549_v4  ;;  %271 = vmatpush1.bf16.msra.mxu1 %v3589_v11  ;;  %v3637_v19 = vld [vmem:[%s5086_s1 + $0x68] ss:$16 sps:$4 sm:$0xff]   ;;  %v3643_v20 = vld [vmem:[%s5086_s1 + $0x8c] ss:$16 sps:$4 sm:$0xff]   ;;  %v3649_v21 = vld [vmem:[%s5086_s1 + $0xa0] ss:$16 sps:$4 sm:$0xff]  }
   0x8   :  { %231 = vmatprep.subr.bf16.mxu0 %v3555_v5  ;;  %272 = vmatprep.subr.bf16.mxu1 %v3606_v14  ;;  %v3654_v22 = vld [vmem:[%s5086_s1 + $0xc4] ss:$16 sps:$4 sm:$0xff]   ;;  %v3661_v23 = vld [vmem:[%s5086_s1 + $0x88] ss:$16 sps:$4 sm:$0xff]   ;;  %v3666_v24 = vld [vmem:[%s5086_s1 + $0xc0] ss:$16 sps:$4 sm:$0xff]  }
   0x9   :  { %v3672_v25 = vld [vmem:[%s5086_s1 + $0xac] ss:$16 sps:$4 sm:$0xff]   ;;  %v3677_v26 = vld [vmem:[%s5086_s1 + $0xe4] ss:$16 sps:$4 sm:$0xff]   ;;  %v3682_v27 = vld [vmem:[%s5086_s1 + $0xa8] ss:$16 sps:$4 sm:$0xff]  }
   0xa   :  { %v3688_v28 = vld [vmem:[%s5086_s1 + $0xcc] ss:$16 sps:$4 sm:$0xff]   ;;  %v3695_v29 = vld [vmem:[%s5086_s1 + $0xe0] ss:$16 sps:$4 sm:$0xff]   ;;  %v3701_v30 = vld [vmem:[%s5086_s1 + $0xc8] ss:$16 sps:$4 sm:$0xff]  }
   0xb   :  { %232 = vmatpush1.bf16.msra.mxu0 %v3571_v8  ;;  %273 = vmatpush1.bf16.msra.mxu1 %v3613_v15  ;;  %v3707_v31 = vld [vmem:[%s5086_s1 + $0xec] ss:$16 sps:$4 sm:$0xff]   ;;  %v3717_v32 = vld [vmem:[%s5086_s1 + $0xe8] ss:$16 sps:$4 sm:$0xff]   ;;  %v60_v34 = vld [vmem:[%s5087_s0] sm:$0xff] }
   0xc   :  { %233 = vmatprep.subr.bf16.mxu0 %v3578_v9  ;;  %274 = vmatprep.subr.bf16.mxu1 %v3619_v16  ;;  %v61_v35 = vld [vmem:[%s5087_s0 + $0x8] sm:$0xff]  ;;  %v63_v44 = vld [vmem:[%s5087_s0 + $0x18] sm:$0xff]  ;;  %v62_v50 = vld [vmem:[%s5087_s0 + $0x10] sm:$0xff] }
   0xf   :  { %234 = vmatpush1.bf16.msra.mxu0 %v3596_v12  ;;  %275 = vmatpush1.bf16.msra.mxu1 %v3637_v19 }
  0x10   :  { %235 = vmatprep.subr.bf16.mxu0 %v3601_v13  ;;  %276 = vmatprep.subr.bf16.mxu1 %v3643_v20 }
  0x13   :  { %236 = vmatpush1.bf16.msra.mxu0 %v3625_v17  ;;  %277 = vmatpush1.bf16.msra.mxu1 %v3661_v23 }
  0x14   :  { %237 = vmatprep.subr.bf16.mxu0 %v3631_v18  ;;  %278 = vmatprep.subr.bf16.mxu1 %v3672_v25 }
  0x17   :  { %238 = vmatpush1.bf16.msra.mxu0 %v3649_v21  ;;  %279 = vmatpush1.bf16.msra.mxu1 %v3682_v27 }
  0x18   :  { %239 = vmatprep.subr.bf16.mxu0 %v3654_v22  ;;  %280 = vmatprep.subr.bf16.mxu1 %v3688_v28 }
  0x1b   :  { %240 = vmatpush1.bf16.msra.mxu0 %v3666_v24  ;;  %281 = vmatpush1.bf16.msra.mxu1 %v3701_v30 }
  0x1c   :  { %241 = vmatprep.subr.bf16.mxu0 %v3677_v26  ;;  %282 = vmatprep.subr.bf16.mxu1 %v3707_v31 }
  0x1f   :  { %242 = vmatpush1.bf16.msra.mxu0 %v3695_v29  ;;  %283 = vmatpush1.bf16.msra.mxu1 %v3717_v32 }
  0x20   :  { %348 = vmatprep.subr.bf16.mxu0 %v3530_v0  ;;  %389 = vmatprep.subr.bf16.mxu1 %v3560_v6 }
  0x22   :  { %260 = vmatmul.mubr.bf16.vlgmr.msra.gmra.mrb[0].mxu0 %v3496_v33  ;;  %301 = vmatmul.mubr.bf16.vlgmr.msra.gmra.mrb[0].mxu1 %v3496_v33 }
  0x23   :  { %349 = vmatpush1.bf16.msra.mxu0 %v3537_v2  ;;  %380 = vmatprep.mubr.bf16.mxu0 %v5092_v1 }
  0x24   :  { %350 = vmatprep.subr.bf16.mxu0 %v3543_v3  ;;  %390 = vmatpush1.bf16.msra.mxu1 %v3565_v7 }
  0x25   :  { %391 = vmatprep.subr.bf16.mxu1 %v3584_v10  ;;  %421 = vmatprep.mubr.bf16.mxu1 %v5092_v1 }
  0x27   :  { %351 = vmatpush1.bf16.msra.mxu0 %v3549_v4 }
  0x28   :  { %352 = vmatprep.subr.bf16.mxu0 %v3555_v5  ;;  %392 = vmatpush1.bf16.msra.mxu1 %v3589_v11 }
  0x29   :  { %393 = vmatprep.subr.bf16.mxu1 %v3606_v14 }
  0x2b   :  { %353 = vmatpush1.bf16.msra.mxu0 %v3571_v8 }
  0x2c   :  { %354 = vmatprep.subr.bf16.mxu0 %v3578_v9  ;;  %394 = vmatpush1.bf16.msra.mxu1 %v3613_v15 }
  0x2d   :  { %395 = vmatprep.subr.bf16.mxu1 %v3619_v16 }
  0x2f   :  { %355 = vmatpush1.bf16.msra.mxu0 %v3596_v12 }
  0x30   :  { %356 = vmatprep.subr.bf16.mxu0 %v3601_v13  ;;  %396 = vmatpush1.bf16.msra.mxu1 %v3637_v19 }
  0x31   :  { %397 = vmatprep.subr.bf16.mxu1 %v3643_v20 }
  0x33   :  { %357 = vmatpush1.bf16.msra.mxu0 %v3625_v17 }
  0x34   :  { %358 = vmatprep.subr.bf16.mxu0 %v3631_v18  ;;  %398 = vmatpush1.bf16.msra.mxu1 %v3661_v23 }
  0x35   :  { %399 = vmatprep.subr.bf16.mxu1 %v3672_v25 }
  0x37   :  { %359 = vmatpush1.bf16.msra.mxu0 %v3649_v21 }
  0x38   :  { %360 = vmatprep.subr.bf16.mxu0 %v3654_v22  ;;  %400 = vmatpush1.bf16.msra.mxu1 %v3682_v27 }
  0x39   :  { %401 = vmatprep.subr.bf16.mxu1 %v3688_v28 }
  0x3b   :  { %361 = vmatpush1.bf16.msra.mxu0 %v3666_v24 }
  0x3c   :  { %362 = vmatprep.subr.bf16.mxu0 %v3677_v26  ;;  %402 = vmatpush1.bf16.msra.mxu1 %v3701_v30 }
  0x3d   :  { %403 = vmatprep.subr.bf16.mxu1 %v3707_v31 }
  0x3f   :  { %363 = vmatpush1.bf16.msra.mxu0 %v3695_v29 }
  0x40   :  { %470 = vmatprep.subr.bf16.mxu0 %v3530_v0  ;;  %404 = vmatpush1.bf16.msra.mxu1 %v3717_v32 }
  0x41   :  { %511 = vmatprep.subr.bf16.mxu1 %v3560_v6 }
  0xf5   :  { %v261_v36 = vpop.f32.mrb[0].mxu0  ;;  %v302_v45 = vpop.f32.mrb[0].mxu1 }
  0xf6   :  { %v309_v37 = vadd.f32 %v261_v36, %v60_v34  ;;  %v263_v38 = vpop.f32.mrb[1].mxu0  ;;  %v304_v46 = vpop.f32.mrb[1].mxu1  ;;  %v311_v52 = vadd.f32 %v302_v45, %v62_v50 }
  0xf7   :  { %v310_v39 = vadd.f32 %v263_v38, %v61_v35  ;;  %v265_v40 = vpop.f32.mrb[2].mxu0  ;;  %v312_v47 = vadd.f32 %v304_v46, %v63_v44  ;;  %v306_v48 = vpop.f32.mrb[2].mxu1 }
  0xf8   :  { %v2845_v41 = vmul.f32 -1.442695, %v309_v37  ;;  %v266_v42 = vpop.f32.mrb[3].mxu0  ;;  %v307_v49 = vpop.f32.mrb[3].mxu1  ;;  %v2849_v40 = vld [vmem:[%s5087_s0 + $0x28] sm:$0xff] }
  0xf9   :  { %v2846_v43 = vmul.f32 -1.442695, %v310_v39  ;;  %v2847_v51 = vmul.f32 -1.442695, %v312_v47  ;;  %v2848_v39 = vld [vmem:[%s5087_s0 + $0x20] sm:$0xff] }
  0xfa   :  { %3171 = vpow2.f32 %v2845_v41 }
  0xfb   :  { %3173 = vpow2.f32 %v2846_v43 }
  0xfc   :  { %3175 = vpow2.f32 %v2847_v51 }
  0xfd   :  { %3177 = vtanh.f32 %v311_v52 }
 0x104   :  { %v3172_v53 = vpop.eup %3171 }
 0x105   :  { %v3174_v54 = vpop.eup %3173  ;;  %v316_v55 = vadd.f32 1.0, %v3172_v53  ;;  %v2851_v53 = vld [vmem:[%s5087_s0 + $0x38] sm:$0xff] }
 0x106   :  { %v322_v56 = vadd.f32 1.0, %v3174_v54  ;;  %v3176_v57 = vpop.eup %3175 }
 0x107   :  { %3179 = vrcp.f32 %v316_v55  ;;  %v3178_v58 = vpop.eup %3177  ;;  %v329_v60 = vadd.f32 1.0, %v3176_v57  ;;  %v2850_v55 = vld [vmem:[%s5087_s0 + $0x30] sm:$0xff] }
 0x108   :  { %3181 = vrcp.f32 %v322_v56 }
 0x109   :  { %3183 = vrcp.f32 %v329_v60 }
 0x111   :  { %v3180_v59 = vpop.eup %3179 }
 0x112   :  { %v3182_v61 = vpop.eup %3181  ;;  %v333_v62 = vmul.f32 %v3180_v59, %v3178_v58 }
 0x113   :  { %v332_v63 = vmul.f32 0.0, %v3182_v61  ;;  %v3184_v35 = vpop.eup %3183 }
 0x115   :  { %v3771_v34 = vadd.f32 %v333_v62, %v332_v63 }
 0x117   :  { %3185 = vtanh.f32 %v3771_v34 }
 0x121   :  { %v3186_v36 = vpop.eup %3185 }
 0x122   :  { %v3774_v37 = vmul.f32 %v3186_v36, %v3184_v35 }
 0x124   :  { %v347_v38 = vpack.c.bf16 %v3774_v37, %v3774_v37 }
 0x126   :  { %381 = vmatmul.mubr.bf16.vlgmr.msra.gmra.mrb[4].mxu0 %v347_v38  ;;  %422 = vmatmul.mubr.bf16.vlgmr.msra.gmra.mrb[4].mxu1 %v347_v38 }
 0x127   :  { %471 = vmatpush1.bf16.msra.mxu0 %v3537_v2  ;;  %512 = vmatpush1.bf16.msra.mxu1 %v3565_v7 }
 0x128   :  { %472 = vmatprep.subr.bf16.mxu0 %v3543_v3  ;;  %513 = vmatprep.subr.bf16.mxu1 %v3584_v10 }
 0x129   :  { %502 = vmatprep.mubr.bf16.mxu0 %v5092_v1  ;;  %543 = vmatprep.mubr.bf16.mxu1 %v5092_v1 }
 0x12b   :  { %473 = vmatpush1.bf16.msra.mxu0 %v3549_v4  ;;  %514 = vmatpush1.bf16.msra.mxu1 %v3589_v11 }
 0x12c   :  { %474 = vmatprep.subr.bf16.mxu0 %v3555_v5  ;;  %515 = vmatprep.subr.bf16.mxu1 %v3606_v14 }
 0x12f   :  { %475 = vmatpush1.bf16.msra.mxu0 %v3571_v8  ;;  %516 = vmatpush1.bf16.msra.mxu1 %v3613_v15 }
 0x130   :  { %476 = vmatprep.subr.bf16.mxu0 %v3578_v9  ;;  %517 = vmatprep.subr.bf16.mxu1 %v3619_v16 }
 0x133   :  { %477 = vmatpush1.bf16.msra.mxu0 %v3596_v12  ;;  %518 = vmatpush1.bf16.msra.mxu1 %v3637_v19 }
 0x134   :  { %478 = vmatprep.subr.bf16.mxu0 %v3601_v13  ;;  %519 = vmatprep.subr.bf16.mxu1 %v3643_v20 }
 0x137   :  { %479 = vmatpush1.bf16.msra.mxu0 %v3625_v17  ;;  %520 = vmatpush1.bf16.msra.mxu1 %v3661_v23 }
 0x138   :  { %480 = vmatprep.subr.bf16.mxu0 %v3631_v18  ;;  %521 = vmatprep.subr.bf16.mxu1 %v3672_v25 }
 0x13b   :  { %481 = vmatpush1.bf16.msra.mxu0 %v3649_v21  ;;  %522 = vmatpush1.bf16.msra.mxu1 %v3682_v27 }
 0x13c   :  { %482 = vmatprep.subr.bf16.mxu0 %v3654_v22  ;;  %523 = vmatprep.subr.bf16.mxu1 %v3688_v28 }
 0x13f   :  { %483 = vmatpush1.bf16.msra.mxu0 %v3666_v24  ;;  %524 = vmatpush1.bf16.msra.mxu1 %v3701_v30 }
 0x140   :  { %484 = vmatprep.subr.bf16.mxu0 %v3677_v26  ;;  %525 = vmatprep.subr.bf16.mxu1 %v3707_v31 }
 0x143   :  { %485 = vmatpush1.bf16.msra.mxu0 %v3695_v29  ;;  %526 = vmatpush1.bf16.msra.mxu1 %v3717_v32 }
 0x144   :  { %592 = vmatprep.subr.bf16.mxu0 %v3530_v0  ;;  %633 = vmatprep.subr.bf16.mxu1 %v3560_v6 }
 0x1f9   :  { %v382_v41 = vpop.f32.mrb[4].mxu0  ;;  %v423_v42 = vpop.f32.mrb[4].mxu1 }
 0x1fa   :  { %v430_v43 = vadd.f32 %v2848_v39, %v382_v41  ;;  %v384_v44 = vpop.f32.mrb[5].mxu0  ;;  %v425_v45 = vpop.f32.mrb[5].mxu1  ;;  %v432_v57 = vadd.f32 %v2850_v55, %v423_v42 }
 0x1fb   :  { %v431_v46 = vadd.f32 %v2849_v40, %v384_v44  ;;  %v386_v47 = vpop.f32.mrb[6].mxu0  ;;  %v427_v48 = vpop.f32.mrb[6].mxu1  ;;  %v433_v54 = vadd.f32 %v2851_v53, %v425_v45 }
 0x1fc   :  { %v2852_v49 = vmul.f32 -1.442695, %v430_v43  ;;  %v387_v50 = vpop.f32.mrb[7].mxu0  ;;  %v428_v51 = vpop.f32.mrb[7].mxu1 }
 0x1fd   :  { %v2853_v52 = vmul.f32 -1.442695, %v431_v46  ;;  %v2854_v56 = vmul.f32 -1.442695, %v433_v54  ;;  %v2856_v46 = vld [vmem:[%s5087_s0 + $0x48] sm:$0xff] }
 0x1fe   :  { %3187 = vpow2.f32 %v2852_v49 }
 0x1ff   :  { %3189 = vpow2.f32 %v2853_v52 }
 0x200   :  { %3191 = vpow2.f32 %v2854_v56 }
 0x201   :  { %3193 = vtanh.f32 %v432_v57 }
 0x208   :  { %v3188_v58 = vpop.eup %3187 }
 0x209   :  { %v3190_v59 = vpop.eup %3189  ;;  %v437_v60 = vadd.f32 1.0, %v3188_v58 }
 0x20a   :  { %v443_v61 = vadd.f32 1.0, %v3190_v59  ;;  %v3192_v62 = vpop.eup %3191  ;;  %v2858_v59 = vld [vmem:[%s5087_s0 + $0x58] sm:$0xff] }
 0x20b   :  { %3195 = vrcp.f32 %v437_v60  ;;  %v3194_v63 = vpop.eup %3193  ;;  %v450_v39 = vadd.f32 1.0, %v3192_v62 }
 0x20c   :  { %3197 = vrcp.f32 %v443_v61  ;;  %v2857_v61 = vld [vmem:[%s5087_s0 + $0x50] sm:$0xff] }
 0x20d   :  { %3199 = vrcp.f32 %v450_v39 }
 0x215   :  { %v3196_v35 = vpop.eup %3195 }
 0x216   :  { %v3198_v36 = vpop.eup %3197  ;;  %v454_v38 = vmul.f32 %v3196_v35, %v3194_v63 }
 0x217   :  { %v453_v40 = vmul.f32 %v3198_v36, %v3771_v34  ;;  %v3200_v42 = vpop.eup %3199  ;;  %v2855_v34 = vld [vmem:[%s5087_s0 + $0x40] sm:$0xff] }
 0x219   :  { %v3825_v41 = vadd.f32 %v454_v38, %v453_v40 }
 0x21b   :  { %3201 = vtanh.f32 %v3825_v41 }
 0x225   :  { %v3202_v43 = vpop.eup %3201 }
 0x226   :  { %v3828_v44 = vmul.f32 %v3202_v43, %v3200_v42 }
 0x228   :  { %v469_v45 = vpack.c.bf16 %v3828_v44, %v3828_v44 }
 0x22a   :  { %503 = vmatmul.mubr.bf16.vlgmr.msra.gmra.mrb[8].mxu0 %v469_v45  ;;  %544 = vmatmul.mubr.bf16.vlgmr.msra.gmra.mrb[8].mxu1 %v469_v45 }
 0x22b   :  { %593 = vmatpush1.bf16.msra.mxu0 %v3537_v2  ;;  %634 = vmatpush1.bf16.msra.mxu1 %v3565_v7 }
 0x22c   :  { %594 = vmatprep.subr.bf16.mxu0 %v3543_v3  ;;  %635 = vmatprep.subr.bf16.mxu1 %v3584_v10 }
 0x22d   :  { %624 = vmatprep.mubr.bf16.mxu0 %v5092_v1  ;;  %665 = vmatprep.mubr.bf16.mxu1 %v5092_v1 }
 0x22f   :  { %595 = vmatpush1.bf16.msra.mxu0 %v3549_v4  ;;  %636 = vmatpush1.bf16.msra.mxu1 %v3589_v11 }
 0x230   :  { %596 = vmatprep.subr.bf16.mxu0 %v3555_v5  ;;  %637 = vmatprep.subr.bf16.mxu1 %v3606_v14 }
 0x233   :  { %597 = vmatpush1.bf16.msra.mxu0 %v3571_v8  ;;  %638 = vmatpush1.bf16.msra.mxu1 %v3613_v15 }
 0x234   :  { %598 = vmatprep.subr.bf16.mxu0 %v3578_v9  ;;  %639 = vmatprep.subr.bf16.mxu1 %v3619_v16 }
 0x237   :  { %599 = vmatpush1.bf16.msra.mxu0 %v3596_v12  ;;  %640 = vmatpush1.bf16.msra.mxu1 %v3637_v19 }
 0x238   :  { %600 = vmatprep.subr.bf16.mxu0 %v3601_v13  ;;  %641 = vmatprep.subr.bf16.mxu1 %v3643_v20 }
 0x23b   :  { %601 = vmatpush1.bf16.msra.mxu0 %v3625_v17  ;;  %642 = vmatpush1.bf16.msra.mxu1 %v3661_v23 }
 0x23c   :  { %602 = vmatprep.subr.bf16.mxu0 %v3631_v18  ;;  %643 = vmatprep.subr.bf16.mxu1 %v3672_v25 }
 0x23f   :  { %603 = vmatpush1.bf16.msra.mxu0 %v3649_v21  ;;  %644 = vmatpush1.bf16.msra.mxu1 %v3682_v27 }
 0x240   :  { %604 = vmatprep.subr.bf16.mxu0 %v3654_v22  ;;  %645 = vmatprep.subr.bf16.mxu1 %v3688_v28 }
 0x243   :  { %605 = vmatpush1.bf16.msra.mxu0 %v3666_v24  ;;  %646 = vmatpush1.bf16.msra.mxu1 %v3701_v30 }
 0x244   :  { %606 = vmatprep.subr.bf16.mxu0 %v3677_v26  ;;  %647 = vmatprep.subr.bf16.mxu1 %v3707_v31 }
 0x247   :  { %607 = vmatpush1.bf16.msra.mxu0 %v3695_v29  ;;  %648 = vmatpush1.bf16.msra.mxu1 %v3717_v32 }
 0x248   :  { %714 = vmatprep.subr.bf16.mxu0 %v3530_v0  ;;  %755 = vmatprep.subr.bf16.mxu1 %v3560_v6 }
 0x2fd   :  { %v504_v47 = vpop.f32.mrb[8].mxu0  ;;  %v545_v48 = vpop.f32.mrb[8].mxu1 }
 0x2fe   :  { %v552_v49 = vadd.f32 %v2855_v34, %v504_v47  ;;  %v506_v50 = vpop.f32.mrb[9].mxu0  ;;  %v547_v51 = vpop.f32.mrb[9].mxu1  ;;  %v554_v63 = vadd.f32 %v2857_v61, %v545_v48 }
 0x2ff   :  { %v553_v52 = vadd.f32 %v2856_v46, %v506_v50  ;;  %v508_v53 = vpop.f32.mrb[10].mxu0  ;;  %v549_v54 = vpop.f32.mrb[10].mxu1  ;;  %v555_v60 = vadd.f32 %v2858_v59, %v547_v51 }
 0x300   :  { %v2859_v55 = vmul.f32 -1.442695, %v552_v49  ;;  %v509_v56 = vpop.f32.mrb[11].mxu0  ;;  %v550_v57 = vpop.f32.mrb[11].mxu1  ;;  %v2863_v53 = vld [vmem:[%s5087_s0 + $0x68] sm:$0xff] }
 0x301   :  { %v2860_v58 = vmul.f32 -1.442695, %v553_v52  ;;  %v2861_v62 = vmul.f32 -1.442695, %v555_v60 }
 0x302   :  { %3203 = vpow2.f32 %v2859_v55 }
 0x303   :  { %3205 = vpow2.f32 %v2860_v58 }
 0x304   :  { %3207 = vpow2.f32 %v2861_v62 }
 0x305   :  { %3209 = vtanh.f32 %v554_v63 }
 0x30c   :  { %v3204_v35 = vpop.eup %3203 }
 0x30d   :  { %v3206_v36 = vpop.eup %3205  ;;  %v559_v38 = vadd.f32 1.0, %v3204_v35 }
 0x30e   :  { %v565_v39 = vadd.f32 1.0, %v3206_v36  ;;  %v3208_v40 = vpop.eup %3207 }
 0x30f   :  { %3211 = vrcp.f32 %v559_v38  ;;  %v3210_v42 = vpop.eup %3209  ;;  %v572_v46 = vadd.f32 1.0, %v3208_v40  ;;  %v2865_v38 = vld [vmem:[%s5087_s0 + $0x78] sm:$0xff]  ;;  %v2864_v40 = vld [vmem:[%s5087_s0 + $0x70] sm:$0xff] }
 0x310   :  { %3213 = vrcp.f32 %v565_v39 }
 0x311   :  { %3215 = vrcp.f32 %v572_v46 }
 0x319   :  { %v3212_v43 = vpop.eup %3211 }
 0x31a   :  { %v3214_v45 = vpop.eup %3213  ;;  %v576_v34 = vmul.f32 %v3212_v43, %v3210_v42 }
 0x31b   :  { %v575_v47 = vmul.f32 %v3214_v45, %v3825_v41  ;;  %v3216_v48 = vpop.eup %3215  ;;  %v2862_v41 = vld [vmem:[%s5087_s0 + $0x60] sm:$0xff] }
 0x31d   :  { %v3879_v49 = vadd.f32 %v576_v34, %v575_v47 }
 0x31f   :  { %3217 = vtanh.f32 %v3879_v49 }
 0x329   :  { %v3218_v50 = vpop.eup %3217 }
 0x32a   :  { %v3882_v51 = vmul.f32 %v3218_v50, %v3216_v48 }
 0x32c   :  { %v591_v52 = vpack.c.bf16 %v3882_v51, %v3882_v51 }
 0x32e   :  { %625 = vmatmul.mubr.bf16.vlgmr.msra.gmra.mrb[12].mxu0 %v591_v52  ;;  %666 = vmatmul.mubr.bf16.vlgmr.msra.gmra.mrb[12].mxu1 %v591_v52 }
 0x32f   :  { %715 = vmatpush1.bf16.msra.mxu0 %v3537_v2  ;;  %756 = vmatpush1.bf16.msra.mxu1 %v3565_v7 }
 0x330   :  { %716 = vmatprep.subr.bf16.mxu0 %v3543_v3  ;;  %757 = vmatprep.subr.bf16.mxu1 %v3584_v10 }
 0x331   :  { %746 = vmatprep.mubr.bf16.mxu0 %v5092_v1  ;;  %787 = vmatprep.mubr.bf16.mxu1 %v5092_v1 }
 0x333   :  { %717 = vmatpush1.bf16.msra.mxu0 %v3549_v4  ;;  %758 = vmatpush1.bf16.msra.mxu1 %v3589_v11 }
 0x334   :  { %718 = vmatprep.subr.bf16.mxu0 %v3555_v5  ;;  %759 = vmatprep.subr.bf16.mxu1 %v3606_v14 }
 0x337   :  { %719 = vmatpush1.bf16.msra.mxu0 %v3571_v8  ;;  %760 = vmatpush1.bf16.msra.mxu1 %v3613_v15 }
 0x338   :  { %720 = vmatprep.subr.bf16.mxu0 %v3578_v9  ;;  %761 = vmatprep.subr.bf16.mxu1 %v3619_v16 }
 0x33b   :  { %721 = vmatpush1.bf16.msra.mxu0 %v3596_v12  ;;  %762 = vmatpush1.bf16.msra.mxu1 %v3637_v19 }
 0x33c   :  { %722 = vmatprep.subr.bf16.mxu0 %v3601_v13  ;;  %763 = vmatprep.subr.bf16.mxu1 %v3643_v20 }
 0x33f   :  { %723 = vmatpush1.bf16.msra.mxu0 %v3625_v17  ;;  %764 = vmatpush1.bf16.msra.mxu1 %v3661_v23 }
 0x340   :  { %724 = vmatprep.subr.bf16.mxu0 %v3631_v18  ;;  %765 = vmatprep.subr.bf16.mxu1 %v3672_v25 }
 0x343   :  { %725 = vmatpush1.bf16.msra.mxu0 %v3649_v21  ;;  %766 = vmatpush1.bf16.msra.mxu1 %v3682_v27 }
 0x344   :  { %726 = vmatprep.subr.bf16.mxu0 %v3654_v22  ;;  %767 = vmatprep.subr.bf16.mxu1 %v3688_v28 }
 0x347   :  { %727 = vmatpush1.bf16.msra.mxu0 %v3666_v24  ;;  %768 = vmatpush1.bf16.msra.mxu1 %v3701_v30 }
 0x348   :  { %728 = vmatprep.subr.bf16.mxu0 %v3677_v26  ;;  %769 = vmatprep.subr.bf16.mxu1 %v3707_v31 }
 0x34b   :  { %729 = vmatpush1.bf16.msra.mxu0 %v3695_v29  ;;  %770 = vmatpush1.bf16.msra.mxu1 %v3717_v32 }
 0x34c   :  { %836 = vmatprep.subr.bf16.mxu0 %v3530_v0  ;;  %877 = vmatprep.subr.bf16.mxu1 %v3560_v6 }
 0x401   :  { %v626_v54 = vpop.f32.mrb[12].mxu0  ;;  %v667_v55 = vpop.f32.mrb[12].mxu1 }
 0x402   :  { %v674_v56 = vadd.f32 %v2862_v41, %v626_v54  ;;  %v628_v57 = vpop.f32.mrb[13].mxu0  ;;  %v669_v58 = vpop.f32.mrb[13].mxu1  ;;  %v676_v43 = vadd.f32 %v2864_v40, %v667_v55  ;;  %v2871_v40 = vld [vmem:[%s5087_s0 + $0x90] sm:$0xff] }
 0x403   :  { %v675_v59 = vadd.f32 %v2863_v53, %v628_v57  ;;  %v630_v60 = vpop.f32.mrb[14].mxu0  ;;  %v671_v61 = vpop.f32.mrb[14].mxu1  ;;  %v677_v39 = vadd.f32 %v2865_v38, %v669_v58  ;;  %v2872_v38 = vld [vmem:[%s5087_s0 + $0x98] sm:$0xff] }
 0x404   :  { %v2866_v62 = vmul.f32 -1.442695, %v674_v56  ;;  %v631_v63 = vpop.f32.mrb[15].mxu0  ;;  %v672_v35 = vpop.f32.mrb[15].mxu1 }
 0x405   :  { %v2867_v36 = vmul.f32 -1.442695, %v675_v59  ;;  %v2868_v42 = vmul.f32 -1.442695, %v677_v39 }
 0x406   :  { %3219 = vpow2.f32 %v2866_v62 }
 0x407   :  { %3221 = vpow2.f32 %v2867_v36 }
 0x408   :  { %3223 = vpow2.f32 %v2868_v42 }
 0x409   :  { %3225 = vtanh.f32 %v676_v43 }
 0x410   :  { %v3220_v45 = vpop.eup %3219 }
 0x411   :  { %v3222_v34 = vpop.eup %3221  ;;  %v681_v46 = vadd.f32 1.0, %v3220_v45 }
 0x412   :  { %v687_v47 = vadd.f32 1.0, %v3222_v34  ;;  %v3224_v48 = vpop.eup %3223 }
 0x413   :  { %3227 = vrcp.f32 %v681_v46  ;;  %v3226_v50 = vpop.eup %3225  ;;  %v694_v54 = vadd.f32 1.0, %v3224_v48 }
 0x414   :  { %3229 = vrcp.f32 %v687_v47 }
 0x415   :  { %3231 = vrcp.f32 %v694_v54 }
 0x41d   :  { %v3228_v52 = vpop.eup %3227 }
 0x41e   :  { %v3230_v41 = vpop.eup %3229  ;;  %v698_v53 = vmul.f32 %v3228_v52, %v3226_v50 }
 0x41f   :  { %v697_v56 = vmul.f32 %v3230_v41, %v3879_v49  ;;  %v3232_v55 = vpop.eup %3231 }
 0x421   :  { %v3933_v57 = vadd.f32 %v698_v53, %v697_v56 }
 0x423   :  { %3233 = vtanh.f32 %v3933_v57 }
 0x42d   :  { %v3234_v58 = vpop.eup %3233 }
 0x42e   :  { %v3936_v59 = vmul.f32 %v3234_v58, %v3232_v55 }
 0x430   :  { %v713_v60 = vpack.c.bf16 %v3936_v59, %v3936_v59 }
 0x432   :  { %747 = vmatmul.mubr.bf16.vlgmr.msra.gmra.mrb[16].mxu0 %v713_v60  ;;  %788 = vmatmul.mubr.bf16.vlgmr.msra.gmra.mrb[16].mxu1 %v713_v60 }
 0x433   :  { %837 = vmatpush1.bf16.msra.mxu0 %v3537_v2  ;;  %878 = vmatpush1.bf16.msra.mxu1 %v3565_v7  ;;  %v2869_v2 = vld [vmem:[%s5087_s0 + $0x80] sm:$0xff] }
 0x434   :  { %838 = vmatprep.subr.bf16.mxu0 %v3543_v3  ;;  %879 = vmatprep.subr.bf16.mxu1 %v3584_v10  ;;  %v2870_v3 = vld [vmem:[%s5087_s0 + $0x88] sm:$0xff] }
 0x435   :  { %868 = vmatprep.mubr.bf16.mxu0 %v5092_v1  ;;  %909 = vmatprep.mubr.bf16.mxu1 %v5092_v1 }
 0x437   :  { %839 = vmatpush1.bf16.msra.mxu0 %v3549_v4  ;;  %880 = vmatpush1.bf16.msra.mxu1 %v3589_v11 }
 0x438   :  { %840 = vmatprep.subr.bf16.mxu0 %v3555_v5  ;;  %881 = vmatprep.subr.bf16.mxu1 %v3606_v14 }
 0x43b   :  { %841 = vmatpush1.bf16.msra.mxu0 %v3571_v8  ;;  %882 = vmatpush1.bf16.msra.mxu1 %v3613_v15 }
 0x43c   :  { %842 = vmatprep.subr.bf16.mxu0 %v3578_v9  ;;  %883 = vmatprep.subr.bf16.mxu1 %v3619_v16 }
 0x43f   :  { %843 = vmatpush1.bf16.msra.mxu0 %v3596_v12  ;;  %884 = vmatpush1.bf16.msra.mxu1 %v3637_v19 }
 0x440   :  { %844 = vmatprep.subr.bf16.mxu0 %v3601_v13  ;;  %885 = vmatprep.subr.bf16.mxu1 %v3643_v20 }
 0x443   :  { %845 = vmatpush1.bf16.msra.mxu0 %v3625_v17  ;;  %886 = vmatpush1.bf16.msra.mxu1 %v3661_v23 }
 0x444   :  { %846 = vmatprep.subr.bf16.mxu0 %v3631_v18  ;;  %887 = vmatprep.subr.bf16.mxu1 %v3672_v25 }
 0x447   :  { %847 = vmatpush1.bf16.msra.mxu0 %v3649_v21  ;;  %888 = vmatpush1.bf16.msra.mxu1 %v3682_v27 }
 0x448   :  { %848 = vmatprep.subr.bf16.mxu0 %v3654_v22  ;;  %889 = vmatprep.subr.bf16.mxu1 %v3688_v28 }
 0x44b   :  { %849 = vmatpush1.bf16.msra.mxu0 %v3666_v24  ;;  %890 = vmatpush1.bf16.msra.mxu1 %v3701_v30 }
 0x44c   :  { %850 = vmatprep.subr.bf16.mxu0 %v3677_v26  ;;  %891 = vmatprep.subr.bf16.mxu1 %v3707_v31 }
 0x44f   :  { %851 = vmatpush1.bf16.msra.mxu0 %v3695_v29  ;;  %892 = vmatpush1.bf16.msra.mxu1 %v3717_v32 }
 0x450   :  { %958 = vmatprep.subr.bf16.mxu0 %v3530_v0  ;;  %999 = vmatprep.subr.bf16.mxu1 %v3560_v6 }
 0x505   :  { %v748_v4 = vpop.f32.mrb[16].mxu0  ;;  %v789_v5 = vpop.f32.mrb[16].mxu1 }
 0x506   :  { %v796_v8 = vadd.f32 %v2869_v2, %v748_v4  ;;  %v750_v9 = vpop.f32.mrb[17].mxu0  ;;  %v791_v49 = vpop.f32.mrb[17].mxu1  ;;  %v798_v43 = vadd.f32 %v2871_v40, %v789_v5  ;;  %v3997_v4 = vld [vmem:[%s5086_s1] ss:$16 sps:$4 sm:$0xff]  }
 0x507   :  { %v797_v61 = vadd.f32 %v2870_v3, %v750_v9  ;;  %v752_v62 = vpop.f32.mrb[18].mxu0  ;;  %v793_v63 = vpop.f32.mrb[18].mxu1  ;;  %v799_v39 = vadd.f32 %v2872_v38, %v791_v49  ;;  %v4013_v5 = vld [vmem:[%s5086_s1 + $0x20] ss:$16 sps:$4 sm:$0xff]  }
 0x508   :  { %v2873_v35 = vmul.f32 -1.442695, %v796_v8  ;;  %v753_v0 = vpop.f32.mrb[19].mxu0  ;;  %v794_v36 = vpop.f32.mrb[19].mxu1 }
 0x509   :  { %v2874_v6 = vmul.f32 -1.442695, %v797_v61  ;;  %v2875_v42 = vmul.f32 -1.442695, %v799_v39 }
 0x50a   :  { %3235 = vpow2.f32 %v2873_v35 }
 0x50b   :  { %3237 = vpow2.f32 %v2874_v6 }
 0x50c   :  { %3239 = vpow2.f32 %v2875_v42 }
 0x50d   :  { %3241 = vtanh.f32 %v798_v43 }
 0x514   :  { %v3236_v45 = vpop.eup %3235 }
 0x515   :  { %v3238_v34 = vpop.eup %3237  ;;  %v803_v46 = vadd.f32 1.0, %v3236_v45 }
 0x516   :  { %v809_v47 = vadd.f32 1.0, %v3238_v34  ;;  %v3240_v48 = vpop.eup %3239  ;;  %v3435_v34 = vld [vmem:[%s5086_s1 + $0x8] ss:$16 sps:$4 sm:$0xff]  }
 0x517   :  { %3243 = vrcp.f32 %v803_v46  ;;  %v3242_v50 = vpop.eup %3241  ;;  %v816_v54 = vadd.f32 1.0, %v3240_v48  ;;  %v3436_v46 = vld [vmem:[%s5086_s1 + $0x2c] ss:$16 sps:$4 sm:$0xff]  }
 0x518   :  { %3245 = vrcp.f32 %v809_v47  ;;  %v3437_v47 = vld [vmem:[%s5086_s1 + $0x28] ss:$16 sps:$4 sm:$0xff]   ;;  %v3438_v48 = vld [vmem:[%s5086_s1 + $0x4c] ss:$16 sps:$4 sm:$0xff]  }
 0x519   :  { %3247 = vrcp.f32 %v816_v54  ;;  %v3443_v54 = vld [vmem:[%s5086_s1 + $0x84] ss:$16 sps:$4 sm:$0xff]  }
 0x521   :  { %v3244_v52 = vpop.eup %3243 }
 0x522   :  { %v3246_v41 = vpop.eup %3245  ;;  %v820_v53 = vmul.f32 %v3244_v52, %v3242_v50  ;;  %v3439_v50 = vld [vmem:[%s5086_s1 + $0x48] ss:$16 sps:$4 sm:$0xff]   ;;  %v3440_v52 = vld [vmem:[%s5086_s1 + $0x6c] ss:$16 sps:$4 sm:$0xff]  }
 0x523   :  { %v819_v56 = vmul.f32 %v3246_v41, %v3933_v57  ;;  %v3248_v58 = vpop.eup %3247  ;;  %v4004_v57 = vld [vmem:[%s5086_s1 + $0x24] ss:$16 sps:$4 sm:$0xff]   ;;  %v3441_v41 = vld [vmem:[%s5086_s1 + $0x60] ss:$16 sps:$4 sm:$0xff]  }
 0x525   :  { %v3987_v55 = vadd.f32 %v820_v53, %v819_v56  ;;  %v3442_v53 = vld [vmem:[%s5086_s1 + $0x68] ss:$16 sps:$4 sm:$0xff]   ;;  %v3444_v56 = vld [vmem:[%s5086_s1 + $0x8c] ss:$16 sps:$4 sm:$0xff]  }
 0x527   :  { %3249 = vtanh.f32 %v3987_v55 }
 0x531   :  { %v3250_v60 = vpop.eup %3249 }
 0x532   :  { %v3990_v2 = vmul.f32 %v3250_v60, %v3248_v58  ;;  %v3446_v58 = vld [vmem:[%s5086_s1 + $0x88] ss:$16 sps:$4 sm:$0xff]   ;;  %v3447_v60 = vld [vmem:[%s5086_s1 + $0xa4] ss:$16 sps:$4 sm:$0xff]  }
 0x534   :  { %v835_v3 = vpack.c.bf16 %v3990_v2, %v3990_v2 }
 0x536   :  { %869 = vmatmul.mubr.bf16.vlgmr.msra.gmra.mrb[20].mxu0 %v835_v3  ;;  %910 = vmatmul.mubr.bf16.vlgmr.msra.gmra.mrb[20].mxu1 %v835_v3  ;;  %v3448_v3 = vld [vmem:[%s5086_s1 + $0xac] ss:$16 sps:$4 sm:$0xff]  }
 0x537   :  { %959 = vmatpush1.bf16.msra.mxu0 %v3997_v4  ;;  %1000 = vmatpush1.bf16.msra.mxu1 %v3565_v7  ;;  %v4020_v7 = vld [vmem:[%s5086_s1 + $0x44] ss:$16 sps:$4 sm:$0xff]  }
 0x538   :  { %960 = vmatprep.subr.bf16.mxu0 %v4004_v57  ;;  %1001 = vmatprep.subr.bf16.mxu1 %v3584_v10  ;;  %v4027_v10 = vld [vmem:[%s5086_s1 + $0x40] ss:$16 sps:$4 sm:$0xff]  }
 0x539   :  { %990 = vmatprep.mubr.bf16.mxu0 %v5092_v1  ;;  %1031 = vmatprep.mubr.bf16.mxu1 %v5092_v1 }
 0x53b   :  { %961 = vmatpush1.bf16.msra.mxu0 %v4013_v5  ;;  %1002 = vmatpush1.bf16.msra.mxu1 %v3589_v11  ;;  %v4034_v11 = vld [vmem:[%s5086_s1 + $0x64] ss:$16 sps:$4 sm:$0xff]  }
 0x53c   :  { %962 = vmatprep.subr.bf16.mxu0 %v4020_v7  ;;  %1003 = vmatprep.subr.bf16.mxu1 %v3606_v14  ;;  %v2876_v14 = vld [vmem:[%s5087_s0 + $0xa0] sm:$0xff] }
 0x53f   :  { %963 = vmatpush1.bf16.msra.mxu0 %v4027_v10  ;;  %1004 = vmatpush1.bf16.msra.mxu1 %v3613_v15  ;;  %v2877_v15 = vld [vmem:[%s5087_s0 + $0xa8] sm:$0xff] }
 0x540   :  { %964 = vmatprep.subr.bf16.mxu0 %v4034_v11  ;;  %1005 = vmatprep.subr.bf16.mxu1 %v3619_v16 }
 0x543   :  { %965 = vmatpush1.bf16.msra.mxu0 %v3596_v12  ;;  %1006 = vmatpush1.bf16.msra.mxu1 %v3637_v19  ;;  %v3433_v12 = vld [vmem:[%s5086_s1 + $0x4] ss:$16 sps:$4 sm:$0xff]  }
 0x544   :  { %966 = vmatprep.subr.bf16.mxu0 %v3601_v13  ;;  %1007 = vmatprep.subr.bf16.mxu1 %v3643_v20  ;;  %v3434_v13 = vld [vmem:[%s5086_s1 + $0xc] ss:$16 sps:$4 sm:$0xff]  }
 0x547   :  { %967 = vmatpush1.bf16.msra.mxu0 %v3625_v17  ;;  %1008 = vmatpush1.bf16.msra.mxu1 %v3661_v23 }
 0x548   :  { %968 = vmatprep.subr.bf16.mxu0 %v3631_v18  ;;  %1009 = vmatprep.subr.bf16.mxu1 %v3672_v25 }
 0x54b   :  { %969 = vmatpush1.bf16.msra.mxu0 %v3649_v21  ;;  %1010 = vmatpush1.bf16.msra.mxu1 %v3682_v27 }
 0x54c   :  { %970 = vmatprep.subr.bf16.mxu0 %v3654_v22  ;;  %1011 = vmatprep.subr.bf16.mxu1 %v3688_v28  ;;  %v2879_v28 = vld [vmem:[%s5087_s0 + $0xb8] sm:$0xff] }
 0x54f   :  { %971 = vmatpush1.bf16.msra.mxu0 %v3666_v24  ;;  %1012 = vmatpush1.bf16.msra.mxu1 %v3701_v30  ;;  %v2878_v30 = vld [vmem:[%s5087_s0 + $0xb0] sm:$0xff] }
 0x550   :  { %972 = vmatprep.subr.bf16.mxu0 %v3677_v26  ;;  %1013 = vmatprep.subr.bf16.mxu1 %v3707_v31 }
 0x553   :  { %973 = vmatpush1.bf16.msra.mxu0 %v3695_v29  ;;  %1014 = vmatpush1.bf16.msra.mxu1 %v3717_v32 }
 0x554   :  { %1080 = vmatprep.subr.bf16.mxu0 %v3433_v12  ;;  %1121 = vmatprep.subr.bf16.mxu1 %v3434_v13  ;;  %v3455_v12 = vld [vmem:[%s5086_s1 + $0xe4] ss:$16 sps:$4 sm:$0xff]   ;;  %v3456_v13 = vld [vmem:[%s5086_s1 + $0xec] ss:$16 sps:$4 sm:$0xff]  }
 0x609   :  { %v870_v16 = vpop.f32.mrb[20].mxu0  ;;  %v911_v17 = vpop.f32.mrb[20].mxu1 }
 0x60a   :  { %v918_v18 = vadd.f32 %v2876_v14, %v870_v16  ;;  %v872_v19 = vpop.f32.mrb[21].mxu0  ;;  %v913_v20 = vpop.f32.mrb[21].mxu1  ;;  %v920_v32 = vadd.f32 %v2878_v30, %v911_v17  ;;  %v3457_v14 = vld [vmem:[%s5086_s1 + $0xe0] ss:$16 sps:$4 sm:$0xff]   ;;  %v3077_v16 = vld [vmem:[%s5088_s2 + $0x4] ss:$16 sps:$4 sm:$0xff]  }
 0x60b   :  { %v919_v21 = vadd.f32 %v2877_v15, %v872_v19  ;;  %v874_v22 = vpop.f32.mrb[22].mxu0  ;;  %v915_v23 = vpop.f32.mrb[22].mxu1  ;;  %v921_v29 = vadd.f32 %v2879_v28, %v913_v20  ;;  %v3458_v15 = vld [vmem:[%s5086_s1 + $0xe8] ss:$16 sps:$4 sm:$0xff]   ;;  %v3080_v17 = vld [vmem:[%s5088_s2 + $0xc] ss:$16 sps:$4 sm:$0xff]  }
 0x60c   :  { %v2880_v24 = vmul.f32 -1.442695, %v918_v18  ;;  %v875_v25 = vpop.f32.mrb[23].mxu0  ;;  %v916_v26 = vpop.f32.mrb[23].mxu1  ;;  %v2883_v18 = vld [vmem:[%s5087_s0 + $0xc0] sm:$0xff]  ;;  %v2884_v19 = vld [vmem:[%s5087_s0 + $0xc8] sm:$0xff] }
 0x60d   :  { %v2881_v27 = vmul.f32 -1.442695, %v919_v21  ;;  %v2882_v31 = vmul.f32 -1.442695, %v921_v29 }
 0x60e   :  { %3251 = vpow2.f32 %v2880_v24 }
 0x60f   :  { %3253 = vpow2.f32 %v2881_v27 }
 0x610   :  { %3255 = vpow2.f32 %v2882_v31 }
 0x611   :  { %3257 = vtanh.f32 %v920_v32  ;;  %v2886_v32 = vld [vmem:[%s5087_s0 + $0xd8] sm:$0xff] }
 0x618   :  { %v3252_v8 = vpop.eup %3251 }
 0x619   :  { %v3254_v9 = vpop.eup %3253  ;;  %v925_v49 = vadd.f32 1.0, %v3252_v8 }
 0x61a   :  { %v931_v61 = vadd.f32 1.0, %v3254_v9  ;;  %v3256_v62 = vpop.eup %3255  ;;  %v2885_v9 = vld [vmem:[%s5087_s0 + $0xd0] sm:$0xff] }
 0x61b   :  { %3259 = vrcp.f32 %v925_v49  ;;  %v3258_v63 = vpop.eup %3257  ;;  %v938_v6 = vadd.f32 1.0, %v3256_v62 }
 0x61c   :  { %3261 = vrcp.f32 %v931_v61 }
 0x61d   :  { %3263 = vrcp.f32 %v938_v6 }
 0x625   :  { %v3260_v35 = vpop.eup %3259 }
 0x626   :  { %v3262_v0 = vpop.eup %3261  ;;  %v942_v36 = vmul.f32 %v3260_v35, %v3258_v63 }
 0x627   :  { %v941_v38 = vmul.f32 %v3262_v0, %v3987_v55  ;;  %v3264_v40 = vpop.eup %3263  ;;  %v3445_v55 = vld [vmem:[%s5086_s1 + $0x80] ss:$16 sps:$4 sm:$0xff]  }
 0x629   :  { %v4075_v39 = vadd.f32 %v942_v36, %v941_v38 }
 0x62b   :  { %3265 = vtanh.f32 %v4075_v39 }
 0x635   :  { %v3266_v42 = vpop.eup %3265 }
 0x636   :  { %v4078_v43 = vmul.f32 %v3266_v42, %v3264_v40 }
 0x638   :  { %v957_v45 = vpack.c.bf16 %v4078_v43, %v4078_v43 }
 0x63a   :  { %991 = vmatmul.mubr.bf16.vlgmr.msra.gmra.mrb[24].mxu0 %v957_v45  ;;  %1032 = vmatmul.mubr.bf16.vlgmr.msra.gmra.mrb[24].mxu1 %v957_v45 }
 0x63b   :  { %1081 = vmatpush1.bf16.msra.mxu0 %v3997_v4  ;;  %1122 = vmatpush1.bf16.msra.mxu1 %v3435_v34  ;;  %v3449_v4 = vld [vmem:[%s5086_s1 + $0xa0] ss:$16 sps:$4 sm:$0xff]  }
 0x63c   :  { %1082 = vmatprep.subr.bf16.mxu0 %v4004_v57  ;;  %1123 = vmatprep.subr.bf16.mxu1 %v3436_v46  ;;  %v3450_v57 = vld [vmem:[%s5086_s1 + $0xa8] ss:$16 sps:$4 sm:$0xff]  }
 0x63d   :  { %1112 = vmatprep.mubr.bf16.mxu0 %v5092_v1  ;;  %1153 = vmatprep.mubr.bf16.mxu1 %v5092_v1 }
 0x63f   :  { %1083 = vmatpush1.bf16.msra.mxu0 %v4013_v5  ;;  %1124 = vmatpush1.bf16.msra.mxu1 %v3437_v47  ;;  %v3451_v5 = vld [vmem:[%s5086_s1 + $0xc4] ss:$16 sps:$4 sm:$0xff]  }
 0x640   :  { %1084 = vmatprep.subr.bf16.mxu0 %v4020_v7  ;;  %1125 = vmatprep.subr.bf16.mxu1 %v3438_v48  ;;  %v3452_v7 = vld [vmem:[%s5086_s1 + $0xcc] ss:$16 sps:$4 sm:$0xff]  }
 0x643   :  { %1085 = vmatpush1.bf16.msra.mxu0 %v4027_v10  ;;  %1126 = vmatpush1.bf16.msra.mxu1 %v3439_v50  ;;  %v3453_v10 = vld [vmem:[%s5086_s1 + $0xc0] ss:$16 sps:$4 sm:$0xff]  }
 0x644   :  { %1086 = vmatprep.subr.bf16.mxu0 %v4034_v11  ;;  %1127 = vmatprep.subr.bf16.mxu1 %v3440_v52  ;;  %v3454_v11 = vld [vmem:[%s5086_s1 + $0xc8] ss:$16 sps:$4 sm:$0xff]   ;;  %v3075_v52 = vld [vmem:[%s5088_s2] ss:$16 sps:$4 sm:$0xff]  }
 0x647   :  { %1087 = vmatpush1.bf16.msra.mxu0 %v3441_v41  ;;  %1128 = vmatpush1.bf16.msra.mxu1 %v3442_v53  ;;  %v3078_v41 = vld [vmem:[%s5088_s2 + $0x8] ss:$16 sps:$4 sm:$0xff]   ;;  %v3083_v53 = vld [vmem:[%s5088_s2 + $0x24] ss:$16 sps:$4 sm:$0xff]  }
 0x648   :  { %1088 = vmatprep.subr.bf16.mxu0 %v3443_v54  ;;  %1129 = vmatprep.subr.bf16.mxu1 %v3444_v56  ;;  %v3086_v54 = vld [vmem:[%s5088_s2 + $0x2c] ss:$16 sps:$4 sm:$0xff]   ;;  %v3081_v56 = vld [vmem:[%s5088_s2 + $0x20] ss:$16 sps:$4 sm:$0xff]  }
 0x64b   :  { %1089 = vmatpush1.bf16.msra.mxu0 %v3445_v55  ;;  %1130 = vmatpush1.bf16.msra.mxu1 %v3446_v58  ;;  %v3084_v55 = vld [vmem:[%s5088_s2 + $0x28] ss:$16 sps:$4 sm:$0xff]   ;;  %v3089_v58 = vld [vmem:[%s5088_s2 + $0x44] ss:$16 sps:$4 sm:$0xff]  }
 0x64c   :  { %1090 = vmatprep.subr.bf16.mxu0 %v3447_v60  ;;  %1131 = vmatprep.subr.bf16.mxu1 %v3448_v3  ;;  %v3092_v60 = vld [vmem:[%s5088_s2 + $0x4c] ss:$16 sps:$4 sm:$0xff]   ;;  %v3087_v3 = vld [vmem:[%s5088_s2 + $0x40] ss:$16 sps:$4 sm:$0xff]  }
 0x64f   :  { %1091 = vmatpush1.bf16.msra.mxu0 %v3449_v4  ;;  %1132 = vmatpush1.bf16.msra.mxu1 %v3450_v57  ;;  %v3090_v4 = vld [vmem:[%s5088_s2 + $0x48] ss:$16 sps:$4 sm:$0xff]   ;;  %v3095_v57 = vld [vmem:[%s5088_s2 + $0x64] ss:$16 sps:$4 sm:$0xff]  }
 0x650   :  { %1092 = vmatprep.subr.bf16.mxu0 %v3451_v5  ;;  %1133 = vmatprep.subr.bf16.mxu1 %v3452_v7  ;;  %v3098_v5 = vld [vmem:[%s5088_s2 + $0x6c] ss:$16 sps:$4 sm:$0xff]   ;;  %v3093_v7 = vld [vmem:[%s5088_s2 + $0x60] ss:$16 sps:$4 sm:$0xff]  }
 0x653   :  { %1093 = vmatpush1.bf16.msra.mxu0 %v3453_v10  ;;  %1134 = vmatpush1.bf16.msra.mxu1 %v3454_v11  ;;  %v3096_v10 = vld [vmem:[%s5088_s2 + $0x68] ss:$16 sps:$4 sm:$0xff]   ;;  %v3101_v11 = vld [vmem:[%s5088_s2 + $0x84] ss:$16 sps:$4 sm:$0xff]  }
 0x654   :  { %1094 = vmatprep.subr.bf16.mxu0 %v3455_v12  ;;  %1135 = vmatprep.subr.bf16.mxu1 %v3456_v13  ;;  %v3104_v12 = vld [vmem:[%s5088_s2 + $0x8c] ss:$16 sps:$4 sm:$0xff]   ;;  %v3099_v13 = vld [vmem:[%s5088_s2 + $0x80] ss:$16 sps:$4 sm:$0xff]  }
 0x657   :  { %1095 = vmatpush1.bf16.msra.mxu0 %v3457_v14  ;;  %1136 = vmatpush1.bf16.msra.mxu1 %v3458_v15  ;;  %v3102_v14 = vld [vmem:[%s5088_s2 + $0x88] ss:$16 sps:$4 sm:$0xff]   ;;  %v3107_v15 = vld [vmem:[%s5088_s2 + $0xa4] ss:$16 sps:$4 sm:$0xff]  }
 0x658   :  { %1426 = vmatprep.subr.bf16.mxu0 %v3077_v16  ;;  %1499 = vmatprep.subr.bf16.mxu1 %v3080_v17  ;;  %v3110_v16 = vld [vmem:[%s5088_s2 + $0xac] ss:$16 sps:$4 sm:$0xff]   ;;  %v3105_v17 = vld [vmem:[%s5088_s2 + $0xa0] ss:$16 sps:$4 sm:$0xff]  }
 0x70d   :  { %v992_v20 = vpop.f32.mrb[24].mxu0  ;;  %v1033_v21 = vpop.f32.mrb[24].mxu1 }
 0x70e   :  { %v1040_v22 = vadd.f32 %v2883_v18, %v992_v20  ;;  %v994_v23 = vpop.f32.mrb[25].mxu0  ;;  %v1035_v24 = vpop.f32.mrb[25].mxu1  ;;  %v1042_v61 = vadd.f32 %v2885_v9, %v1033_v21  ;;  %v3108_v18 = vld [vmem:[%s5088_s2 + $0xa8] ss:$16 sps:$4 sm:$0xff]   ;;  %v3116_v20 = vld [vmem:[%s5088_s2 + $0xcc] ss:$16 sps:$4 sm:$0xff]  }
 0x70f   :  { %v1041_v25 = vadd.f32 %v2884_v19, %v994_v23  ;;  %v996_v26 = vpop.f32.mrb[26].mxu0  ;;  %v1037_v27 = vpop.f32.mrb[26].mxu1  ;;  %v1043_v8 = vadd.f32 %v2886_v32, %v1035_v24  ;;  %v3113_v19 = vld [vmem:[%s5088_s2 + $0xc4] ss:$16 sps:$4 sm:$0xff]   ;;  %v3111_v21 = vld [vmem:[%s5088_s2 + $0xc0] ss:$16 sps:$4 sm:$0xff]  }
 0x710   :  { %v2887_v28 = vmul.f32 -1.442695, %v1040_v22  ;;  %v997_v29 = vpop.f32.mrb[27].mxu0  ;;  %v1038_v30 = vpop.f32.mrb[27].mxu1  ;;  %v3114_v22 = vld [vmem:[%s5088_s2 + $0xc8] ss:$16 sps:$4 sm:$0xff]   ;;  %v3021_v27 = vpack.c.bf16 %v3828_v44, %v3774_v37 }
 0x711   :  { %v2888_v31 = vmul.f32 -1.442695, %v1041_v25  ;;  %v2889_v49 = vmul.f32 -1.442695, %v1043_v8  ;;  %v3119_v23 = vld [vmem:[%s5088_s2 + $0xe4] ss:$16 sps:$4 sm:$0xff]   ;;  %v3023_v29 = vpack.c.bf16 %v4078_v43, %v3990_v2 }
 0x712   :  { %3267 = vpow2.f32 %v2887_v28  ;;  %v3122_v24 = vld [vmem:[%s5088_s2 + $0xec] ss:$16 sps:$4 sm:$0xff]   ;;  %v3117_v25 = vld [vmem:[%s5088_s2 + $0xe0] ss:$16 sps:$4 sm:$0xff]   ;;  %v3120_v26 = vld [vmem:[%s5088_s2 + $0xe8] ss:$16 sps:$4 sm:$0xff]   ;;  %v3022_v28 = vpack.c.bf16 %v3936_v59, %v3882_v51 }
 0x713   :  { %3269 = vpow2.f32 %v2888_v31  ;;  %v4295_v37 = vld [vmem:[%s5086_s1 + $0x104] ss:$16 sps:$4 sm:$0xff]   ;;  %v4300_v44 = vld [vmem:[%s5086_s1 + $0x10c] ss:$16 sps:$4 sm:$0xff]   ;;  %v4305_v51 = vld [vmem:[%s5086_s1 + $0x100] ss:$16 sps:$4 sm:$0xff]  }
 0x714   :  { %3271 = vpow2.f32 %v2889_v49  ;;  %v4310_v59 = vld [vmem:[%s5086_s1 + $0x108] ss:$16 sps:$4 sm:$0xff]   ;;  %v4319_v2 = vld [vmem:[%s5086_s1 + $0x124] ss:$16 sps:$4 sm:$0xff]   ;;  %v4324_v43 = vld [vmem:[%s5086_s1 + $0x12c] ss:$16 sps:$4 sm:$0xff]  }
 0x715   :  { %3273 = vtanh.f32 %v1042_v61  ;;  %v4329_v30 = vld [vmem:[%s5086_s1 + $0x120] ss:$16 sps:$4 sm:$0xff]   ;;  %v4334_v31 = vld [vmem:[%s5086_s1 + $0x128] ss:$16 sps:$4 sm:$0xff]   ;;  %v4343_v32 = vld [vmem:[%s5086_s1 + $0x144] ss:$16 sps:$4 sm:$0xff]  }
 0x716   :  { %v4348_v8 = vld [vmem:[%s5086_s1 + $0x140] ss:$16 sps:$4 sm:$0xff]   ;;  %v4354_v9 = vld [vmem:[%s5086_s1 + $0x14c] ss:$16 sps:$4 sm:$0xff]   ;;  %v4359_v49 = vld [vmem:[%s5086_s1 + $0x148] ss:$16 sps:$4 sm:$0xff]  }
 0x717   :  { %v4366_v61 = vld [vmem:[%s5086_s1 + $0x164] ss:$16 sps:$4 sm:$0xff]  }
 0x71c   :  { %v3268_v62 = vpop.eup %3267 }
 0x71d   :  { %v3270_v63 = vpop.eup %3269  ;;  %v1047_v35 = vadd.f32 1.0, %v3268_v62  ;;  %v4371_v62 = vld [vmem:[%s5086_s1 + $0x160] ss:$16 sps:$4 sm:$0xff]  }
 0x71e   :  { %v1053_v0 = vadd.f32 1.0, %v3270_v63  ;;  %v3272_v36 = vpop.eup %3271  ;;  %v4376_v63 = vld [vmem:[%s5086_s1 + $0x16c] ss:$16 sps:$4 sm:$0xff]  }
 0x71f   :  { %3275 = vrcp.f32 %v1047_v35  ;;  %v3274_v6 = vpop.eup %3273  ;;  %v1060_v45 = vadd.f32 1.0, %v3272_v36  ;;  %v4382_v35 = vld [vmem:[%s5086_s1 + $0x168] ss:$16 sps:$4 sm:$0xff]   ;;  %v4395_v36 = vld [vmem:[%s5086_s1 + $0x18c] ss:$16 sps:$4 sm:$0xff]  }
 0x720   :  { %3277 = vrcp.f32 %v1053_v0  ;;  %v4390_v0 = vld [vmem:[%s5086_s1 + $0x184] ss:$16 sps:$4 sm:$0xff]  }
 0x721   :  { %3279 = vrcp.f32 %v1060_v45  ;;  %v4424_v45 = vld [vmem:[%s5086_s1 + $0x1ac] ss:$16 sps:$4 sm:$0xff]  }
 0x729   :  { %v3276_v38 = vpop.eup %3275 }
 0x72a   :  { %v3278_v40 = vpop.eup %3277  ;;  %v1064_v42 = vmul.f32 %v3276_v38, %v3274_v6  ;;  %v4401_v6 = vld [vmem:[%s5086_s1 + $0x180] ss:$16 sps:$4 sm:$0xff]   ;;  %v4406_v38 = vld [vmem:[%s5086_s1 + $0x188] ss:$16 sps:$4 sm:$0xff]  }
 0x72b   :  { %v1063_v34 = vmul.f32 %v3278_v40, %v4075_v39  ;;  %v3280_v47 = vpop.eup %3279  ;;  %v4414_v40 = vld [vmem:[%s5086_s1 + $0x1a4] ss:$16 sps:$4 sm:$0xff]  }
 0x72d   :  { %v4181_v46 = vadd.f32 %v1064_v42, %v1063_v34  ;;  %v4419_v42 = vld [vmem:[%s5086_s1 + $0x1a0] ss:$16 sps:$4 sm:$0xff]   ;;  %v4430_v34 = vld [vmem:[%s5086_s1 + $0x1a8] ss:$16 sps:$4 sm:$0xff]  }
 0x72f   :  { %3281 = vtanh.f32 %v4181_v46 }
 0x739   :  { %v3282_v48 = vpop.eup %3281 }
 0x73a   :  { %v4184_v50 = vmul.f32 %v3282_v48, %v3280_v47  ;;  %v4438_v47 = vld [vmem:[%s5086_s1 + $0x1c4] ss:$16 sps:$4 sm:$0xff]   ;;  %v4443_v48 = vld [vmem:[%s5086_s1 + $0x1cc] ss:$16 sps:$4 sm:$0xff]  }
 0x73c   :  { %v1079_v39 = vpack.c.bf16 %v4184_v50, %v4184_v50 }
 0x73e   :  { %1113 = vmatmul.mubr.bf16.vlgmr.msra.gmra.mrb[28].mxu0 %v1079_v39  ;;  %1154 = vmatmul.mubr.bf16.vlgmr.msra.gmra.mrb[28].mxu1 %v1079_v39  ;;  %v4462_v39 = vld [vmem:[%s5086_s1 + $0x1e4] ss:$16 sps:$4 sm:$0xff]  }
 0x73f   :  { %1427 = vmatpush1.bf16.msra.mxu0 %v3075_v52  ;;  %1500 = vmatpush1.bf16.msra.mxu1 %v3078_v41  ;;  %v4449_v52 = vld [vmem:[%s5086_s1 + $0x1c0] ss:$16 sps:$4 sm:$0xff]   ;;  %v4454_v41 = vld [vmem:[%s5086_s1 + $0x1c8] ss:$16 sps:$4 sm:$0xff]  }
 0x740   :  { %1428 = vmatprep.subr.bf16.mxu0 %v3083_v53  ;;  %1501 = vmatprep.subr.bf16.mxu1 %v3086_v54  ;;  %v4467_v53 = vld [vmem:[%s5086_s1 + $0x1e0] ss:$16 sps:$4 sm:$0xff]   ;;  %v4472_v54 = vld [vmem:[%s5086_s1 + $0x1ec] ss:$16 sps:$4 sm:$0xff]  }
 0x741   :  { %1458 = vmatprep.mubr.bf16.mxu0 %v5092_v1  ;;  %1531 = vmatprep.mubr.bf16.mxu1 %v5092_v1 }
 0x743   :  { %1429 = vmatpush1.bf16.msra.mxu0 %v3081_v56  ;;  %1502 = vmatpush1.bf16.msra.mxu1 %v3084_v55  ;;  %v4478_v56 = vld [vmem:[%s5086_s1 + $0x1e8] ss:$16 sps:$4 sm:$0xff]   ;;  %v2890_v55 = vld [vmem:[%s5087_s0 + $0xe0] sm:$0xff] }
 0x744   :  { %1430 = vmatprep.subr.bf16.mxu0 %v3089_v58  ;;  %1503 = vmatprep.subr.bf16.mxu1 %v3092_v60  ;;  %v2891_v58 = vld [vmem:[%s5087_s0 + $0xe8] sm:$0xff] }
 0x747   :  { %1431 = vmatpush1.bf16.msra.mxu0 %v3087_v3  ;;  %1504 = vmatpush1.bf16.msra.mxu1 %v3090_v4 }
 0x748   :  { %1432 = vmatprep.subr.bf16.mxu0 %v3095_v57  ;;  %1505 = vmatprep.subr.bf16.mxu1 %v3098_v5 }
 0x74b   :  { %1433 = vmatpush1.bf16.msra.mxu0 %v3093_v7  ;;  %1506 = vmatpush1.bf16.msra.mxu1 %v3096_v10 }
 0x74c   :  { %1434 = vmatprep.subr.bf16.mxu0 %v3101_v11  ;;  %1507 = vmatprep.subr.bf16.mxu1 %v3104_v12 }
 0x74f   :  { %1435 = vmatpush1.bf16.msra.mxu0 %v3099_v13  ;;  %1508 = vmatpush1.bf16.msra.mxu1 %v3102_v14 }
 0x750   :  { %1436 = vmatprep.subr.bf16.mxu0 %v3107_v15  ;;  %1509 = vmatprep.subr.bf16.mxu1 %v3110_v16  ;;  %v2893_v16 = vld [vmem:[%s5087_s0 + $0xf8] sm:$0xff] }
 0x753   :  { %1437 = vmatpush1.bf16.msra.mxu0 %v3105_v17  ;;  %1510 = vmatpush1.bf16.msra.mxu1 %v3108_v18  ;;  %v2892_v18 = vld [vmem:[%s5087_s0 + $0xf0] sm:$0xff] }
 0x754   :  { %1438 = vmatprep.subr.bf16.mxu0 %v3113_v19  ;;  %1511 = vmatprep.subr.bf16.mxu1 %v3116_v20 }
 0x757   :  { %1439 = vmatpush1.bf16.msra.mxu0 %v3111_v21  ;;  %1512 = vmatpush1.bf16.msra.mxu1 %v3114_v22 }
 0x758   :  { %1440 = vmatprep.subr.bf16.mxu0 %v3119_v23  ;;  %1513 = vmatprep.subr.bf16.mxu1 %v3122_v24 }
 0x75b   :  { %1441 = vmatpush1.bf16.msra.mxu0 %v3117_v25  ;;  %1514 = vmatpush1.bf16.msra.mxu1 %v3120_v26 }
 0x75c   :  { %1842 = vmatprep.subr.bf16.mxu0 %v4295_v37  ;;  %1883 = vmatprep.subr.bf16.mxu1 %v4300_v44 }
 0x75e   :  { %1459 = vmatmul.mubr.bf16.vlgmr.msra.gmra.mrb[32].mxu0 %v3021_v27  ;;  %1532 = vmatmul.mubr.bf16.vlgmr.msra.gmra.mrb[32].mxu1 %v3021_v27 }
 0x75f   :  { %1468 = vmatprep.mubr.bf16.mxu0 %v5092_v1  ;;  %1541 = vmatprep.mubr.bf16.mxu1 %v5092_v1 }
 0x760   :  { %1843 = vmatpush1.bf16.msra.mxu0 %v4305_v51  ;;  %1884 = vmatpush1.bf16.msra.mxu1 %v4310_v59 }
 0x761   :  { %1844 = vmatprep.subr.bf16.mxu0 %v4319_v2  ;;  %1885 = vmatprep.subr.bf16.mxu1 %v4324_v43 }
 0x764   :  { %1845 = vmatpush1.bf16.msra.mxu0 %v4329_v30  ;;  %1886 = vmatpush1.bf16.msra.mxu1 %v4334_v31 }
 0x765   :  { %1846 = vmatprep.subr.bf16.mxu0 %v4343_v32  ;;  %1887 = vmatprep.subr.bf16.mxu1 %v4354_v9 }
 0x766   :  { %1469 = vmatmul.mubr.bf16.gmra.mrb[36].mxu0 %v3022_v28  ;;  %1542 = vmatmul.mubr.bf16.gmra.mrb[36].mxu1 %v3022_v28 }
 0x767   :  { %1478 = vmatprep.mubr.bf16.mxu0 %v5092_v1  ;;  %1551 = vmatprep.mubr.bf16.mxu1 %v5092_v1 }
 0x768   :  { %1847 = vmatpush1.bf16.msra.mxu0 %v4348_v8  ;;  %1888 = vmatpush1.bf16.msra.mxu1 %v4359_v49 }
 0x769   :  { %1848 = vmatprep.subr.bf16.mxu0 %v4366_v61  ;;  %1889 = vmatprep.subr.bf16.mxu1 %v4376_v63 }
 0x76c   :  { %1849 = vmatpush1.bf16.msra.mxu0 %v4371_v62  ;;  %1890 = vmatpush1.bf16.msra.mxu1 %v4382_v35 }
 0x76d   :  { %1850 = vmatprep.subr.bf16.mxu0 %v4390_v0  ;;  %1891 = vmatprep.subr.bf16.mxu1 %v4395_v36 }
 0x76e   :  { %1479 = vmatmul.mubr.bf16.gmra.mrb[40].mxu0 %v3023_v29  ;;  %1552 = vmatmul.mubr.bf16.gmra.mrb[40].mxu1 %v3023_v29 }
 0x76f   :  { %1488 = vmatprep.mubr.bf16.mxu0 %v5092_v1  ;;  %1561 = vmatprep.mubr.bf16.mxu1 %v5092_v1 }
 0x770   :  { %1851 = vmatpush1.bf16.msra.mxu0 %v4401_v6  ;;  %1892 = vmatpush1.bf16.msra.mxu1 %v4406_v38 }
 0x771   :  { %1852 = vmatprep.subr.bf16.mxu0 %v4414_v40  ;;  %1893 = vmatprep.subr.bf16.mxu1 %v4424_v45 }
 0x774   :  { %1853 = vmatpush1.bf16.msra.mxu0 %v4419_v42  ;;  %1894 = vmatpush1.bf16.msra.mxu1 %v4430_v34 }
 0x775   :  { %1854 = vmatprep.subr.bf16.mxu0 %v4438_v47  ;;  %1895 = vmatprep.subr.bf16.mxu1 %v4443_v48 }
 0x778   :  { %1855 = vmatpush1.bf16.msra.mxu0 %v4449_v52  ;;  %1896 = vmatpush1.bf16.msra.mxu1 %v4454_v41 }
 0x779   :  { %1856 = vmatprep.subr.bf16.mxu0 %v4462_v39  ;;  %1897 = vmatprep.subr.bf16.mxu1 %v4472_v54 }
 0x77c   :  { %1857 = vmatpush1.bf16.msra.mxu0 %v4467_v53  ;;  %1898 = vmatpush1.bf16.msra.mxu1 %v4478_v56 }
 0x77d   :  { %1962 = vmatprep.subr.bf16.mxu0 %v4295_v37  ;;  %2003 = vmatprep.subr.bf16.mxu1 %v4300_v44 }
 0x811   :  { %v1114_v60 = vpop.f32.mrb[28].mxu0  ;;  %v1155_v3 = vpop.f32.mrb[28].mxu1 }
 0x812   :  { %v1162_v4 = vadd.f32 %v2890_v55, %v1114_v60  ;;  %v1116_v57 = vpop.f32.mrb[29].mxu0  ;;  %v1157_v5 = vpop.f32.mrb[29].mxu1  ;;  %v1164_v20 = vadd.f32 %v2892_v18, %v1155_v3 }
 0x813   :  { %v1163_v7 = vadd.f32 %v2891_v58, %v1116_v57  ;;  %v1118_v10 = vpop.f32.mrb[30].mxu0  ;;  %v1159_v11 = vpop.f32.mrb[30].mxu1  ;;  %v1165_v17 = vadd.f32 %v2893_v16, %v1157_v5 }
 0x814   :  { %v2894_v12 = vmul.f32 -1.442695, %v1162_v4  ;;  %v1119_v13 = vpop.f32.mrb[31].mxu0  ;;  %v1160_v14 = vpop.f32.mrb[31].mxu1 }
 0x815   :  { %v2895_v15 = vmul.f32 -1.442695, %v1163_v7  ;;  %v2896_v19 = vmul.f32 -1.442695, %v1165_v17 }
 0x816   :  { %3283 = vpow2.f32 %v2894_v12 }
 0x817   :  { %3285 = vpow2.f32 %v2895_v15 }
 0x818   :  { %3287 = vpow2.f32 %v2896_v19 }
 0x819   :  { %3289 = vtanh.f32 %v1164_v20 }
 0x820   :  { %v3284_v21 = vpop.eup %3283 }
 0x821   :  { %v3286_v22 = vpop.eup %3285  ;;  %v1169_v23 = vadd.f32 1.0, %v3284_v21 }
 0x822   :  { %v1175_v24 = vadd.f32 1.0, %v3286_v22  ;;  %v3288_v25 = vpop.eup %3287 }
 0x823   :  { %3291 = vrcp.f32 %v1169_v23  ;;  %v3290_v26 = vpop.eup %3289  ;;  %v1182_v55 = vadd.f32 1.0, %v3288_v25 }
 0x824   :  { %3293 = vrcp.f32 %v1175_v24 }
 0x825   :  { %3295 = vrcp.f32 %v1182_v55 }
 0x82d   :  { %v3292_v27 = vpop.eup %3291 }
 0x82e   :  { %v3294_v28 = vpop.eup %3293  ;;  %v1186_v29 = vmul.f32 %v3292_v27, %v3290_v26 }
 0x82f   :  { %v1185_v58 = vmul.f32 %v3294_v28, %v4181_v46  ;;  %v3296_v18 = vpop.eup %3295 }
 0x831   :  { %v1187_v60 = vadd.f32 %v1186_v29, %v1185_v58  ;;  %v4499_v4 = vpop.f32.mrb[32].mxu0  ;;  %v4501_v3 = vpop.f32.mrb[32].mxu1 }
 0x832   :  { %v4503_v57 = vpop.f32.mrb[33].mxu0  ;;  %v4505_v5 = vpop.f32.mrb[33].mxu1 }
 0x833   :  { %2803 = vst [vmem:[%s5089_s5] sm:$0xff] %v1187_v60  ;;  %v4510_v7 = vpop.f32.mrb[34].mxu0  ;;  %v4512_v10 = vpop.f32.mrb[34].mxu1  ;;  %3297 = vtanh.f32 %v1187_v60 }
 0x834   :  { %v4514_v46 = vpop.f32.mrb[35].mxu0  ;;  %v4516_v11 = vpop.f32.mrb[35].mxu1 }
 0x839   :  { %v4518_v12 = vpop.f32.mrb[36].mxu0  ;;  %v4520_v13 = vpop.f32.mrb[36].mxu1 }
 0x83a   :  { %v4522_v14 = vpop.f32.mrb[37].mxu0  ;;  %v4524_v15 = vpop.f32.mrb[37].mxu1 }
 0x83b   :  { %5094 = vst [vmem:[#allocation6_spill] sm:$0xff] %v4522_v14  ;;  %5095 = vst [vmem:[#allocation7_spill] sm:$0xff] %v4524_v15  ;;  %v4526_v16 = vpop.f32.mrb[38].mxu0  ;;  %v4528_v17 = vpop.f32.mrb[38].mxu1 }
 0x83c   :  { %5096 = vst [vmem:[#allocation8_spill] sm:$0xff] %v4526_v16  ;;  %5097 = vst [vmem:[#allocation9_spill] sm:$0xff] %v4528_v17  ;;  %v4530_v19 = vpop.f32.mrb[39].mxu0  ;;  %v4532_v20 = vpop.f32.mrb[39].mxu1 }
 0x83d   :  { %5098 = vst [vmem:[#allocation10_spill] sm:$0xff] %v4530_v19  ;;  %5099 = vst [vmem:[#allocation11_spill] sm:$0xff] %v4532_v20  ;;  %v3298_v21 = vpop.eup %3297 }
 0x83e   :  { %v1189_v22 = vmul.f32 %v3298_v21, %v3296_v18 }
 0x840   :  { %v3024_v23 = vpack.c.bf16 %v1189_v22, %v4184_v50  ;;  %2799 = vst [vmem:[%s5090_s4] sm:$0xff] %v1189_v22 }
 0x841   :  { %v4538_v24 = vpop.f32.mrb[40].mxu0  ;;  %v4540_v25 = vpop.f32.mrb[40].mxu1 }
 0x842   :  { %5100 = vst [vmem:[#allocation12_spill] sm:$0xff] %v4538_v24  ;;  %5101 = vst [vmem:[#allocation13_spill] sm:$0xff] %v4540_v25  ;;  %v4542_v26 = vpop.f32.mrb[41].mxu0  ;;  %v4544_v27 = vpop.f32.mrb[41].mxu1  ;;  %1489 = vmatmul.mubr.bf16.gmra.mrb[44].mxu0 %v3024_v23  ;;  %1562 = vmatmul.mubr.bf16.gmra.mrb[44].mxu1 %v3024_v23 }
 0x843   :  { %5102 = vst [vmem:[#allocation14_spill] sm:$0xff] %v4542_v26  ;;  %5103 = vst [vmem:[#allocation15_spill] sm:$0xff] %v4544_v27  ;;  %v4546_v28 = vpop.f32.mrb[42].mxu0  ;;  %v4548_v29 = vpop.f32.mrb[42].mxu1  ;;  %1874 = vmatprep.mubr.bf16.mxu0 %v5092_v1  ;;  %1915 = vmatprep.mubr.bf16.mxu1 %v5092_v1 }
 0x844   :  { %5104 = vst [vmem:[#allocation16_spill] sm:$0xff] %v4546_v28  ;;  %5105 = vst [vmem:[#allocation17_spill] sm:$0xff] %v4548_v29  ;;  %v4552_v50 = vpop.f32.mrb[43].mxu0  ;;  %v4554_v55 = vpop.f32.mrb[43].mxu1 }
 0x845   :  { %5106 = vst [vmem:[#allocation18_spill] sm:$0xff] %v4552_v50  ;;  %5107 = vst [vmem:[#allocation19_spill] sm:$0xff] %v4554_v55  ;;  %v4611_v55 = vld [vmem:[%s5091_s3] sm:$0xff] }
 0x84a   :  { %1875 = vmatmul.mubr.bf16.vlgmr.msra.gmra.mrb[48].mxu0 %v3496_v33  ;;  %1916 = vmatmul.mubr.bf16.vlgmr.msra.gmra.mrb[48].mxu1 %v3496_v33 }
 0x84b   :  { %1963 = vmatpush1.bf16.msra.mxu0 %v4305_v51  ;;  %2004 = vmatpush1.bf16.msra.mxu1 %v4310_v59 }
 0x84c   :  { %1964 = vmatprep.subr.bf16.mxu0 %v4319_v2  ;;  %2005 = vmatprep.subr.bf16.mxu1 %v4324_v43 }
 0x84d   :  { %1994 = vmatprep.mubr.bf16.mxu0 %v5092_v1  ;;  %2035 = vmatprep.mubr.bf16.mxu1 %v5092_v1 }
 0x84f   :  { %1965 = vmatpush1.bf16.msra.mxu0 %v4329_v30  ;;  %2006 = vmatpush1.bf16.msra.mxu1 %v4334_v31 }
 0x850   :  { %1966 = vmatprep.subr.bf16.mxu0 %v4343_v32  ;;  %2007 = vmatprep.subr.bf16.mxu1 %v4354_v9 }
 0x853   :  { %1967 = vmatpush1.bf16.msra.mxu0 %v4348_v8  ;;  %2008 = vmatpush1.bf16.msra.mxu1 %v4359_v49 }
 0x854   :  { %1968 = vmatprep.subr.bf16.mxu0 %v4366_v61  ;;  %2009 = vmatprep.subr.bf16.mxu1 %v4376_v63 }
 0x857   :  { %1969 = vmatpush1.bf16.msra.mxu0 %v4371_v62  ;;  %2010 = vmatpush1.bf16.msra.mxu1 %v4382_v35 }
 0x858   :  { %1970 = vmatprep.subr.bf16.mxu0 %v4390_v0  ;;  %2011 = vmatprep.subr.bf16.mxu1 %v4395_v36 }
 0x85b   :  { %1971 = vmatpush1.bf16.msra.mxu0 %v4401_v6  ;;  %2012 = vmatpush1.bf16.msra.mxu1 %v4406_v38 }
 0x85c   :  { %1972 = vmatprep.subr.bf16.mxu0 %v4414_v40  ;;  %2013 = vmatprep.subr.bf16.mxu1 %v4424_v45 }
 0x85f   :  { %1973 = vmatpush1.bf16.msra.mxu0 %v4419_v42  ;;  %2014 = vmatpush1.bf16.msra.mxu1 %v4430_v34 }
 0x860   :  { %1974 = vmatprep.subr.bf16.mxu0 %v4438_v47  ;;  %2015 = vmatprep.subr.bf16.mxu1 %v4443_v48 }
 0x863   :  { %1975 = vmatpush1.bf16.msra.mxu0 %v4449_v52  ;;  %2016 = vmatpush1.bf16.msra.mxu1 %v4454_v41 }
 0x864   :  { %1976 = vmatprep.subr.bf16.mxu0 %v4462_v39  ;;  %2017 = vmatprep.subr.bf16.mxu1 %v4472_v54 }
 0x867   :  { %1977 = vmatpush1.bf16.msra.mxu0 %v4467_v53  ;;  %2018 = vmatpush1.bf16.msra.mxu1 %v4478_v56 }
 0x868   :  { %2082 = vmatprep.subr.bf16.mxu0 %v4295_v37  ;;  %2123 = vmatprep.subr.bf16.mxu1 %v4300_v44 }
 0x915   :  { %v4592_v33 = vpop.f32.mrb[44].mxu0  ;;  %v4594_v58 = vpop.f32.mrb[44].mxu1 }
 0x916   :  { %5108 = vst [vmem:[#allocation20_spill] sm:$0xff] %v4592_v33  ;;  %5109 = vst [vmem:[#allocation21_spill] sm:$0xff] %v4594_v58  ;;  %v4596_v60 = vpop.f32.mrb[45].mxu0  ;;  %v4598_v18 = vpop.f32.mrb[45].mxu1  ;;  %v4616_v58 = vld [vmem:[%s5091_s3 + $0x10] sm:$0xff] }
 0x917   :  { %5110 = vst [vmem:[#allocation22_spill] sm:$0xff] %v4596_v60  ;;  %5111 = vst [vmem:[#allocation23_spill] sm:$0xff] %v4598_v18  ;;  %v4600_v21 = vpop.f32.mrb[46].mxu0  ;;  %v4602_v22 = vpop.f32.mrb[46].mxu1 }
 0x918   :  { %5112 = vst [vmem:[#allocation24_spill] sm:$0xff] %v4600_v21  ;;  %5113 = vst [vmem:[#allocation25_spill] sm:$0xff] %v4602_v22  ;;  %v4604_v23 = vpop.f32.mrb[47].mxu0  ;;  %v4606_v1 = vpop.f32.mrb[47].mxu1  ;;  %v4621_v21 = vld [vmem:[%s5091_s3 + $0x8] sm:$0xff]  ;;  %v1578_v22 = vadd.f32 %v4616_v58, %v4501_v3 }
 0x919   :  { %5114 = vst [vmem:[#allocation26_spill] sm:$0xff] %v4604_v23  ;;  %5115 = vst [vmem:[#allocation27_spill] sm:$0xff] %v4606_v1  ;;  %v4626_v23 = vld [vmem:[%s5091_s3 + $0x18] sm:$0xff]  ;;  %v1576_v1 = vadd.f32 %v4611_v55, %v4499_v4  ;;  %v1577_v18 = vadd.f32 %v4621_v21, %v4503_v57 }
 0x91a   :  { %v1579_v60 = vadd.f32 %v4626_v23, %v4505_v5 }
 0x91d   :  { %v1876_v33 = vpop.f32.mrb[48].mxu0  ;;  %v1917_v50 = vpop.f32.mrb[48].mxu1 }
 0x91e   :  { %v1924_v29 = vadd.f32 %v1876_v33, %v1576_v1  ;;  %v1926_v28 = vadd.f32 %v1917_v50, %v1578_v22  ;;  %v1878_v27 = vpop.f32.mrb[49].mxu0  ;;  %v1919_v26 = vpop.f32.mrb[49].mxu1  ;;  %v1583_v22 = vadd.f32 %v4626_v23, %v4516_v11 }
 0x91f   :  { %v1925_v25 = vadd.f32 %v1878_v27, %v1577_v18  ;;  %v1927_v24 = vadd.f32 %v1919_v26, %v1579_v60  ;;  %v1880_v20 = vpop.f32.mrb[50].mxu0  ;;  %v1921_v19 = vpop.f32.mrb[50].mxu1  ;;  %v1582_v60 = vadd.f32 %v4616_v58, %v4512_v10  ;;  %v1581_v18 = vadd.f32 %v4621_v21, %v4514_v46 }
 0x920   :  { %v2997_v4 = vmul.f32 -1.442695, %v1924_v29  ;;  %v1881_v17 = vpop.f32.mrb[51].mxu0  ;;  %v1922_v16 = vpop.f32.mrb[51].mxu1 }
 0x921   :  { %v2998_v3 = vmul.f32 -1.442695, %v1925_v25  ;;  %v2999_v57 = vmul.f32 -1.442695, %v1927_v24 }
 0x922   :  { %3299 = vpow2.f32 %v2997_v4 }
 0x923   :  { %3301 = vpow2.f32 %v2998_v3 }
 0x924   :  { %3303 = vpow2.f32 %v2999_v57 }
 0x925   :  { %3305 = vtanh.f32 %v1926_v28  ;;  %v1580_v28 = vadd.f32 %v4611_v55, %v4510_v7 }
 0x92c   :  { %v3300_v15 = vpop.eup %3299 }
 0x92d   :  { %v3302_v14 = vpop.eup %3301  ;;  %v1931_v5 = vadd.f32 1.0, %v3300_v15 }
 0x92e   :  { %v1937_v1 = vadd.f32 1.0, %v3302_v14  ;;  %v3304_v50 = vpop.eup %3303  ;;  %v5116_v14 = vmov 0  }
 0x92f   :  { %3307 = vrcp.f32 %v1931_v5  ;;  %v3306_v27 = vpop.eup %3305  ;;  %v1944_v29 = vadd.f32 1.0, %v3304_v50 }
 0x930   :  { %3309 = vrcp.f32 %v1937_v1 }
 0x931   :  { %3311 = vrcp.f32 %v1944_v29 }
 0x939   :  { %v3308_v26 = vpop.eup %3307 }
 0x93a   :  { %v3310_v20 = vpop.eup %3309  ;;  %v1948_v19 = vmul.f32 %v3308_v26, %v3306_v27 }
 0x93b   :  { %v1947_v17 = vmul.f32 0.0, %v3310_v20  ;;  %v3312_v24 = vpop.eup %3311 }
 0x93d   :  { %v4636_v16 = vadd.f32 %v1948_v19, %v1947_v17 }
 0x93f   :  { %3313 = vtanh.f32 %v4636_v16 }
 0x949   :  { %v3314_v25 = vpop.eup %3313 }
 0x94a   :  { %v1951_v15 = vmul.f32 %v3314_v25, %v3312_v24 }
 0x94c   :  { %v1961_v33 = vpack.c.bf16 %v1951_v15, %v1951_v15 }
 0x94e   :  { %1995 = vmatmul.mubr.bf16.vlgmr.msra.gmra.mrb[52].mxu0 %v1961_v33  ;;  %2036 = vmatmul.mubr.bf16.vlgmr.msra.gmra.mrb[52].mxu1 %v1961_v33 }
 0x94f   :  { %2083 = vmatpush1.bf16.msra.mxu0 %v4305_v51  ;;  %2124 = vmatpush1.bf16.msra.mxu1 %v4310_v59 }
 0x950   :  { %2084 = vmatprep.subr.bf16.mxu0 %v4319_v2  ;;  %2125 = vmatprep.subr.bf16.mxu1 %v4324_v43 }
 0x951   :  { %2114 = vmatprep.mubr.bf16.mxu0 %v5116_v14  ;;  %2155 = vmatprep.mubr.bf16.mxu1 %v5116_v14 }
 0x953   :  { %2085 = vmatpush1.bf16.msra.mxu0 %v4329_v30  ;;  %2126 = vmatpush1.bf16.msra.mxu1 %v4334_v31 }
 0x954   :  { %2086 = vmatprep.subr.bf16.mxu0 %v4343_v32  ;;  %2127 = vmatprep.subr.bf16.mxu1 %v4354_v9 }
 0x957   :  { %2087 = vmatpush1.bf16.msra.mxu0 %v4348_v8  ;;  %2128 = vmatpush1.bf16.msra.mxu1 %v4359_v49 }
 0x958   :  { %2088 = vmatprep.subr.bf16.mxu0 %v4366_v61  ;;  %2129 = vmatprep.subr.bf16.mxu1 %v4376_v63 }
 0x95b   :  { %2089 = vmatpush1.bf16.msra.mxu0 %v4371_v62  ;;  %2130 = vmatpush1.bf16.msra.mxu1 %v4382_v35 }
 0x95c   :  { %2090 = vmatprep.subr.bf16.mxu0 %v4390_v0  ;;  %2131 = vmatprep.subr.bf16.mxu1 %v4395_v36 }
 0x95f   :  { %2091 = vmatpush1.bf16.msra.mxu0 %v4401_v6  ;;  %2132 = vmatpush1.bf16.msra.mxu1 %v4406_v38 }
 0x960   :  { %2092 = vmatprep.subr.bf16.mxu0 %v4414_v40  ;;  %2133 = vmatprep.subr.bf16.mxu1 %v4424_v45 }
 0x963   :  { %2093 = vmatpush1.bf16.msra.mxu0 %v4419_v42  ;;  %2134 = vmatpush1.bf16.msra.mxu1 %v4430_v34 }
 0x964   :  { %2094 = vmatprep.subr.bf16.mxu0 %v4438_v47  ;;  %2135 = vmatprep.subr.bf16.mxu1 %v4443_v48 }
 0x967   :  { %2095 = vmatpush1.bf16.msra.mxu0 %v4449_v52  ;;  %2136 = vmatpush1.bf16.msra.mxu1 %v4454_v41 }
 0x968   :  { %2096 = vmatprep.subr.bf16.mxu0 %v4462_v39  ;;  %2137 = vmatprep.subr.bf16.mxu1 %v4472_v54 }
 0x96b   :  { %2097 = vmatpush1.bf16.msra.mxu0 %v4467_v53  ;;  %2138 = vmatpush1.bf16.msra.mxu1 %v4478_v56 }
 0x96c   :  { %2202 = vmatprep.subr.bf16.mxu0 %v4295_v37  ;;  %2243 = vmatprep.subr.bf16.mxu1 %v4300_v44 }
 0xa21   :  { %v1996_v4 = vpop.f32.mrb[52].mxu0  ;;  %v2037_v3 = vpop.f32.mrb[52].mxu1 }
 0xa22   :  { %v2044_v57 = vadd.f32 %v1996_v4, %v1580_v28  ;;  %v2046_v5 = vadd.f32 %v2037_v3, %v1582_v60  ;;  %v1998_v1 = vpop.f32.mrb[53].mxu0  ;;  %v2039_v50 = vpop.f32.mrb[53].mxu1 }
 0xa23   :  { %v2045_v27 = vadd.f32 %v1998_v1, %v1581_v18  ;;  %v2047_v26 = vadd.f32 %v2039_v50, %v1583_v22  ;;  %v2000_v20 = vpop.f32.mrb[54].mxu0  ;;  %v2041_v19 = vpop.f32.mrb[54].mxu1 }
 0xa24   :  { %v3000_v7 = vmul.f32 -1.442695, %v2044_v57  ;;  %v2001_v29 = vpop.f32.mrb[55].mxu0  ;;  %v2042_v17 = vpop.f32.mrb[55].mxu1  ;;  %v5117_v20 = vld [vmem:[#allocation6_spill] sm:$0xff] }
 0xa25   :  { %v3001_v10 = vmul.f32 -1.442695, %v2045_v27  ;;  %v3002_v46 = vmul.f32 -1.442695, %v2047_v26  ;;  %v1586_v26 = vadd.f32 %v4616_v58, %v4520_v13  ;;  %v1585_v19 = vadd.f32 %v4621_v21, %v5117_v20 }
 0xa26   :  { %3315 = vpow2.f32 %v3000_v7  ;;  %v5118_v7 = vld [vmem:[#allocation7_spill] sm:$0xff] }
 0xa27   :  { %3317 = vpow2.f32 %v3001_v10  ;;  %v1587_v29 = vadd.f32 %v4626_v23, %v5118_v7 }
 0xa28   :  { %3319 = vpow2.f32 %v3002_v46 }
 0xa29   :  { %3321 = vtanh.f32 %v2046_v5 }
 0xa30   :  { %v3316_v24 = vpop.eup %3315 }
 0xa31   :  { %v3318_v25 = vpop.eup %3317  ;;  %v2051_v11 = vadd.f32 1.0, %v3316_v24 }
 0xa32   :  { %v2057_v15 = vadd.f32 1.0, %v3318_v25  ;;  %v3320_v33 = vpop.eup %3319 }
 0xa33   :  { %3323 = vrcp.f32 %v2051_v11  ;;  %v3322_v28 = vpop.eup %3321  ;;  %v2064_v4 = vadd.f32 1.0, %v3320_v33 }
 0xa34   :  { %3325 = vrcp.f32 %v2057_v15 }
 0xa35   :  { %3327 = vrcp.f32 %v2064_v4 }
 0xa3d   :  { %v3324_v60 = vpop.eup %3323 }
 0xa3e   :  { %v3326_v18 = vpop.eup %3325  ;;  %v2068_v22 = vmul.f32 %v3324_v60, %v3322_v28 }
 0xa3f   :  { %v2067_v3 = vmul.f32 %v3326_v18, %v4636_v16  ;;  %v3328_v1 = vpop.eup %3327  ;;  %v1584_v16 = vadd.f32 %v4611_v55, %v4518_v12 }
 0xa41   :  { %v4682_v57 = vadd.f32 %v2068_v22, %v2067_v3 }
 0xa43   :  { %3329 = vtanh.f32 %v4682_v57 }
 0xa4d   :  { %v3330_v50 = vpop.eup %3329 }
 0xa4e   :  { %v2071_v27 = vmul.f32 %v3330_v50, %v3328_v1 }
 0xa50   :  { %v2081_v5 = vpack.c.bf16 %v2071_v27, %v2071_v27 }
 0xa52   :  { %2115 = vmatmul.mubr.bf16.vlgmr.msra.gmra.mrb[56].mxu0 %v2081_v5  ;;  %2156 = vmatmul.mubr.bf16.vlgmr.msra.gmra.mrb[56].mxu1 %v2081_v5 }
 0xa53   :  { %2203 = vmatpush1.bf16.msra.mxu0 %v4305_v51  ;;  %2244 = vmatpush1.bf16.msra.mxu1 %v4310_v59 }
 0xa54   :  { %2204 = vmatprep.subr.bf16.mxu0 %v4319_v2  ;;  %2245 = vmatprep.subr.bf16.mxu1 %v4324_v43 }
 0xa55   :  { %2234 = vmatprep.mubr.bf16.mxu0 %v5116_v14  ;;  %2275 = vmatprep.mubr.bf16.mxu1 %v5116_v14 }
 0xa57   :  { %2205 = vmatpush1.bf16.msra.mxu0 %v4329_v30  ;;  %2246 = vmatpush1.bf16.msra.mxu1 %v4334_v31 }
 0xa58   :  { %2206 = vmatprep.subr.bf16.mxu0 %v4343_v32  ;;  %2247 = vmatprep.subr.bf16.mxu1 %v4354_v9 }
 0xa5b   :  { %2207 = vmatpush1.bf16.msra.mxu0 %v4348_v8  ;;  %2248 = vmatpush1.bf16.msra.mxu1 %v4359_v49 }
 0xa5c   :  { %2208 = vmatprep.subr.bf16.mxu0 %v4366_v61  ;;  %2249 = vmatprep.subr.bf16.mxu1 %v4376_v63 }
 0xa5f   :  { %2209 = vmatpush1.bf16.msra.mxu0 %v4371_v62  ;;  %2250 = vmatpush1.bf16.msra.mxu1 %v4382_v35 }
 0xa60   :  { %2210 = vmatprep.subr.bf16.mxu0 %v4390_v0  ;;  %2251 = vmatprep.subr.bf16.mxu1 %v4395_v36 }
 0xa63   :  { %2211 = vmatpush1.bf16.msra.mxu0 %v4401_v6  ;;  %2252 = vmatpush1.bf16.msra.mxu1 %v4406_v38 }
 0xa64   :  { %2212 = vmatprep.subr.bf16.mxu0 %v4414_v40  ;;  %2253 = vmatprep.subr.bf16.mxu1 %v4424_v45 }
 0xa67   :  { %2213 = vmatpush1.bf16.msra.mxu0 %v4419_v42  ;;  %2254 = vmatpush1.bf16.msra.mxu1 %v4430_v34 }
 0xa68   :  { %2214 = vmatprep.subr.bf16.mxu0 %v4438_v47  ;;  %2255 = vmatprep.subr.bf16.mxu1 %v4443_v48 }
 0xa6b   :  { %2215 = vmatpush1.bf16.msra.mxu0 %v4449_v52  ;;  %2256 = vmatpush1.bf16.msra.mxu1 %v4454_v41 }
 0xa6c   :  { %2216 = vmatprep.subr.bf16.mxu0 %v4462_v39  ;;  %2257 = vmatprep.subr.bf16.mxu1 %v4472_v54 }
 0xa6f   :  { %2217 = vmatpush1.bf16.msra.mxu0 %v4467_v53  ;;  %2258 = vmatpush1.bf16.msra.mxu1 %v4478_v56 }
 0xa70   :  { %2322 = vmatprep.subr.bf16.mxu0 %v4295_v37  ;;  %2363 = vmatprep.subr.bf16.mxu1 %v4300_v44 }
 0xb25   :  { %v2116_v17 = vpop.f32.mrb[56].mxu0  ;;  %v2157_v10 = vpop.f32.mrb[56].mxu1 }
 0xb26   :  { %v2164_v46 = vadd.f32 %v2116_v17, %v1584_v16  ;;  %v2166_v24 = vadd.f32 %v2157_v10, %v1586_v26  ;;  %v2118_v25 = vpop.f32.mrb[57].mxu0  ;;  %v2159_v11 = vpop.f32.mrb[57].mxu1 }
 0xb27   :  { %v2165_v15 = vadd.f32 %v2118_v25, %v1585_v19  ;;  %v2167_v33 = vadd.f32 %v2159_v11, %v1587_v29  ;;  %v2120_v28 = vpop.f32.mrb[58].mxu0  ;;  %v2161_v60 = vpop.f32.mrb[58].mxu1 }
 0xb28   :  { %v3003_v12 = vmul.f32 -1.442695, %v2164_v46  ;;  %v2121_v18 = vpop.f32.mrb[59].mxu0  ;;  %v2162_v22 = vpop.f32.mrb[59].mxu1  ;;  %v5121_v28 = vld [vmem:[#allocation10_spill] sm:$0xff] }
 0xb29   :  { %v3004_v13 = vmul.f32 -1.442695, %v2165_v15  ;;  %v3005_v4 = vmul.f32 -1.442695, %v2167_v33  ;;  %v5120_v15 = vld [vmem:[#allocation9_spill] sm:$0xff]  ;;  %v1589_v60 = vadd.f32 %v4621_v21, %v5121_v28 }
 0xb2a   :  { %3331 = vpow2.f32 %v3003_v12  ;;  %v1590_v33 = vadd.f32 %v4616_v58, %v5120_v15  ;;  %v5122_v12 = vld [vmem:[#allocation11_spill] sm:$0xff] }
 0xb2b   :  { %3333 = vpow2.f32 %v3004_v13  ;;  %v1591_v18 = vadd.f32 %v4626_v23, %v5122_v12 }
 0xb2c   :  { %3335 = vpow2.f32 %v3005_v4 }
 0xb2d   :  { %3337 = vtanh.f32 %v2166_v24 }
 0xb34   :  { %v3332_v3 = vpop.eup %3331 }
 0xb35   :  { %v3334_v1 = vpop.eup %3333  ;;  %v2171_v50 = vadd.f32 1.0, %v3332_v3 }
 0xb36   :  { %v2177_v27 = vadd.f32 1.0, %v3334_v1  ;;  %v3336_v5 = vpop.eup %3335 }
 0xb37   :  { %3339 = vrcp.f32 %v2171_v50  ;;  %v3338_v16 = vpop.eup %3337  ;;  %v2184_v7 = vadd.f32 1.0, %v3336_v5 }
 0xb38   :  { %3341 = vrcp.f32 %v2177_v27 }
 0xb39   :  { %3343 = vrcp.f32 %v2184_v7 }
 0xb41   :  { %v3340_v26 = vpop.eup %3339 }
 0xb42   :  { %v3342_v20 = vpop.eup %3341  ;;  %v2188_v19 = vmul.f32 %v3340_v26, %v3338_v16 }
 0xb43   :  { %v2187_v29 = vmul.f32 %v3342_v20, %v4682_v57  ;;  %v3344_v10 = vpop.eup %3343  ;;  %v5119_v57 = vld [vmem:[#allocation8_spill] sm:$0xff] }
 0xb44   :  { %v1588_v11 = vadd.f32 %v4611_v55, %v5119_v57 }
 0xb45   :  { %v4728_v17 = vadd.f32 %v2188_v19, %v2187_v29 }
 0xb47   :  { %3345 = vtanh.f32 %v4728_v17 }
 0xb51   :  { %v3346_v46 = vpop.eup %3345 }
 0xb52   :  { %v2191_v25 = vmul.f32 %v3346_v46, %v3344_v10 }
 0xb54   :  { %v2201_v24 = vpack.c.bf16 %v2191_v25, %v2191_v25 }
 0xb56   :  { %2235 = vmatmul.mubr.bf16.vlgmr.msra.gmra.mrb[60].mxu0 %v2201_v24  ;;  %2276 = vmatmul.mubr.bf16.vlgmr.msra.gmra.mrb[60].mxu1 %v2201_v24 }
 0xb57   :  { %2323 = vmatpush1.bf16.msra.mxu0 %v4305_v51  ;;  %2364 = vmatpush1.bf16.msra.mxu1 %v4310_v59 }
 0xb58   :  { %2324 = vmatprep.subr.bf16.mxu0 %v4319_v2  ;;  %2365 = vmatprep.subr.bf16.mxu1 %v4324_v43 }
 0xb59   :  { %2354 = vmatprep.mubr.bf16.mxu0 %v5116_v14  ;;  %2395 = vmatprep.mubr.bf16.mxu1 %v5116_v14 }
 0xb5b   :  { %2325 = vmatpush1.bf16.msra.mxu0 %v4329_v30  ;;  %2366 = vmatpush1.bf16.msra.mxu1 %v4334_v31 }
 0xb5c   :  { %2326 = vmatprep.subr.bf16.mxu0 %v4343_v32  ;;  %2367 = vmatprep.subr.bf16.mxu1 %v4354_v9 }
 0xb5f   :  { %2327 = vmatpush1.bf16.msra.mxu0 %v4348_v8  ;;  %2368 = vmatpush1.bf16.msra.mxu1 %v4359_v49 }
 0xb60   :  { %2328 = vmatprep.subr.bf16.mxu0 %v4366_v61  ;;  %2369 = vmatprep.subr.bf16.mxu1 %v4376_v63 }
 0xb63   :  { %2329 = vmatpush1.bf16.msra.mxu0 %v4371_v62  ;;  %2370 = vmatpush1.bf16.msra.mxu1 %v4382_v35 }
 0xb64   :  { %2330 = vmatprep.subr.bf16.mxu0 %v4390_v0  ;;  %2371 = vmatprep.subr.bf16.mxu1 %v4395_v36 }
 0xb67   :  { %2331 = vmatpush1.bf16.msra.mxu0 %v4401_v6  ;;  %2372 = vmatpush1.bf16.msra.mxu1 %v4406_v38 }
 0xb68   :  { %2332 = vmatprep.subr.bf16.mxu0 %v4414_v40  ;;  %2373 = vmatprep.subr.bf16.mxu1 %v4424_v45 }
 0xb6b   :  { %2333 = vmatpush1.bf16.msra.mxu0 %v4419_v42  ;;  %2374 = vmatpush1.bf16.msra.mxu1 %v4430_v34 }
 0xb6c   :  { %2334 = vmatprep.subr.bf16.mxu0 %v4438_v47  ;;  %2375 = vmatprep.subr.bf16.mxu1 %v4443_v48 }
 0xb6f   :  { %2335 = vmatpush1.bf16.msra.mxu0 %v4449_v52  ;;  %2376 = vmatpush1.bf16.msra.mxu1 %v4454_v41 }
 0xb70   :  { %2336 = vmatprep.subr.bf16.mxu0 %v4462_v39  ;;  %2377 = vmatprep.subr.bf16.mxu1 %v4472_v54 }
 0xb73   :  { %2337 = vmatpush1.bf16.msra.mxu0 %v4467_v53  ;;  %2378 = vmatpush1.bf16.msra.mxu1 %v4478_v56 }
 0xb74   :  { %2442 = vmatprep.subr.bf16.mxu0 %v4295_v37  ;;  %2483 = vmatprep.subr.bf16.mxu1 %v4300_v44 }
 0xc29   :  { %v2236_v22 = vpop.f32.mrb[60].mxu0  ;;  %v2277_v13 = vpop.f32.mrb[60].mxu1 }
 0xc2a   :  { %v2284_v4 = vadd.f32 %v2236_v22, %v1588_v11  ;;  %v2286_v3 = vadd.f32 %v2277_v13, %v1590_v33  ;;  %v2238_v1 = vpop.f32.mrb[61].mxu0  ;;  %v2279_v50 = vpop.f32.mrb[61].mxu1 }
 0xc2b   :  { %v2285_v27 = vadd.f32 %v2238_v1, %v1589_v60  ;;  %v2287_v5 = vadd.f32 %v2279_v50, %v1591_v18  ;;  %v2240_v16 = vpop.f32.mrb[62].mxu0  ;;  %v2281_v26 = vpop.f32.mrb[62].mxu1 }
 0xc2c   :  { %v3006_v20 = vmul.f32 -1.442695, %v2284_v4  ;;  %v2241_v19 = vpop.f32.mrb[63].mxu0  ;;  %v2282_v7 = vpop.f32.mrb[63].mxu1 }
 0xc2d   :  { %v3007_v29 = vmul.f32 -1.442695, %v2285_v27  ;;  %v3008_v10 = vmul.f32 -1.442695, %v2287_v5  ;;  %v4826_v19 = vld [vmem:[%s5086_s1 + $0x100] ss:$16 sps:$4 sm:$0xff]  }
 0xc2e   :  { %3347 = vpow2.f32 %v3006_v20  ;;  %v4832_v7 = vld [vmem:[%s5086_s1 + $0x108] ss:$16 sps:$4 sm:$0xff]  }
 0xc2f   :  { %3349 = vpow2.f32 %v3007_v29  ;;  %v4838_v29 = vld [vmem:[%s5086_s1 + $0x124] ss:$16 sps:$4 sm:$0xff]  }
 0xc30   :  { %3351 = vpow2.f32 %v3008_v10  ;;  %v4844_v10 = vld [vmem:[%s5086_s1 + $0x12c] ss:$16 sps:$4 sm:$0xff]  }
 0xc31   :  { %3353 = vtanh.f32 %v2286_v3 }
 0xc38   :  { %v3348_v46 = vpop.eup %3347 }
 0xc39   :  { %v3350_v25 = vpop.eup %3349  ;;  %v2291_v24 = vadd.f32 1.0, %v3348_v46  ;;  %v4852_v46 = vld [vmem:[%s5086_s1 + $0x120] ss:$16 sps:$4 sm:$0xff]  }
 0xc3a   :  { %v2297_v57 = vadd.f32 1.0, %v3350_v25  ;;  %v3352_v11 = vpop.eup %3351  ;;  %v4858_v25 = vld [vmem:[%s5086_s1 + $0x128] ss:$16 sps:$4 sm:$0xff]  }
 0xc3b   :  { %3355 = vrcp.f32 %v2291_v24  ;;  %v3354_v15 = vpop.eup %3353  ;;  %v2304_v12 = vadd.f32 1.0, %v3352_v11  ;;  %v4864_v24 = vld [vmem:[%s5086_s1 + $0x144] ss:$16 sps:$4 sm:$0xff]   ;;  %v4876_v11 = vld [vmem:[%s5086_s1 + $0x140] ss:$16 sps:$4 sm:$0xff]  }
 0xc3c   :  { %3357 = vrcp.f32 %v2297_v57  ;;  %v4870_v57 = vld [vmem:[%s5086_s1 + $0x14c] ss:$16 sps:$4 sm:$0xff]  }
 0xc3d   :  { %3359 = vrcp.f32 %v2304_v12  ;;  %v4906_v12 = vld [vmem:[%s5086_s1 + $0x168] ss:$16 sps:$4 sm:$0xff]  }
 0xc45   :  { %v3356_v33 = vpop.eup %3355 }
 0xc46   :  { %v3358_v28 = vpop.eup %3357  ;;  %v2308_v60 = vmul.f32 %v3356_v33, %v3354_v15  ;;  %v4882_v15 = vld [vmem:[%s5086_s1 + $0x148] ss:$16 sps:$4 sm:$0xff]   ;;  %v4888_v33 = vld [vmem:[%s5086_s1 + $0x164] ss:$16 sps:$4 sm:$0xff]  }
 0xc47   :  { %v2307_v18 = vmul.f32 %v3358_v28, %v4728_v17  ;;  %v3360_v13 = vpop.eup %3359  ;;  %v4894_v28 = vld [vmem:[%s5086_s1 + $0x16c] ss:$16 sps:$4 sm:$0xff]  }
 0xc49   :  { %v4774_v22 = vadd.f32 %v2308_v60, %v2307_v18  ;;  %v4900_v60 = vld [vmem:[%s5086_s1 + $0x160] ss:$16 sps:$4 sm:$0xff]   ;;  %v4912_v18 = vld [vmem:[%s5086_s1 + $0x184] ss:$16 sps:$4 sm:$0xff]  }
 0xc4b   :  { %3361 = vtanh.f32 %v4774_v22 }
 0xc55   :  { %v3362_v4 = vpop.eup %3361 }
 0xc56   :  { %v2311_v1 = vmul.f32 %v3362_v4, %v3360_v13  ;;  %v4924_v13 = vld [vmem:[%s5086_s1 + $0x180] ss:$16 sps:$4 sm:$0xff]   ;;  %v4930_v4 = vld [vmem:[%s5086_s1 + $0x188] ss:$16 sps:$4 sm:$0xff]  }
 0xc58   :  { %v2321_v3 = vpack.c.bf16 %v2311_v1, %v2311_v1  ;;  %v4936_v1 = vld [vmem:[%s5086_s1 + $0x1a4] ss:$16 sps:$4 sm:$0xff]  }
 0xc5a   :  { %2355 = vmatmul.mubr.bf16.vlgmr.msra.gmra.mrb[64].mxu0 %v2321_v3  ;;  %2396 = vmatmul.mubr.bf16.vlgmr.msra.gmra.mrb[64].mxu1 %v2321_v3  ;;  %v4942_v3 = vld [vmem:[%s5086_s1 + $0x1ac] ss:$16 sps:$4 sm:$0xff]  }
 0xc5b   :  { %2443 = vmatpush1.bf16.msra.mxu0 %v4305_v51  ;;  %2484 = vmatpush1.bf16.msra.mxu1 %v4310_v59  ;;  %v5123_v51 = vld [vmem:[#allocation12_spill] sm:$0xff] }
 0xc5c   :  { %2444 = vmatprep.subr.bf16.mxu0 %v4319_v2  ;;  %2485 = vmatprep.subr.bf16.mxu1 %v4324_v43  ;;  %v1592_v59 = vadd.f32 %v4611_v55, %v5123_v51  ;;  %v5124_v2 = vld [vmem:[#allocation13_spill] sm:$0xff]  ;;  %v4948_v51 = vld [vmem:[%s5086_s1 + $0x1a0] ss:$16 sps:$4 sm:$0xff]  }
 0xc5d   :  { %2474 = vmatprep.mubr.bf16.mxu0 %v5116_v14  ;;  %2515 = vmatprep.mubr.bf16.mxu1 %v5116_v14  ;;  %v1594_v43 = vadd.f32 %v4616_v58, %v5124_v2  ;;  %v4960_v2 = vld [vmem:[%s5086_s1 + $0x1c4] ss:$16 sps:$4 sm:$0xff]  }
 0xc5f   :  { %2445 = vmatpush1.bf16.msra.mxu0 %v4329_v30  ;;  %2486 = vmatpush1.bf16.msra.mxu1 %v4334_v31  ;;  %v5125_v30 = vld [vmem:[#allocation14_spill] sm:$0xff] }
 0xc60   :  { %2446 = vmatprep.subr.bf16.mxu0 %v4343_v32  ;;  %2487 = vmatprep.subr.bf16.mxu1 %v4354_v9  ;;  %v1593_v31 = vadd.f32 %v4621_v21, %v5125_v30  ;;  %v5126_v32 = vld [vmem:[#allocation15_spill] sm:$0xff]  ;;  %v4972_v30 = vld [vmem:[%s5086_s1 + $0x1c0] ss:$16 sps:$4 sm:$0xff]  }
 0xc63   :  { %2447 = vmatpush1.bf16.msra.mxu0 %v4348_v8  ;;  %2488 = vmatpush1.bf16.msra.mxu1 %v4359_v49  ;;  %v1595_v8 = vadd.f32 %v4626_v23, %v5126_v32  ;;  %v4984_v32 = vld [vmem:[%s5086_s1 + $0x1e4] ss:$16 sps:$4 sm:$0xff]  }
 0xc64   :  { %2448 = vmatprep.subr.bf16.mxu0 %v4366_v61  ;;  %2489 = vmatprep.subr.bf16.mxu1 %v4376_v63 }
 0xc67   :  { %2449 = vmatpush1.bf16.msra.mxu0 %v4371_v62  ;;  %2490 = vmatpush1.bf16.msra.mxu1 %v4382_v35 }
 0xc68   :  { %2450 = vmatprep.subr.bf16.mxu0 %v4390_v0  ;;  %2491 = vmatprep.subr.bf16.mxu1 %v4395_v36 }
 0xc6b   :  { %2451 = vmatpush1.bf16.msra.mxu0 %v4401_v6  ;;  %2492 = vmatpush1.bf16.msra.mxu1 %v4406_v38 }
 0xc6c   :  { %2452 = vmatprep.subr.bf16.mxu0 %v4414_v40  ;;  %2493 = vmatprep.subr.bf16.mxu1 %v4424_v45 }
 0xc6f   :  { %2453 = vmatpush1.bf16.msra.mxu0 %v4419_v42  ;;  %2494 = vmatpush1.bf16.msra.mxu1 %v4430_v34 }
 0xc70   :  { %2454 = vmatprep.subr.bf16.mxu0 %v4438_v47  ;;  %2495 = vmatprep.subr.bf16.mxu1 %v4443_v48 }
 0xc73   :  { %2455 = vmatpush1.bf16.msra.mxu0 %v4449_v52  ;;  %2496 = vmatpush1.bf16.msra.mxu1 %v4454_v41 }
 0xc74   :  { %2456 = vmatprep.subr.bf16.mxu0 %v4462_v39  ;;  %2497 = vmatprep.subr.bf16.mxu1 %v4472_v54 }
 0xc77   :  { %2457 = vmatpush1.bf16.msra.mxu0 %v4467_v53  ;;  %2498 = vmatpush1.bf16.msra.mxu1 %v4478_v56 }
 0xc78   :  { %2562 = vmatprep.subr.bf16.mxu0 %v4295_v37  ;;  %2603 = vmatprep.subr.bf16.mxu1 %v4300_v44 }
 0xd2d   :  { %v2356_v9 = vpop.f32.mrb[64].mxu0  ;;  %v2397_v49 = vpop.f32.mrb[64].mxu1 }
 0xd2e   :  { %v2404_v61 = vadd.f32 %v2356_v9, %v1592_v59  ;;  %v2406_v62 = vadd.f32 %v2397_v49, %v1594_v43  ;;  %v2358_v63 = vpop.f32.mrb[65].mxu0  ;;  %v2399_v37 = vpop.f32.mrb[65].mxu1  ;;  %v4954_v59 = vld [vmem:[%s5086_s1 + $0x1a8] ss:$16 sps:$4 sm:$0xff]   ;;  %v4966_v43 = vld [vmem:[%s5086_s1 + $0x1cc] ss:$16 sps:$4 sm:$0xff]  }
 0xd2f   :  { %v2405_v35 = vadd.f32 %v2358_v63, %v1593_v31  ;;  %v2407_v44 = vadd.f32 %v2399_v37, %v1595_v8  ;;  %v2360_v0 = vpop.f32.mrb[66].mxu0  ;;  %v2401_v36 = vpop.f32.mrb[66].mxu1  ;;  %v4978_v31 = vld [vmem:[%s5086_s1 + $0x1c8] ss:$16 sps:$4 sm:$0xff]   ;;  %v4990_v8 = vld [vmem:[%s5086_s1 + $0x1ec] ss:$16 sps:$4 sm:$0xff]  }
 0xd30   :  { %v3009_v6 = vmul.f32 -1.442695, %v2404_v61  ;;  %v2361_v38 = vpop.f32.mrb[67].mxu0  ;;  %v2402_v40 = vpop.f32.mrb[67].mxu1  ;;  %v4996_v9 = vld [vmem:[%s5086_s1 + $0x1e0] ss:$16 sps:$4 sm:$0xff]  }
 0xd31   :  { %v3010_v42 = vmul.f32 -1.442695, %v2405_v35  ;;  %v3011_v45 = vmul.f32 -1.442695, %v2407_v44  ;;  %v5002_v49 = vld [vmem:[%s5086_s1 + $0x1e8] ss:$16 sps:$4 sm:$0xff]  }
 0xd32   :  { %3363 = vpow2.f32 %v3009_v6  ;;  %v3489_v61 = vld [vmem:[%s5086_s1 + $0x104] ss:$16 sps:$4 sm:$0xff]   ;;  %v5128_v35 = vld [vmem:[#allocation17_spill] sm:$0xff]  ;;  %v5130_v6 = vld [vmem:[#allocation19_spill] sm:$0xff] }
 0xd33   :  { %3365 = vpow2.f32 %v3010_v42  ;;  %v5127_v63 = vld [vmem:[#allocation16_spill] sm:$0xff]  ;;  %v1598_v44 = vadd.f32 %v4616_v58, %v5128_v35  ;;  %v5129_v0 = vld [vmem:[#allocation18_spill] sm:$0xff]  ;;  %v1599_v38 = vadd.f32 %v4626_v23, %v5130_v6 }
 0xd34   :  { %3367 = vpow2.f32 %v3011_v45  ;;  %v1596_v37 = vadd.f32 %v4611_v55, %v5127_v63  ;;  %v1597_v36 = vadd.f32 %v4621_v21, %v5129_v0 }
 0xd35   :  { %3369 = vtanh.f32 %v2406_v62  ;;  %v3490_v62 = vld [vmem:[%s5086_s1 + $0x10c] ss:$16 sps:$4 sm:$0xff]  }
 0xd3c   :  { %v3364_v34 = vpop.eup %3363 }
 0xd3d   :  { %v3366_v47 = vpop.eup %3365  ;;  %v2411_v48 = vadd.f32 1.0, %v3364_v34 }
 0xd3e   :  { %v2417_v52 = vadd.f32 1.0, %v3366_v47  ;;  %v3368_v41 = vpop.eup %3367 }
 0xd3f   :  { %3371 = vrcp.f32 %v2411_v48  ;;  %v3370_v39 = vpop.eup %3369  ;;  %v2424_v17 = vadd.f32 1.0, %v3368_v41 }
 0xd40   :  { %3373 = vrcp.f32 %v2417_v52 }
 0xd41   :  { %3375 = vrcp.f32 %v2424_v17 }
 0xd49   :  { %v3372_v53 = vpop.eup %3371 }
 0xd4a   :  { %v3374_v54 = vpop.eup %3373  ;;  %v2428_v56 = vmul.f32 %v3372_v53, %v3370_v39 }
 0xd4b   :  { %v2427_v50 = vmul.f32 %v3374_v54, %v4774_v22  ;;  %v3376_v5 = vpop.eup %3375  ;;  %v4918_v22 = vld [vmem:[%s5086_s1 + $0x18c] ss:$16 sps:$4 sm:$0xff]  }
 0xd4d   :  { %v4820_v27 = vadd.f32 %v2428_v56, %v2427_v50 }
 0xd4f   :  { %3377 = vtanh.f32 %v4820_v27 }
 0xd59   :  { %v3378_v16 = vpop.eup %3377 }
 0xd5a   :  { %v2431_v26 = vmul.f32 %v3378_v16, %v3376_v5 }
 0xd5c   :  { %v2441_v20 = vpack.c.bf16 %v2431_v26, %v2431_v26 }
 0xd5e   :  { %2475 = vmatmul.mubr.bf16.vlgmr.msra.gmra.mrb[68].mxu0 %v2441_v20  ;;  %2516 = vmatmul.mubr.bf16.vlgmr.msra.gmra.mrb[68].mxu1 %v2441_v20 }
 0xd5f   :  { %2563 = vmatpush1.bf16.msra.mxu0 %v4826_v19  ;;  %2604 = vmatpush1.bf16.msra.mxu1 %v4832_v7 }
 0xd60   :  { %2564 = vmatprep.subr.bf16.mxu0 %v4838_v29  ;;  %2605 = vmatprep.subr.bf16.mxu1 %v4844_v10 }
 0xd61   :  { %2594 = vmatprep.mubr.bf16.mxu0 %v5116_v14  ;;  %2635 = vmatprep.mubr.bf16.mxu1 %v5116_v14 }
 0xd63   :  { %2565 = vmatpush1.bf16.msra.mxu0 %v4852_v46  ;;  %2606 = vmatpush1.bf16.msra.mxu1 %v4858_v25 }
 0xd64   :  { %2566 = vmatprep.subr.bf16.mxu0 %v4864_v24  ;;  %2607 = vmatprep.subr.bf16.mxu1 %v4870_v57 }
 0xd67   :  { %2567 = vmatpush1.bf16.msra.mxu0 %v4876_v11  ;;  %2608 = vmatpush1.bf16.msra.mxu1 %v4882_v15 }
 0xd68   :  { %2568 = vmatprep.subr.bf16.mxu0 %v4888_v33  ;;  %2609 = vmatprep.subr.bf16.mxu1 %v4894_v28 }
 0xd6b   :  { %2569 = vmatpush1.bf16.msra.mxu0 %v4900_v60  ;;  %2610 = vmatpush1.bf16.msra.mxu1 %v4906_v12 }
 0xd6c   :  { %2570 = vmatprep.subr.bf16.mxu0 %v4912_v18  ;;  %2611 = vmatprep.subr.bf16.mxu1 %v4918_v22 }
 0xd6f   :  { %2571 = vmatpush1.bf16.msra.mxu0 %v4924_v13  ;;  %2612 = vmatpush1.bf16.msra.mxu1 %v4930_v4 }
 0xd70   :  { %2572 = vmatprep.subr.bf16.mxu0 %v4936_v1  ;;  %2613 = vmatprep.subr.bf16.mxu1 %v4942_v3 }
 0xd73   :  { %2573 = vmatpush1.bf16.msra.mxu0 %v4948_v51  ;;  %2614 = vmatpush1.bf16.msra.mxu1 %v4954_v59 }
 0xd74   :  { %2574 = vmatprep.subr.bf16.mxu0 %v4960_v2  ;;  %2615 = vmatprep.subr.bf16.mxu1 %v4966_v43 }
 0xd77   :  { %2575 = vmatpush1.bf16.msra.mxu0 %v4972_v30  ;;  %2616 = vmatpush1.bf16.msra.mxu1 %v4978_v31 }
 0xd78   :  { %2576 = vmatprep.subr.bf16.mxu0 %v4984_v32  ;;  %2617 = vmatprep.subr.bf16.mxu1 %v4990_v8 }
 0xd7b   :  { %2577 = vmatpush1.bf16.msra.mxu0 %v4996_v9  ;;  %2618 = vmatpush1.bf16.msra.mxu1 %v5002_v49 }
 0xd7c   :  { %2682 = vmatprep.subr.bf16.mxu0 %v3489_v61  ;;  %2723 = vmatprep.subr.bf16.mxu1 %v3490_v62 }
 0xe31   :  { %v2476_v40 = vpop.f32.mrb[68].mxu0  ;;  %v2517_v42 = vpop.f32.mrb[68].mxu1 }
 0xe32   :  { %v2524_v45 = vadd.f32 %v2476_v40, %v1596_v37  ;;  %v2526_v34 = vadd.f32 %v2517_v42, %v1598_v44  ;;  %v2478_v47 = vpop.f32.mrb[69].mxu0  ;;  %v2519_v48 = vpop.f32.mrb[69].mxu1 }
 0xe33   :  { %v2525_v52 = vadd.f32 %v2478_v47, %v1597_v36  ;;  %v2527_v41 = vadd.f32 %v2519_v48, %v1599_v38  ;;  %v2480_v39 = vpop.f32.mrb[70].mxu0  ;;  %v2521_v53 = vpop.f32.mrb[70].mxu1 }
 0xe34   :  { %v3012_v54 = vmul.f32 -1.442695, %v2524_v45  ;;  %v2481_v56 = vpop.f32.mrb[71].mxu0  ;;  %v2522_v17 = vpop.f32.mrb[71].mxu1  ;;  %v3492_v53 = vld [vmem:[%s5091_s3 + $0x10] sm:$0xff] }
 0xe35   :  { %v3013_v50 = vmul.f32 -1.442695, %v2525_v52  ;;  %v3014_v5 = vmul.f32 -1.442695, %v2527_v41  ;;  %v3491_v52 = vld [vmem:[%s5091_s3] sm:$0xff]  ;;  %v5135_v41 = vld [vmem:[#allocation24_spill] sm:$0xff] }
 0xe36   :  { %3379 = vpow2.f32 %v3012_v54  ;;  %v1604_v39 = vadd.f32 %v3491_v52, %v5135_v41  ;;  %v5136_v54 = vld [vmem:[#allocation25_spill] sm:$0xff]  ;;  %v3493_v17 = vld [vmem:[%s5091_s3 + $0x8] sm:$0xff] }
 0xe37   :  { %3381 = vpow2.f32 %v3013_v50  ;;  %v1606_v56 = vadd.f32 %v3492_v53, %v5136_v54  ;;  %v5137_v50 = vld [vmem:[#allocation26_spill] sm:$0xff] }
 0xe38   :  { %3383 = vpow2.f32 %v3014_v5  ;;  %v1605_v5 = vadd.f32 %v3493_v17, %v5137_v50 }
 0xe39   :  { %3385 = vtanh.f32 %v2526_v34 }
 0xe40   :  { %v3380_v16 = vpop.eup %3379 }
 0xe41   :  { %v3382_v26 = vpop.eup %3381  ;;  %v2531_v20 = vadd.f32 1.0, %v3380_v16  ;;  %v3494_v16 = vld [vmem:[%s5091_s3 + $0x18] sm:$0xff] }
 0xe42   :  { %v2537_v61 = vadd.f32 1.0, %v3382_v26  ;;  %v3384_v62 = vpop.eup %3383  ;;  %v5138_v26 = vld [vmem:[#allocation27_spill] sm:$0xff] }
 0xe43   :  { %3387 = vrcp.f32 %v2531_v20  ;;  %v3386_v63 = vpop.eup %3385  ;;  %v2544_v0 = vadd.f32 1.0, %v3384_v62  ;;  %v1607_v20 = vadd.f32 %v3494_v16, %v5138_v26 }
 0xe44   :  { %3389 = vrcp.f32 %v2537_v61 }
 0xe45   :  { %3391 = vrcp.f32 %v2544_v0 }
 0xe4d   :  { %v3388_v37 = vpop.eup %3387 }
 0xe4e   :  { %v3390_v35 = vpop.eup %3389  ;;  %v2548_v44 = vmul.f32 %v3388_v37, %v3386_v63 }
 0xe4f   :  { %v2547_v36 = vmul.f32 %v3390_v35, %v4820_v27  ;;  %v3392_v38 = vpop.eup %3391 }
 0xe51   :  { %v5020_v6 = vadd.f32 %v2548_v44, %v2547_v36 }
 0xe53   :  { %3393 = vtanh.f32 %v5020_v6 }
 0xe5d   :  { %v3394_v40 = vpop.eup %3393 }
 0xe5e   :  { %v2551_v42 = vmul.f32 %v3394_v40, %v3392_v38 }
 0xe60   :  { %v2561_v45 = vpack.c.bf16 %v2551_v42, %v2551_v42 }
 0xe62   :  { %2595 = vmatmul.mubr.bf16.vlgmr.msra.gmra.mrb[72].mxu0 %v2561_v45  ;;  %2636 = vmatmul.mubr.bf16.vlgmr.msra.gmra.mrb[72].mxu1 %v2561_v45 }
 0xe63   :  { %2683 = vmatpush1.bf16.msra.mxu0 %v4826_v19  ;;  %2724 = vmatpush1.bf16.msra.mxu1 %v4832_v7  ;;  %v5132_v19 = vld [vmem:[#allocation21_spill] sm:$0xff] }
 0xe64   :  { %2684 = vmatprep.subr.bf16.mxu0 %v4838_v29  ;;  %2725 = vmatprep.subr.bf16.mxu1 %v4844_v10  ;;  %v1602_v7 = vadd.f32 %v4616_v58, %v5132_v19  ;;  %v5133_v29 = vld [vmem:[#allocation22_spill] sm:$0xff] }
 0xe65   :  { %2714 = vmatprep.mubr.bf16.mxu0 %v5116_v14  ;;  %2755 = vmatprep.mubr.bf16.mxu1 %v5116_v14  ;;  %v5131_v14 = vld [vmem:[#allocation20_spill] sm:$0xff]  ;;  %v1601_v10 = vadd.f32 %v4621_v21, %v5133_v29 }
 0xe66   :  { %v1600_v27 = vadd.f32 %v4611_v55, %v5131_v14 }
 0xe67   :  { %2685 = vmatpush1.bf16.msra.mxu0 %v4852_v46  ;;  %2726 = vmatpush1.bf16.msra.mxu1 %v4858_v25  ;;  %v5134_v46 = vld [vmem:[#allocation23_spill] sm:$0xff] }
 0xe68   :  { %2686 = vmatprep.subr.bf16.mxu0 %v4864_v24  ;;  %2727 = vmatprep.subr.bf16.mxu1 %v4870_v57  ;;  %v1603_v25 = vadd.f32 %v4626_v23, %v5134_v46 }
 0xe6b   :  { %2687 = vmatpush1.bf16.msra.mxu0 %v4876_v11  ;;  %2728 = vmatpush1.bf16.msra.mxu1 %v4882_v15 }
 0xe6c   :  { %2688 = vmatprep.subr.bf16.mxu0 %v4888_v33  ;;  %2729 = vmatprep.subr.bf16.mxu1 %v4894_v28 }
 0xe6f   :  { %2689 = vmatpush1.bf16.msra.mxu0 %v4900_v60  ;;  %2730 = vmatpush1.bf16.msra.mxu1 %v4906_v12 }
 0xe70   :  { %2690 = vmatprep.subr.bf16.mxu0 %v4912_v18  ;;  %2731 = vmatprep.subr.bf16.mxu1 %v4918_v22 }
 0xe73   :  { %2691 = vmatpush1.bf16.msra.mxu0 %v4924_v13  ;;  %2732 = vmatpush1.bf16.msra.mxu1 %v4930_v4 }
 0xe74   :  { %2692 = vmatprep.subr.bf16.mxu0 %v4936_v1  ;;  %2733 = vmatprep.subr.bf16.mxu1 %v4942_v3 }
 0xe77   :  { %2693 = vmatpush1.bf16.msra.mxu0 %v4948_v51  ;;  %2734 = vmatpush1.bf16.msra.mxu1 %v4954_v59 }
 0xe78   :  { %2694 = vmatprep.subr.bf16.mxu0 %v4960_v2  ;;  %2735 = vmatprep.subr.bf16.mxu1 %v4966_v43 }
 0xe7b   :  { %2695 = vmatpush1.bf16.msra.mxu0 %v4972_v30  ;;  %2736 = vmatpush1.bf16.msra.mxu1 %v4978_v31 }
 0xe7c   :  { %2696 = vmatprep.subr.bf16.mxu0 %v4984_v32  ;;  %2737 = vmatprep.subr.bf16.mxu1 %v4990_v8 }
 0xe7f   :  { %2697 = vmatpush1.bf16.msra.mxu0 %v4996_v9  ;;  %2738 = vmatpush1.bf16.msra.mxu1 %v5002_v49 }
 0xf35   :  { %v2596_v24 = vpop.f32.mrb[72].mxu0  ;;  %v2637_v57 = vpop.f32.mrb[72].mxu1 }
 0xf36   :  { %v2644_v11 = vadd.f32 %v2596_v24, %v1600_v27  ;;  %v2646_v15 = vadd.f32 %v2637_v57, %v1602_v7  ;;  %v2598_v33 = vpop.f32.mrb[73].mxu0  ;;  %v2639_v28 = vpop.f32.mrb[73].mxu1 }
 0xf37   :  { %v2645_v60 = vadd.f32 %v2598_v33, %v1601_v10  ;;  %v2647_v12 = vadd.f32 %v2639_v28, %v1603_v25  ;;  %v2600_v18 = vpop.f32.mrb[74].mxu0  ;;  %v2641_v22 = vpop.f32.mrb[74].mxu1 }
 0xf38   :  { %v3015_v55 = vmul.f32 -1.442695, %v2644_v11  ;;  %v2601_v13 = vpop.f32.mrb[75].mxu0  ;;  %v2642_v4 = vpop.f32.mrb[75].mxu1 }
 0xf39   :  { %v3016_v58 = vmul.f32 -1.442695, %v2645_v60  ;;  %v3017_v21 = vmul.f32 -1.442695, %v2647_v12 }
 0xf3a   :  { %3395 = vpow2.f32 %v3015_v55 }
 0xf3b   :  { %3397 = vpow2.f32 %v3016_v58 }
 0xf3c   :  { %3399 = vpow2.f32 %v3017_v21 }
 0xf3d   :  { %3401 = vtanh.f32 %v2646_v15 }
 0xf44   :  { %v3396_v1 = vpop.eup %3395 }
 0xf45   :  { %v3398_v3 = vpop.eup %3397  ;;  %v2651_v23 = vadd.f32 1.0, %v3396_v1 }
 0xf46   :  { %v2657_v51 = vadd.f32 1.0, %v3398_v3  ;;  %v3400_v59 = vpop.eup %3399 }
 0xf47   :  { %3403 = vrcp.f32 %v2651_v23  ;;  %v3402_v2 = vpop.eup %3401  ;;  %v2664_v32 = vadd.f32 1.0, %v3400_v59 }
 0xf48   :  { %3405 = vrcp.f32 %v2657_v51 }
 0xf49   :  { %3407 = vrcp.f32 %v2664_v32 }
 0xf51   :  { %v3404_v43 = vpop.eup %3403 }
 0xf52   :  { %v3406_v30 = vpop.eup %3405  ;;  %v2668_v31 = vmul.f32 %v3404_v43, %v3402_v2 }
 0xf53   :  { %v2667_v8 = vmul.f32 %v3406_v30, %v5020_v6  ;;  %v3408_v49 = vpop.eup %3407 }
 0xf55   :  { %v2669_v9 = vadd.f32 %v2668_v31, %v2667_v8 }
 0xf57   :  { %3409 = vtanh.f32 %v2669_v9 }
 0xf61   :  { %v3410_v34 = vpop.eup %3409 }
 0xf62   :  { %v2671_v47 = vmul.f32 %v3410_v34, %v3408_v49 }
 0xf64   :  { %v2681_v48 = vpack.c.bf16 %v2671_v47, %v2671_v47 }
 0xf66   :  { %2715 = vmatmul.mubr.bf16.vlgmr.msra.gmra.mrb[76].mxu0 %v2681_v48  ;;  %2756 = vmatmul.mubr.bf16.vlgmr.msra.gmra.mrb[76].mxu1 %v2681_v48 }
0x1039   :  { %v2716_v61 = vpop.f32.mrb[76].mxu0  ;;  %v2757_v62 = vpop.f32.mrb[76].mxu1 }
0x103a   :  { %v2764_v63 = vadd.f32 %v2716_v61, %v1604_v39  ;;  %v2766_v37 = vadd.f32 %v2757_v62, %v1606_v56  ;;  %v2718_v35 = vpop.f32.mrb[77].mxu0  ;;  %v2759_v44 = vpop.f32.mrb[77].mxu1 }
0x103b   :  { %v2765_v0 = vadd.f32 %v2718_v35, %v1605_v5  ;;  %v2767_v36 = vadd.f32 %v2759_v44, %v1607_v20  ;;  %v2720_v6 = vpop.f32.mrb[78].mxu0  ;;  %v2761_v38 = vpop.f32.mrb[78].mxu1 }
0x103c   :  { %v3018_v40 = vmul.f32 -1.442695, %v2764_v63  ;;  %v2721_v42 = vpop.f32.mrb[79].mxu0  ;;  %v2762_v45 = vpop.f32.mrb[79].mxu1 }
0x103d   :  { %v3019_v14 = vmul.f32 -1.442695, %v2765_v0  ;;  %v3020_v27 = vmul.f32 -1.442695, %v2767_v36 }
0x103e   :  { %3411 = vpow2.f32 %v3018_v40 }
0x103f   :  { %3413 = vpow2.f32 %v3019_v14 }
0x1040   :  { %3415 = vpow2.f32 %v3020_v27 }
0x1041   :  { %3417 = vtanh.f32 %v2766_v37 }
0x1048   :  { %v3412_v19 = vpop.eup %3411 }
0x1049   :  { %v3414_v7 = vpop.eup %3413  ;;  %v2771_v29 = vadd.f32 1.0, %v3412_v19 }
0x104a   :  { %v2777_v10 = vadd.f32 1.0, %v3414_v7  ;;  %v3416_v46 = vpop.eup %3415 }
0x104b   :  { %3419 = vrcp.f32 %v2771_v29  ;;  %v3418_v25 = vpop.eup %3417  ;;  %v2784_v15 = vadd.f32 1.0, %v3416_v46 }
0x104c   :  { %3421 = vrcp.f32 %v2777_v10 }
0x104d   :  { %3423 = vrcp.f32 %v2784_v15 }
0x1055   :  { %v3420_v24 = vpop.eup %3419 }
0x1056   :  { %v3422_v57 = vpop.eup %3421  ;;  %v2788_v11 = vmul.f32 %v3420_v24, %v3418_v25 }
0x1057   :  { %v2787_v33 = vmul.f32 %v3422_v57, %v2669_v9  ;;  %v3424_v60 = vpop.eup %3423 }
0x1059   :  { %v2789_v28 = vadd.f32 %v2788_v11, %v2787_v33 }
0x105b   :  { %3425 = vtanh.f32 %v2789_v28  ;;  %2804 = vst [vmem:[%s5089_s5 + $0x8] sm:$0xff] %v2789_v28 }
0x1065   :  { %v3426_v12 = vpop.eup %3425 }
0x1066   :  { %v2791_v18 = vmul.f32 %v3426_v12, %v3424_v60 }
0x1068   :  { %2800 = vst [vmem:[%s5090_s4 + $0x8] sm:$0xff] %v2791_v18 }

</bundles_post_ra>
